<compile_context>
chip_gen: v7x
topology: tpu7x:2x2x1
jax: 0.10.0
libtpu: 0.0.40
codegen_flags: <defaults>
</compile_context>

<pallas_src>
import functools
import math

import jax
import jax.numpy as jnp
from jax import lax
from jax.experimental import pallas as pl
from jax.experimental.pallas import tpu as pltpu


# ----------------------------------------------------------------------------
# Fused attention kernel
# ----------------------------------------------------------------------------
def _attn_kernel(*refs, num_heads, has_sr, eps, kv_per_tile, tq):
    if has_sr:
        (x_ref, src_ref, srw_ref, srb_ref, lng_ref, lnb_ref,
         qw_ref, kvw_ref, pw_ref, pb_ref, o_ref, kv_scr, q_scr) = refs
    else:
        (src_ref, qw_ref, kvw_ref, pw_ref, pb_ref, o_ref, kv_scr, q_scr) = refs

    C = qw_ref.shape[0]
    hd = C // num_heads

    # ---- kv side: [sr-conv (patch matmul) + LayerNorm +] kv projection -----
    def compute_kv():
        src = src_ref[0]                                     # (Nk, P)/(N, C) bf16
        if has_sr:
            y = jnp.dot(src, srw_ref[...],
                        preferred_element_type=jnp.float32)  # (Nk, C) f32
            y = y + srb_ref[0]
            mu = jnp.mean(y, axis=-1, keepdims=True)
            var = jnp.mean((y - mu) * (y - mu), axis=-1, keepdims=True)
            yn = (y - mu) * lax.rsqrt(var + eps)
            xkv = (yn * lng_ref[0] + lnb_ref[0]).astype(jnp.bfloat16)
        else:
            xkv = src
        kv_scr[...] = jnp.dot(xkv, kvw_ref[...],
                              preferred_element_type=jnp.float32
                              ).astype(jnp.bfloat16)         # (Nk, 2C)

    if kv_per_tile:
        # Recomputed every q-tile so both grid axes can be "parallel"
        # (v7x megacore utilization at small B).  Cheap when Nk is small.
        compute_kv()
    else:
        # Per-batch cache: only valid because the q-tile axis is innermost and
        # "arbitrary" (sequential per batch) -- see dimension_semantics below.
        @pl.when(pl.program_id(1) == 0)
        def _():
            compute_kv()

    # ---- q side: this query tile (scale already folded into q_w) -----------
    if has_sr:
        x = x_ref[0]                                          # (TQ, C) bf16
    else:
        # x IS the resident kv-source slab: slice the q tile out of it in VMEM
        # instead of DMA'ing x a second time.
        start = pl.multiple_of(pl.program_id(1) * tq, tq)
        x = src_ref[0, pl.ds(start, tq), :]                   # (TQ, C) bf16
    q_scr[...] = jnp.dot(x, qw_ref[...],
                         preferred_element_type=jnp.float32).astype(jnp.bfloat16)

    # ---- per-head attention; sum-of-matmuls into the output projection -----
    # Every head slice below is a *static* narrow load from a VMEM ref
    # (vld slot, not XLU lane shuffles), and the accumulation chain bounds the
    # live range of each per-head output.
    acc = jnp.zeros((tq, C), jnp.float32)
    for h in range(num_heads):                                # static head loop
        lo = h * hd
        qh = q_scr[:, lo:lo + hd]                             # (TQ, hd) bf16
        kh = kv_scr[:, lo:lo + hd]                             # (Nk, hd) bf16
        vh = kv_scr[:, C + lo:C + lo + hd]                     # (Nk, hd) bf16
        s = lax.dot_general(qh, kh, (((1,), (1,)), ((), ())),
                            preferred_element_type=jnp.float32)   # (TQ, Nk)
        s = s - jnp.max(s, axis=-1, keepdims=True)
        p = jnp.exp(s)
        inv_l = pl.reciprocal(jnp.sum(p, axis=-1, keepdims=True), approx=True)
        oh = jnp.dot(p.astype(jnp.bfloat16), vh,
                     preferred_element_type=jnp.float32) * inv_l  # (TQ, hd)
        acc = acc + jnp.dot(oh.astype(jnp.bfloat16), pw_ref[lo:lo + hd, :],
                            preferred_element_type=jnp.float32)
    o_ref[0] = (acc + pb_ref[0]).astype(o_ref.dtype)


# ----------------------------------------------------------------------------
# Generation-aware VMEM budgeting and query-tile selection
# ----------------------------------------------------------------------------
def _vmem_cap_bytes():
    """Usable scoped-VMEM cap with headroom for compiler scratch/semaphores."""
    try:
        cap = int(pltpu.get_tpu_info().vmem_capacity_bytes)
    except Exception:  # not on TPU / API unavailable: assume the small (v7x) VMEM
        cap = 64 << 20
    # ~48 MiB on a 64 MiB (v7x) part, ~96 MiB on 128 MiB parts (v5e/v6e).
    return min((cap * 3) // 4, 100 << 20)


def _vmem_estimate(tq, Nk, N, C, P, has_sr, out_bytes):
    """Rough per-step VMEM footprint of the fused kernel (bytes)."""
    bf, f4 = 2, 4
    # resident (single-buffered) operands
    est = C * C * bf + C * 2 * C * bf + C * C * bf + C * f4        # q/kv/proj w + b
    if has_sr:
        est += P * C * bf + 3 * C * f4                             # sr_w + LN params
        est += Nk * P * bf                                         # patch slab
        est += 2 * tq * C * bf                                     # x tile (dbuf)
    else:
        est += N * C * bf                                          # x / kv-source slab
    est += 2 * tq * C * out_bytes                                  # out tile (dbuf)
    est += Nk * 2 * C * bf + tq * C * bf                           # kv_scr + q_scr
    # in-kernel temporaries: q/acc f32, score+exp f32, kv-compute f32
    est += 2 * tq * C * f4 + 3 * tq * Nk * f4 + Nk * 2 * C * f4
    if has_sr:
        est += 3 * Nk * C * f4
    return est


def _pick_tq(N, fits):
    """Largest query tile dividing N (or N itself) that fits the VMEM budget,
    preferring bf16/MXU-friendly multiples of 16 (covers 128/256)."""
    cands = {N} | {t for t in range(8, min(N, 1024) + 1, 8) if N % t == 0}
    for t in sorted(cands, key=lambda t: (t % 16 == 0, t), reverse=True):
        if fits(t):
            return t
    return min(cands)


# ----------------------------------------------------------------------------
# pallas_call wrapper
# ----------------------------------------------------------------------------
def attention_pallas(x_bf, kv_src_bf, params_bf, *, num_heads, has_sr, tq,
                     kv_per_tile, out_dtype, single_buffer, eps=1e-5):
    B, N, C = x_bf.shape
    _, Nk, P = kv_src_bf.shape
    assert N % tq == 0 and (tq % 8 == 0 or tq == N)
    nQ = N // tq

    def res_spec(shape, imap):
        """Resident operand: constant/per-batch index -> single-buffered."""
        if single_buffer:
            try:
                return pl.BlockSpec(shape, imap, pipeline_mode=pl.Buffered(1))
            except Exception:
                pass
        return pl.BlockSpec(shape, imap)

    kernel = functools.partial(_attn_kernel, num_heads=num_heads, has_sr=has_sr,
                               eps=eps, kv_per_tile=kv_per_tile, tq=tq)

    in_specs, inputs = [], []
    if has_sr:
        in_specs.append(pl.BlockSpec((1, tq, C), lambda b, qi: (b, qi, 0)))  # x tile
        inputs.append(x_bf)
    # kv-source slab, resident per batch (for sr=1 it is also the q source)
    in_specs.append(res_spec((1, Nk, P), lambda b, qi: (b, 0, 0)))
    inputs.append(kv_src_bf)
    if has_sr:
        in_specs += [res_spec((P, C), lambda b, qi: (0, 0)),       # sr_w
                     res_spec((1, C), lambda b, qi: (0, 0)),       # sr_b
                     res_spec((1, C), lambda b, qi: (0, 0)),       # ln_g
                     res_spec((1, C), lambda b, qi: (0, 0))]       # ln_b
        inputs += [params_bf["sr_w"], params_bf["sr_b"],
                   params_bf["ln_g"], params_bf["ln_b"]]
    in_specs += [res_spec((C, C), lambda b, qi: (0, 0)),           # q_w (pre-scaled)
                 res_spec((C, 2 * C), lambda b, qi: (0, 0)),       # kv_w
                 res_spec((C, C), lambda b, qi: (0, 0)),           # proj_w
                 res_spec((1, C), lambda b, qi: (0, 0))]           # proj_b
    inputs += [params_bf["q_w"], params_bf["kv_w"],
               params_bf["proj_w"], params_bf["proj_b"]]

    out_bytes = jnp.dtype(out_dtype).itemsize
    cap = _vmem_cap_bytes()
    est = _vmem_estimate(tq, Nk, N, C, P, has_sr, out_bytes)
    vmem_limit = int(min(cap, max(2 * est, 32 << 20)))

    # kv cache carried across the q-tile axis -> that axis must stay
    # "arbitrary" (and innermost).  kv_per_tile removes the carry so both axes
    # can be sharded across TensorCores (v7x megacore).
    sem = ("parallel", "parallel") if kv_per_tile else ("parallel", "arbitrary")

    return pl.pallas_call(
        kernel,
        out_shape=jax.ShapeDtypeStruct((B, N, C), out_dtype),
        grid_spec=pltpu.PrefetchScalarGridSpec(
            num_scalar_prefetch=0,
            grid=(B, nQ),
            in_specs=in_specs,
            out_specs=pl.BlockSpec((1, tq, C), lambda b, qi: (b, qi, 0)),
            scratch_shapes=[pltpu.VMEM((Nk, 2 * C), jnp.bfloat16),   # kv cache
                            pltpu.VMEM((tq, C), jnp.bfloat16)],      # staged q
        ),
        compiler_params=pltpu.CompilerParams(
            dimension_semantics=sem,
            vmem_limit_bytes=vmem_limit,
        ),
    )(*inputs)


# ----------------------------------------------------------------------------
# Host-side glue: parameter prep, patchify, module-level forward
# ----------------------------------------------------------------------------
def _patchify(x, H, W, sr):
    """(B, H*W, C) -> (B, Hs*Ws, sr*sr*C) patches; channel stays minor dim."""
    B, N, C = x.shape
    Hs, Ws = H // sr, W // sr
    p = x.reshape(B, Hs, sr, Ws, sr, C)
    p = jnp.transpose(p, (0, 1, 3, 2, 4, 5))
    return p.reshape(B, Hs * Ws, sr * sr * C)


def init_attention_params(key, dim, num_heads, sr_ratio, dtype=jnp.float32):
    ks = jax.random.split(key, 4)
    params = {
        # stored as (in, out) so kernels do  y = x @ W  (== PyTorch x @ W.T)
        "q_w": (0.02 * jax.random.normal(ks[0], (dim, dim))).astype(dtype),
        "kv_w": (0.02 * jax.random.normal(ks[1], (dim, 2 * dim))).astype(dtype),
        "proj_w": (0.02 * jax.random.normal(ks[2], (dim, dim))).astype(dtype),
        "proj_b": jnp.zeros((1, dim), dtype),
    }
    if sr_ratio > 1:
        fan_out = sr_ratio * sr_ratio * dim
        std = math.sqrt(2.0 / fan_out)
        # Conv2d weight (out=dim, in=dim, sr, sr) flattened to (sr*sr*in, out)
        # with (dy, dx, c_in) ordering, matching _patchify's layout.
        w_conv = std * jax.random.normal(ks[3], (dim, dim, sr_ratio, sr_ratio))
        w_flat = jnp.transpose(w_conv, (2, 3, 1, 0)).reshape(
            sr_ratio * sr_ratio * dim, dim)
        params.update({
            "sr_w": w_flat.astype(dtype),
            "sr_b": jnp.zeros((1, dim), dtype),
            "ln_g": jnp.ones((1, dim), dtype),
            "ln_b": jnp.zeros((1, dim), dtype),
        })
    return params


def prepare_attention_params(params, *, num_heads, sr_ratio, qk_scale=None):
    """One-time host-side transform: fold the attention scale into q_w and
    cast the matmul weights to bf16 (MXU operands).  Biases/LN stay f32."""
    C = params["q_w"].shape[0]
    hd = C // num_heads
    scale = qk_scale if qk_scale is not None else hd ** (-0.5)
    p = dict(params)
    p["q_w"] = (params["q_w"] * scale).astype(jnp.bfloat16)
    for name in ("kv_w", "proj_w") + (("sr_w",) if sr_ratio > 1 else ()):
        p[name] = params[name].astype(jnp.bfloat16)
    return p


def attention_forward(prepared_params, x, H, W, *, num_heads, sr_ratio,
                      tq=None, kv_per_tile=False, out_dtype=jnp.float32):
    """Forward pass of ConTrans Attention.  `prepared_params` must come from
    prepare_attention_params (scale already folded into q_w)."""
    B, N, C = x.shape
    has_sr = sr_ratio > 1
    x_bf = x.astype(jnp.bfloat16)

    if has_sr:
        # TODO(synk): the patch gather is a cheap C-minor XLA transpose in HBM;
        # it could be folded into the kv-source DMA with an in-kernel gather if
        # it ever shows up on the roofline.
        kv_src = _patchify(x_bf, H, W, sr_ratio)        # (B, Nk, sr*sr*C) bf16
    else:
        kv_src = x_bf                                   # (B, N, C) bf16 (also q src)

    Nk, P = kv_src.shape[1], kv_src.shape[2]
    out_bytes = jnp.dtype(out_dtype).itemsize
    cap = _vmem_cap_bytes()
    if tq is None:
        tq = _pick_tq(N, lambda t: _vmem_estimate(t, Nk, N, C, P, has_sr,
                                                  out_bytes) <= cap - (4 << 20))
    assert N % tq == 0

    kwargs = dict(num_heads=num_heads, has_sr=has_sr, tq=tq,
                  kv_per_tile=kv_per_tile, out_dtype=out_dtype)
    try:
        return attention_pallas(x_bf, kv_src, prepared_params,
                                single_buffer=True, **kwargs)
    except Exception:
        # Fallback if this JAX build rejects pipeline_mode=pl.Buffered(1).
        return attention_pallas(x_bf, kv_src, prepared_params,
                                single_buffer=False, **kwargs)


# ----------------------------------------------------------------------------
# Pure-JAX f32 reference (mirrors the PyTorch forward exactly)
# ----------------------------------------------------------------------------
def attention_reference(params, x, H, W, *, num_heads, sr_ratio, qk_scale=None):
    B, N, C = x.shape
    hd = C // num_heads
    scale = qk_scale if qk_scale is not None else hd ** (-0.5)

    q = x @ params["q_w"]
    q = q.reshape(B, N, num_heads, hd).transpose(0, 2, 1, 3)

    if sr_ratio > 1:
        patches = _patchify(x, H, W, sr_ratio)
        y = patches @ params["sr_w"] + params["sr_b"]
        mu = jnp.mean(y, axis=-1, keepdims=True)
        var = jnp.mean((y - mu) ** 2, axis=-1, keepdims=True)
        x_ = (y - mu) / jnp.sqrt(var + 1e-5) * params["ln_g"] + params["ln_b"]
    else:
        x_ = x

    Nk = x_.shape[1]
    kv = (x_ @ params["kv_w"]).reshape(B, Nk, 2, num_heads, hd)
    kv = kv.transpose(2, 0, 3, 1, 4)
    k, v = kv[0], kv[1]

    attn = jnp.einsum("bhqd,bhkd->bhqk", q, k) * scale
    attn = jax.nn.softmax(attn, axis=-1)
    out = jnp.einsum("bhqk,bhkd->bhqd", attn, v)
    out = out.transpose(0, 2, 1, 3).reshape(B, N, C)
    return out @ params["proj_w"] + params["proj_b"]


# ----------------------------------------------------------------------------
if __name__ == "__main__":
    B, C, num_heads = 2, 32, 4
    H = W = 8
    N = H * W

    key = jax.random.PRNGKey(0)
    kx, kp1, kp2 = jax.random.split(key, 3)
    x = jax.random.normal(kx, (B, N, C), dtype=jnp.float32)

    params_cache = {1: init_attention_params(kp1, C, num_heads, 1),
                    2: init_attention_params(kp2, C, num_heads, 2)}

    configs = [
        dict(sr_ratio=1, tq=None),                          # auto tile (full N)
        dict(sr_ratio=1, tq=32),                            # multi-tile, cached kv
        dict(sr_ratio=2, tq=16, kv_per_tile=True),          # fully-parallel grid
        dict(sr_ratio=2, tq=None, out_dtype=jnp.bfloat16),  # bf16 writeback
    ]

    ok = True
    for cfg in configs:
        cfg = dict(cfg)
        sr = cfg.pop("sr_ratio")
        params = params_cache[sr]
        prepared = prepare_attention_params(params, num_heads=num_heads,
                                            sr_ratio=sr)
        out = attention_forward(prepared, x, H, W, num_heads=num_heads,
                                sr_ratio=sr, **cfg)
        out = jax.block_until_ready(out)
        ref = attention_reference(params, x, H, W, num_heads=num_heads,
                                  sr_ratio=sr)
        out32 = out.astype(jnp.float32)
        if not bool(jnp.allclose(out32, ref, atol=1e-2, rtol=1e-2)):
            ok = False
            print(f"MISMATCH sr_ratio={sr} cfg={cfg} "
                  f"max_err={float(jnp.max(jnp.abs(out32 - ref)))}")

    if ok:
        print("KERNEL_OK")
</pallas_src>

<mosaic_0001>
module attributes {stable_mosaic.version = 11 : i64} {
  func.func @_attn_kernel(%arg0: i32, %arg1: i32, %arg2: memref<1x64x32xbf16, #tpu.memory_space<vmem>>, %arg3: memref<32x32xbf16, #tpu.memory_space<vmem>>, %arg4: memref<32x64xbf16, #tpu.memory_space<vmem>>, %arg5: memref<32x32xbf16, #tpu.memory_space<vmem>>, %arg6: memref<1x32xf32, #tpu.memory_space<vmem>>, %arg7: memref<1x64x32xf32, #tpu.memory_space<vmem>>, %arg8: memref<64x64xbf16, #tpu.memory_space<vmem>>, %arg9: memref<64x32xbf16, #tpu.memory_space<vmem>>) attributes {dimension_semantics = [#tpu.dimension_semantics<parallel>, #tpu.dimension_semantics<arbitrary>], iteration_bounds = array<i64: 2, 1>, scalar_prefetch = 0 : i64, scratch_operands = 2 : i64, tpu.core_type = #tpu.core_type<tc>, window_params = [{pipeline_mode = #tpu.pipeline_mode<synchronous>, transform_indices = @transform_0, window_bounds = array<i64: 1, 64, 32>}, {pipeline_mode = #tpu.pipeline_mode<synchronous>, transform_indices = @transform_1, window_bounds = array<i64: 32, 32>}, {pipeline_mode = #tpu.pipeline_mode<synchronous>, transform_indices = @transform_2, window_bounds = array<i64: 32, 64>}, {pipeline_mode = #tpu.pipeline_mode<synchronous>, transform_indices = @transform_3, window_bounds = array<i64: 32, 32>}, {pipeline_mode = #tpu.pipeline_mode<synchronous>, transform_indices = @transform_4, window_bounds = array<i64: 1, 32>}, {transform_indices = @transform_5, window_bounds = array<i64: 1, 64, 32>}]} {
    %c0_i32 = arith.constant 0 : i32
    %0 = arith.cmpi eq, %arg1, %c0_i32 : i32
    %1 = arith.extui %0 : i1 to i32
    %c0_i32_0 = arith.constant 0 : i32
    %2 = arith.cmpi ne, %1, %c0_i32_0 : i32
    scf.if %2 {
      %c0_57 = arith.constant 0 : index
      %c0_58 = arith.constant 0 : index
      %c0_59 = arith.constant 0 : index
      %101 = vector.load %arg2[%c0_57, %c0_58, %c0_59] : memref<1x64x32xbf16, #tpu.memory_space<vmem>>, vector<1x64x32xbf16>
      %102 = vector.shape_cast %101 : vector<1x64x32xbf16> to vector<64x32xbf16>
      %c0_60 = arith.constant 0 : index
      %c0_61 = arith.constant 0 : index
      %103 = vector.load %arg4[%c0_60, %c0_61] : memref<32x64xbf16, #tpu.memory_space<vmem>>, vector<32x64xbf16>
      %cst_62 = arith.constant dense<0.000000e+00> : vector<64x64xf32>
      %104 = tpu.matmul %102, %103, %cst_62 {dimension_numbers = #tpu.dot_dimension_numbers<[1], [0], [0], [1], [0, 0, 1, 1], [], []>} : vector<64x32xbf16>, vector<32x64xbf16>, vector<64x64xf32> -> vector<64x64xf32>
      %105 = arith.truncf %104 : vector<64x64xf32> to vector<64x64xbf16>
      %c0_63 = arith.constant 0 : index
      %c0_64 = arith.constant 0 : index
      %106 = vector.load %arg8[%c0_63, %c0_64] : memref<64x64xbf16, #tpu.memory_space<vmem>>, vector<64x64xbf16>
      tpu.vector_store %arg8[%c0_63, %c0_64], %105 {strides = array<i32>} : memref<64x64xbf16, #tpu.memory_space<vmem>>, vector<64x64xbf16>,
    } else {
    }
    %c64_i32 = arith.constant 64 : i32
    %3 = arith.muli %arg1, %c64_i32 : i32
    %4 = tpu.assume_multiple %3, 64 : i32
    %c0 = arith.constant 0 : index
    %5 = arith.index_cast %4 : i32 to index
    %c0_1 = arith.constant 0 : index
    %6 = vector.load %arg2[%c0, %5, %c0_1] : memref<1x64x32xbf16, #tpu.memory_space<vmem>>, vector<1x64x32xbf16>
    %7 = vector.shape_cast %6 : vector<1x64x32xbf16> to vector<64x32xbf16>
    %c0_2 = arith.constant 0 : index
    %c0_3 = arith.constant 0 : index
    %8 = vector.load %arg3[%c0_2, %c0_3] : memref<32x32xbf16, #tpu.memory_space<vmem>>, vector<32x32xbf16>
    %cst = arith.constant dense<0.000000e+00> : vector<64x32xf32>
    %9 = tpu.matmul %7, %8, %cst {dimension_numbers = #tpu.dot_dimension_numbers<[1], [0], [0], [1], [0, 0, 1, 1], [], []>} : vector<64x32xbf16>, vector<32x32xbf16>, vector<64x32xf32> -> vector<64x32xf32>
    %10 = arith.truncf %9 : vector<64x32xf32> to vector<64x32xbf16>
    %c0_4 = arith.constant 0 : index
    %c0_5 = arith.constant 0 : index
    %11 = vector.load %arg9[%c0_4, %c0_5] : memref<64x32xbf16, #tpu.memory_space<vmem>>, vector<64x32xbf16>
    tpu.vector_store %arg9[%c0_4, %c0_5], %10 {strides = array<i32>} : memref<64x32xbf16, #tpu.memory_space<vmem>>, vector<64x32xbf16>,
    %cst_6 = arith.constant 0.000000e+00 : f32
    %12 = vector.broadcast %cst_6 : f32 to vector<64x32xf32>
    %c0_7 = arith.constant 0 : index
    %c0_8 = arith.constant 0 : index
    %13 = vector.load %arg9[%c0_7, %c0_8] : memref<64x32xbf16, #tpu.memory_space<vmem>>, vector<64x8xbf16>
    %c0_9 = arith.constant 0 : index
    %c0_10 = arith.constant 0 : index
    %14 = vector.load %arg8[%c0_9, %c0_10] : memref<64x64xbf16, #tpu.memory_space<vmem>>, vector<64x8xbf16>
    %c0_11 = arith.constant 0 : index
    %c32 = arith.constant 32 : index
    %15 = vector.load %arg8[%c0_11, %c32] : memref<64x64xbf16, #tpu.memory_space<vmem>>, vector<64x8xbf16>
    %cst_12 = arith.constant dense<0.000000e+00> : vector<64x64xf32>
    %16 = tpu.matmul %13, %14, %cst_12 {dimension_numbers = #tpu.dot_dimension_numbers<[1], [1], [0], [0], [0, 0, 1, 0], [], []>} : vector<64x8xbf16>, vector<64x8xbf16>, vector<64x64xf32> -> vector<64x64xf32>
    %cst_13 = arith.constant dense<0xFF800000> : vector<64xf32>
    %17 = vector.multi_reduction <maximumf>, %16, %cst_13 [1] : vector<64x64xf32> to vector<64xf32>
    %18 = vector.shape_cast %17 : vector<64xf32> to vector<64x1xf32>
    %19 = vector.broadcast %18 : vector<64x1xf32> to vector<64x64xf32>
    %20 = arith.subf %16, %19 : vector<64x64xf32>
    %21 = math.exp %20 : vector<64x64xf32>
    %cst_14 = arith.constant dense<0.000000e+00> : vector<64xf32>
    %22 = vector.multi_reduction <add>, %21, %cst_14 [1] : vector<64x64xf32> to vector<64xf32>
    %23 = vector.shape_cast %22 : vector<64xf32> to vector<64x1xf32>
    %24 = tpu.reciprocal %23 {approx = true} : vector<64x1xf32> -> vector<64x1xf32>
    %25 = arith.truncf %21 : vector<64x64xf32> to vector<64x64xbf16>
    %cst_15 = arith.constant dense<0.000000e+00> : vector<64x8xf32>
    %26 = tpu.matmul %25, %15, %cst_15 {dimension_numbers = #tpu.dot_dimension_numbers<[1], [0], [0], [1], [0, 0, 1, 1], [], []>} : vector<64x64xbf16>, vector<64x8xbf16>, vector<64x8xf32> -> vector<64x8xf32>
    %27 = vector.broadcast %24 : vector<64x1xf32> to vector<64x8xf32>
    %28 = arith.mulf %26, %27 : vector<64x8xf32>
    %29 = arith.truncf %28 : vector<64x8xf32> to vector<64x8xbf16>
    %c0_16 = arith.constant 0 : index
    %c0_17 = arith.constant 0 : index
    %30 = vector.load %arg5[%c0_16, %c0_17] : memref<32x32xbf16, #tpu.memory_space<vmem>>, vector<8x32xbf16>
    %cst_18 = arith.constant dense<0.000000e+00> : vector<64x32xf32>
    %31 = tpu.matmul %29, %30, %cst_18 {dimension_numbers = #tpu.dot_dimension_numbers<[1], [0], [0], [1], [0, 0, 1, 1], [], []>} : vector<64x8xbf16>, vector<8x32xbf16>, vector<64x32xf32> -> vector<64x32xf32>
    %32 = arith.addf %12, %31 : vector<64x32xf32>
    %c0_19 = arith.constant 0 : index
    %c8 = arith.constant 8 : index
    %33 = vector.load %arg9[%c0_19, %c8] : memref<64x32xbf16, #tpu.memory_space<vmem>>, vector<64x8xbf16>
    %c0_20 = arith.constant 0 : index
    %c8_21 = arith.constant 8 : index
    %34 = vector.load %arg8[%c0_20, %c8_21] : memref<64x64xbf16, #tpu.memory_space<vmem>>, vector<64x8xbf16>
    %c0_22 = arith.constant 0 : index
    %c40 = arith.constant 40 : index
    %35 = vector.load %arg8[%c0_22, %c40] : memref<64x64xbf16, #tpu.memory_space<vmem>>, vector<64x8xbf16>
    %cst_23 = arith.constant dense<0.000000e+00> : vector<64x64xf32>
    %36 = tpu.matmul %33, %34, %cst_23 {dimension_numbers = #tpu.dot_dimension_numbers<[1], [1], [0], [0], [0, 0, 1, 0], [], []>} : vector<64x8xbf16>, vector<64x8xbf16>, vector<64x64xf32> -> vector<64x64xf32>
    %cst_24 = arith.constant dense<0xFF800000> : vector<64xf32>
    %37 = vector.multi_reduction <maximumf>, %36, %cst_24 [1] : vector<64x64xf32> to vector<64xf32>
    %38 = vector.shape_cast %37 : vector<64xf32> to vector<64x1xf32>
    %39 = vector.broadcast %38 : vector<64x1xf32> to vector<64x64xf32>
    %40 = arith.subf %36, %39 : vector<64x64xf32>
    %41 = math.exp %40 : vector<64x64xf32>
    %cst_25 = arith.constant dense<0.000000e+00> : vector<64xf32>
    %42 = vector.multi_reduction <add>, %41, %cst_25 [1] : vector<64x64xf32> to vector<64xf32>
    %43 = vector.shape_cast %42 : vector<64xf32> to vector<64x1xf32>
    %44 = tpu.reciprocal %43 {approx = true} : vector<64x1xf32> -> vector<64x1xf32>
    %45 = arith.truncf %41 : vector<64x64xf32> to vector<64x64xbf16>
    %cst_26 = arith.constant dense<0.000000e+00> : vector<64x8xf32>
    %46 = tpu.matmul %45, %35, %cst_26 {dimension_numbers = #tpu.dot_dimension_numbers<[1], [0], [0], [1], [0, 0, 1, 1], [], []>} : vector<64x64xbf16>, vector<64x8xbf16>, vector<64x8xf32> -> vector<64x8xf32>
    %47 = vector.broadcast %44 : vector<64x1xf32> to vector<64x8xf32>
    %48 = arith.mulf %46, %47 : vector<64x8xf32>
    %49 = arith.truncf %48 : vector<64x8xf32> to vector<64x8xbf16>
    %c8_27 = arith.constant 8 : index
    %c0_28 = arith.constant 0 : index
    %50 = vector.load %arg5[%c8_27, %c0_28] : memref<32x32xbf16, #tpu.memory_space<vmem>>, vector<8x32xbf16>
    %cst_29 = arith.constant dense<0.000000e+00> : vector<64x32xf32>
    %51 = tpu.matmul %49, %50, %cst_29 {dimension_numbers = #tpu.dot_dimension_numbers<[1], [0], [0], [1], [0, 0, 1, 1], [], []>} : vector<64x8xbf16>, vector<8x32xbf16>, vector<64x32xf32> -> vector<64x32xf32>
    %52 = arith.addf %32, %51 : vector<64x32xf32>
    %c0_30 = arith.constant 0 : index
    %c16 = arith.constant 16 : index
    %53 = vector.load %arg9[%c0_30, %c16] : memref<64x32xbf16, #tpu.memory_space<vmem>>, vector<64x8xbf16>
    %c0_31 = arith.constant 0 : index
    %c16_32 = arith.constant 16 : index
    %54 = vector.load %arg8[%c0_31, %c16_32] : memref<64x64xbf16, #tpu.memory_space<vmem>>, vector<64x8xbf16>
    %c0_33 = arith.constant 0 : index
    %c48 = arith.constant 48 : index
    %55 = vector.load %arg8[%c0_33, %c48] : memref<64x64xbf16, #tpu.memory_space<vmem>>, vector<64x8xbf16>
    %cst_34 = arith.constant dense<0.000000e+00> : vector<64x64xf32>
    %56 = tpu.matmul %53, %54, %cst_34 {dimension_numbers = #tpu.dot_dimension_numbers<[1], [1], [0], [0], [0, 0, 1, 0], [], []>} : vector<64x8xbf16>, vector<64x8xbf16>, vector<64x64xf32> -> vector<64x64xf32>
    %cst_35 = arith.constant dense<0xFF800000> : vector<64xf32>
    %57 = vector.multi_reduction <maximumf>, %56, %cst_35 [1] : vector<64x64xf32> to vector<64xf32>
    %58 = vector.shape_cast %57 : vector<64xf32> to vector<64x1xf32>
    %59 = vector.broadcast %58 : vector<64x1xf32> to vector<64x64xf32>
    %60 = arith.subf %56, %59 : vector<64x64xf32>
    %61 = math.exp %60 : vector<64x64xf32>
    %cst_36 = arith.constant dense<0.000000e+00> : vector<64xf32>
    %62 = vector.multi_reduction <add>, %61, %cst_36 [1] : vector<64x64xf32> to vector<64xf32>
    %63 = vector.shape_cast %62 : vector<64xf32> to vector<64x1xf32>
    %64 = tpu.reciprocal %63 {approx = true} : vector<64x1xf32> -> vector<64x1xf32>
    %65 = arith.truncf %61 : vector<64x64xf32> to vector<64x64xbf16>
    %cst_37 = arith.constant dense<0.000000e+00> : vector<64x8xf32>
    %66 = tpu.matmul %65, %55, %cst_37 {dimension_numbers = #tpu.dot_dimension_numbers<[1], [0], [0], [1], [0, 0, 1, 1], [], []>} : vector<64x64xbf16>, vector<64x8xbf16>, vector<64x8xf32> -> vector<64x8xf32>
    %67 = vector.broadcast %64 : vector<64x1xf32> to vector<64x8xf32>
    %68 = arith.mulf %66, %67 : vector<64x8xf32>
    %69 = arith.truncf %68 : vector<64x8xf32> to vector<64x8xbf16>
    %c16_38 = arith.constant 16 : index
    %c0_39 = arith.constant 0 : index
    %70 = vector.load %arg5[%c16_38, %c0_39] : memref<32x32xbf16, #tpu.memory_space<vmem>>, vector<8x32xbf16>
    %cst_40 = arith.constant dense<0.000000e+00> : vector<64x32xf32>
    %71 = tpu.matmul %69, %70, %cst_40 {dimension_numbers = #tpu.dot_dimension_numbers<[1], [0], [0], [1], [0, 0, 1, 1], [], []>} : vector<64x8xbf16>, vector<8x32xbf16>, vector<64x32xf32> -> vector<64x32xf32>
    %72 = arith.addf %52, %71 : vector<64x32xf32>
    %c0_41 = arith.constant 0 : index
    %c24 = arith.constant 24 : index
    %73 = vector.load %arg9[%c0_41, %c24] : memref<64x32xbf16, #tpu.memory_space<vmem>>, vector<64x8xbf16>
    %c0_42 = arith.constant 0 : index
    %c24_43 = arith.constant 24 : index
    %74 = vector.load %arg8[%c0_42, %c24_43] : memref<64x64xbf16, #tpu.memory_space<vmem>>, vector<64x8xbf16>
    %c0_44 = arith.constant 0 : index
    %c56 = arith.constant 56 : index
    %75 = vector.load %arg8[%c0_44, %c56] : memref<64x64xbf16, #tpu.memory_space<vmem>>, vector<64x8xbf16>
    %cst_45 = arith.constant dense<0.000000e+00> : vector<64x64xf32>
    %76 = tpu.matmul %73, %74, %cst_45 {dimension_numbers = #tpu.dot_dimension_numbers<[1], [1], [0], [0], [0, 0, 1, 0], [], []>} : vector<64x8xbf16>, vector<64x8xbf16>, vector<64x64xf32> -> vector<64x64xf32>
    %cst_46 = arith.constant dense<0xFF800000> : vector<64xf32>
    %77 = vector.multi_reduction <maximumf>, %76, %cst_46 [1] : vector<64x64xf32> to vector<64xf32>
    %78 = vector.shape_cast %77 : vector<64xf32> to vector<64x1xf32>
    %79 = vector.broadcast %78 : vector<64x1xf32> to vector<64x64xf32>
    %80 = arith.subf %76, %79 : vector<64x64xf32>
    %81 = math.exp %80 : vector<64x64xf32>
    %cst_47 = arith.constant dense<0.000000e+00> : vector<64xf32>
    %82 = vector.multi_reduction <add>, %81, %cst_47 [1] : vector<64x64xf32> to vector<64xf32>
    %83 = vector.shape_cast %82 : vector<64xf32> to vector<64x1xf32>
    %84 = tpu.reciprocal %83 {approx = true} : vector<64x1xf32> -> vector<64x1xf32>
    %85 = arith.truncf %81 : vector<64x64xf32> to vector<64x64xbf16>
    %cst_48 = arith.constant dense<0.000000e+00> : vector<64x8xf32>
    %86 = tpu.matmul %85, %75, %cst_48 {dimension_numbers = #tpu.dot_dimension_numbers<[1], [0], [0], [1], [0, 0, 1, 1], [], []>} : vector<64x64xbf16>, vector<64x8xbf16>, vector<64x8xf32> -> vector<64x8xf32>
    %87 = vector.broadcast %84 : vector<64x1xf32> to vector<64x8xf32>
    %88 = arith.mulf %86, %87 : vector<64x8xf32>
    %89 = arith.truncf %88 : vector<64x8xf32> to vector<64x8xbf16>
    %c24_49 = arith.constant 24 : index
    %c0_50 = arith.constant 0 : index
    %90 = vector.load %arg5[%c24_49, %c0_50] : memref<32x32xbf16, #tpu.memory_space<vmem>>, vector<8x32xbf16>
    %cst_51 = arith.constant dense<0.000000e+00> : vector<64x32xf32>
    %91 = tpu.matmul %89, %90, %cst_51 {dimension_numbers = #tpu.dot_dimension_numbers<[1], [0], [0], [1], [0, 0, 1, 1], [], []>} : vector<64x8xbf16>, vector<8x32xbf16>, vector<64x32xf32> -> vector<64x32xf32>
    %92 = arith.addf %72, %91 : vector<64x32xf32>
    %c0_52 = arith.constant 0 : index
    %c0_53 = arith.constant 0 : index
    %93 = vector.load %arg6[%c0_52, %c0_53] : memref<1x32xf32, #tpu.memory_space<vmem>>, vector<1x32xf32>
    %94 = vector.shape_cast %93 : vector<1x32xf32> to vector<32xf32>
    %95 = vector.shape_cast %94 : vector<32xf32> to vector<1x32xf32>
    %96 = vector.broadcast %95 : vector<1x32xf32> to vector<64x32xf32>
    %97 = arith.addf %92, %96 : vector<64x32xf32>
    %c0_54 = arith.constant 0 : index
    %c0_55 = arith.constant 0 : index
    %c0_56 = arith.constant 0 : index
    %98 = vector.load %arg7[%c0_54, %c0_55, %c0_56] : memref<1x64x32xf32, #tpu.memory_space<vmem>>, vector<1x64x32xf32>
    %99 = vector.shape_cast %98 : vector<1x64x32xf32> to vector<64x32xf32>
    %100 = vector.shape_cast %97 : vector<64x32xf32> to vector<1x64x32xf32>
    tpu.vector_store %arg7[%c0_54, %c0_55, %c0_56], %100 {strides = array<i32>} : memref<1x64x32xf32, #tpu.memory_space<vmem>>, vector<1x64x32xf32>,
    return
  }
  func.func @transform_0(%arg0: i32, %arg1: i32) -> (i32, i32, i32) {
    %c0_i32 = arith.constant 0 : i32
    %c0_i32_0 = arith.constant 0 : i32
    %c0_i32_1 = arith.constant 0 : i32
    return %arg0, %c0_i32, %c0_i32_0 : i32, i32, i32
  }
  func.func @transform_1(%arg0: i32, %arg1: i32) -> (i32, i32) {
    %c0_i32 = arith.constant 0 : i32
    %c0_i32_0 = arith.constant 0 : i32
    %c0_i32_1 = arith.constant 0 : i32
    return %c0_i32, %c0_i32_0 : i32, i32
  }
  func.func @transform_2(%arg0: i32, %arg1: i32) -> (i32, i32) {
    %c0_i32 = arith.constant 0 : i32
    %c0_i32_0 = arith.constant 0 : i32
    %c0_i32_1 = arith.constant 0 : i32
    return %c0_i32, %c0_i32_0 : i32, i32
  }
  func.func @transform_3(%arg0: i32, %arg1: i32) -> (i32, i32) {
    %c0_i32 = arith.constant 0 : i32
    %c0_i32_0 = arith.constant 0 : i32
    %c0_i32_1 = arith.constant 0 : i32
    return %c0_i32, %c0_i32_0 : i32, i32
  }
  func.func @transform_4(%arg0: i32, %arg1: i32) -> (i32, i32) {
    %c0_i32 = arith.constant 0 : i32
    %c0_i32_0 = arith.constant 0 : i32
    %c0_i32_1 = arith.constant 0 : i32
    return %c0_i32, %c0_i32_0 : i32, i32
  }
  func.func @transform_5(%arg0: i32, %arg1: i32) -> (i32, i32, i32) {
    %c0_i32 = arith.constant 0 : i32
    %c0_i32_0 = arith.constant 0 : i32
    return %arg0, %arg1, %c0_i32 : i32, i32, i32
  }
}

module attributes {stable_mosaic.version = 11 : i64} {
  func.func @_attn_kernel(%arg0: i32, %arg1: i32, %arg2: memref<1x64x32xbf16, #tpu.memory_space<vmem>>, %arg3: memref<32x32xbf16, #tpu.memory_space<vmem>>, %arg4: memref<32x64xbf16, #tpu.memory_space<vmem>>, %arg5: memref<32x32xbf16, #tpu.memory_space<vmem>>, %arg6: memref<1x32xf32, #tpu.memory_space<vmem>>, %arg7: memref<1x64x32xf32, #tpu.memory_space<vmem>>, %arg8: memref<64x64xbf16, #tpu.memory_space<vmem>>, %arg9: memref<64x32xbf16, #tpu.memory_space<vmem>>) attributes {dimension_semantics = [#tpu.dimension_semantics<parallel>, #tpu.dimension_semantics<arbitrary>], iteration_bounds = array<i64: 2, 1>, scalar_prefetch = 0 : i64, scratch_operands = 2 : i64, tpu.core_type = #tpu.core_type<tc>, window_params = [{transform_indices = @transform_0, window_bounds = array<i64: 1, 64, 32>}, {pipeline_mode = #tpu.pipeline_mode<synchronous>, transform_indices = @transform_1, window_bounds = array<i64: 32, 32>}, {pipeline_mode = #tpu.pipeline_mode<synchronous>, transform_indices = @transform_2, window_bounds = array<i64: 32, 64>}, {pipeline_mode = #tpu.pipeline_mode<synchronous>, transform_indices = @transform_3, window_bounds = array<i64: 32, 32>}, {pipeline_mode = #tpu.pipeline_mode<synchronous>, transform_indices = @transform_4, window_bounds = array<i64: 1, 32>}, {transform_indices = @transform_5, window_bounds = array<i64: 1, 64, 32>}]} {
    %c0_i32 = arith.constant 0 : i32
    %0 = arith.cmpi eq, %arg1, %c0_i32 : i32
    %1 = arith.extui %0 : i1 to i32
    %c0_i32_0 = arith.constant 0 : i32
    %2 = arith.cmpi ne, %1, %c0_i32_0 : i32
    scf.if %2 {
      %c0_57 = arith.constant 0 : index
      %c0_58 = arith.constant 0 : index
      %c0_59 = arith.constant 0 : index
      %101 = vector.load %arg2[%c0_57, %c0_58, %c0_59] : memref<1x64x32xbf16, #tpu.memory_space<vmem>>, vector<1x64x32xbf16>
      %102 = vector.shape_cast %101 : vector<1x64x32xbf16> to vector<64x32xbf16>
      %c0_60 = arith.constant 0 : index
      %c0_61 = arith.constant 0 : index
      %103 = vector.load %arg4[%c0_60, %c0_61] : memref<32x64xbf16, #tpu.memory_space<vmem>>, vector<32x64xbf16>
      %cst_62 = arith.constant dense<0.000000e+00> : vector<64x64xf32>
      %104 = tpu.matmul %102, %103, %cst_62 {dimension_numbers = #tpu.dot_dimension_numbers<[1], [0], [0], [1], [0, 0, 1, 1], [], []>} : vector<64x32xbf16>, vector<32x64xbf16>, vector<64x64xf32> -> vector<64x64xf32>
      %105 = arith.truncf %104 : vector<64x64xf32> to vector<64x64xbf16>
      %c0_63 = arith.constant 0 : index
      %c0_64 = arith.constant 0 : index
      %106 = vector.load %arg8[%c0_63, %c0_64] : memref<64x64xbf16, #tpu.memory_space<vmem>>, vector<64x64xbf16>
      tpu.vector_store %arg8[%c0_63, %c0_64], %105 {strides = array<i32>} : memref<64x64xbf16, #tpu.memory_space<vmem>>, vector<64x64xbf16>,
    } else {
    }
    %c64_i32 = arith.constant 64 : i32
    %3 = arith.muli %arg1, %c64_i32 : i32
    %4 = tpu.assume_multiple %3, 64 : i32
    %c0 = arith.constant 0 : index
    %5 = arith.index_cast %4 : i32 to index
    %c0_1 = arith.constant 0 : index
    %6 = vector.load %arg2[%c0, %5, %c0_1] : memref<1x64x32xbf16, #tpu.memory_space<vmem>>, vector<1x64x32xbf16>
    %7 = vector.shape_cast %6 : vector<1x64x32xbf16> to vector<64x32xbf16>
    %c0_2 = arith.constant 0 : index
    %c0_3 = arith.constant 0 : index
    %8 = vector.load %arg3[%c0_2, %c0_3] : memref<32x32xbf16, #tpu.memory_space<vmem>>, vector<32x32xbf16>
    %cst = arith.constant dense<0.000000e+00> : vector<64x32xf32>
    %9 = tpu.matmul %7, %8, %cst {dimension_numbers = #tpu.dot_dimension_numbers<[1], [0], [0], [1], [0, 0, 1, 1], [], []>} : vector<64x32xbf16>, vector<32x32xbf16>, vector<64x32xf32> -> vector<64x32xf32>
    %10 = arith.truncf %9 : vector<64x32xf32> to vector<64x32xbf16>
    %c0_4 = arith.constant 0 : index
    %c0_5 = arith.constant 0 : index
    %11 = vector.load %arg9[%c0_4, %c0_5] : memref<64x32xbf16, #tpu.memory_space<vmem>>, vector<64x32xbf16>
    tpu.vector_store %arg9[%c0_4, %c0_5], %10 {strides = array<i32>} : memref<64x32xbf16, #tpu.memory_space<vmem>>, vector<64x32xbf16>,
    %cst_6 = arith.constant 0.000000e+00 : f32
    %12 = vector.broadcast %cst_6 : f32 to vector<64x32xf32>
    %c0_7 = arith.constant 0 : index
    %c0_8 = arith.constant 0 : index
    %13 = vector.load %arg9[%c0_7, %c0_8] : memref<64x32xbf16, #tpu.memory_space<vmem>>, vector<64x8xbf16>
    %c0_9 = arith.constant 0 : index
    %c0_10 = arith.constant 0 : index
    %14 = vector.load %arg8[%c0_9, %c0_10] : memref<64x64xbf16, #tpu.memory_space<vmem>>, vector<64x8xbf16>
    %c0_11 = arith.constant 0 : index
    %c32 = arith.constant 32 : index
    %15 = vector.load %arg8[%c0_11, %c32] : memref<64x64xbf16, #tpu.memory_space<vmem>>, vector<64x8xbf16>
    %cst_12 = arith.constant dense<0.000000e+00> : vector<64x64xf32>
    %16 = tpu.matmul %13, %14, %cst_12 {dimension_numbers = #tpu.dot_dimension_numbers<[1], [1], [0], [0], [0, 0, 1, 0], [], []>} : vector<64x8xbf16>, vector<64x8xbf16>, vector<64x64xf32> -> vector<64x64xf32>
    %cst_13 = arith.constant dense<0xFF800000> : vector<64xf32>
    %17 = vector.multi_reduction <maximumf>, %16, %cst_13 [1] : vector<64x64xf32> to vector<64xf32>
    %18 = vector.shape_cast %17 : vector<64xf32> to vector<64x1xf32>
    %19 = vector.broadcast %18 : vector<64x1xf32> to vector<64x64xf32>
    %20 = arith.subf %16, %19 : vector<64x64xf32>
    %21 = math.exp %20 : vector<64x64xf32>
    %cst_14 = arith.constant dense<0.000000e+00> : vector<64xf32>
    %22 = vector.multi_reduction <add>, %21, %cst_14 [1] : vector<64x64xf32> to vector<64xf32>
    %23 = vector.shape_cast %22 : vector<64xf32> to vector<64x1xf32>
    %24 = tpu.reciprocal %23 {approx = true} : vector<64x1xf32> -> vector<64x1xf32>
    %25 = arith.truncf %21 : vector<64x64xf32> to vector<64x64xbf16>
    %cst_15 = arith.constant dense<0.000000e+00> : vector<64x8xf32>
    %26 = tpu.matmul %25, %15, %cst_15 {dimension_numbers = #tpu.dot_dimension_numbers<[1], [0], [0], [1], [0, 0, 1, 1], [], []>} : vector<64x64xbf16>, vector<64x8xbf16>, vector<64x8xf32> -> vector<64x8xf32>
    %27 = vector.broadcast %24 : vector<64x1xf32> to vector<64x8xf32>
    %28 = arith.mulf %26, %27 : vector<64x8xf32>
    %29 = arith.truncf %28 : vector<64x8xf32> to vector<64x8xbf16>
    %c0_16 = arith.constant 0 : index
    %c0_17 = arith.constant 0 : index
    %30 = vector.load %arg5[%c0_16, %c0_17] : memref<32x32xbf16, #tpu.memory_space<vmem>>, vector<8x32xbf16>
    %cst_18 = arith.constant dense<0.000000e+00> : vector<64x32xf32>
    %31 = tpu.matmul %29, %30, %cst_18 {dimension_numbers = #tpu.dot_dimension_numbers<[1], [0], [0], [1], [0, 0, 1, 1], [], []>} : vector<64x8xbf16>, vector<8x32xbf16>, vector<64x32xf32> -> vector<64x32xf32>
    %32 = arith.addf %12, %31 : vector<64x32xf32>
    %c0_19 = arith.constant 0 : index
    %c8 = arith.constant 8 : index
    %33 = vector.load %arg9[%c0_19, %c8] : memref<64x32xbf16, #tpu.memory_space<vmem>>, vector<64x8xbf16>
    %c0_20 = arith.constant 0 : index
    %c8_21 = arith.constant 8 : index
    %34 = vector.load %arg8[%c0_20, %c8_21] : memref<64x64xbf16, #tpu.memory_space<vmem>>, vector<64x8xbf16>
    %c0_22 = arith.constant 0 : index
    %c40 = arith.constant 40 : index
    %35 = vector.load %arg8[%c0_22, %c40] : memref<64x64xbf16, #tpu.memory_space<vmem>>, vector<64x8xbf16>
    %cst_23 = arith.constant dense<0.000000e+00> : vector<64x64xf32>
    %36 = tpu.matmul %33, %34, %cst_23 {dimension_numbers = #tpu.dot_dimension_numbers<[1], [1], [0], [0], [0, 0, 1, 0], [], []>} : vector<64x8xbf16>, vector<64x8xbf16>, vector<64x64xf32> -> vector<64x64xf32>
    %cst_24 = arith.constant dense<0xFF800000> : vector<64xf32>
    %37 = vector.multi_reduction <maximumf>, %36, %cst_24 [1] : vector<64x64xf32> to vector<64xf32>
    %38 = vector.shape_cast %37 : vector<64xf32> to vector<64x1xf32>
    %39 = vector.broadcast %38 : vector<64x1xf32> to vector<64x64xf32>
    %40 = arith.subf %36, %39 : vector<64x64xf32>
    %41 = math.exp %40 : vector<64x64xf32>
    %cst_25 = arith.constant dense<0.000000e+00> : vector<64xf32>
    %42 = vector.multi_reduction <add>, %41, %cst_25 [1] : vector<64x64xf32> to vector<64xf32>
    %43 = vector.shape_cast %42 : vector<64xf32> to vector<64x1xf32>
    %44 = tpu.reciprocal %43 {approx = true} : vector<64x1xf32> -> vector<64x1xf32>
    %45 = arith.truncf %41 : vector<64x64xf32> to vector<64x64xbf16>
    %cst_26 = arith.constant dense<0.000000e+00> : vector<64x8xf32>
    %46 = tpu.matmul %45, %35, %cst_26 {dimension_numbers = #tpu.dot_dimension_numbers<[1], [0], [0], [1], [0, 0, 1, 1], [], []>} : vector<64x64xbf16>, vector<64x8xbf16>, vector<64x8xf32> -> vector<64x8xf32>
    %47 = vector.broadcast %44 : vector<64x1xf32> to vector<64x8xf32>
    %48 = arith.mulf %46, %47 : vector<64x8xf32>
    %49 = arith.truncf %48 : vector<64x8xf32> to vector<64x8xbf16>
    %c8_27 = arith.constant 8 : index
    %c0_28 = arith.constant 0 : index
    %50 = vector.load %arg5[%c8_27, %c0_28] : memref<32x32xbf16, #tpu.memory_space<vmem>>, vector<8x32xbf16>
    %cst_29 = arith.constant dense<0.000000e+00> : vector<64x32xf32>
    %51 = tpu.matmul %49, %50, %cst_29 {dimension_numbers = #tpu.dot_dimension_numbers<[1], [0], [0], [1], [0, 0, 1, 1], [], []>} : vector<64x8xbf16>, vector<8x32xbf16>, vector<64x32xf32> -> vector<64x32xf32>
    %52 = arith.addf %32, %51 : vector<64x32xf32>
    %c0_30 = arith.constant 0 : index
    %c16 = arith.constant 16 : index
    %53 = vector.load %arg9[%c0_30, %c16] : memref<64x32xbf16, #tpu.memory_space<vmem>>, vector<64x8xbf16>
    %c0_31 = arith.constant 0 : index
    %c16_32 = arith.constant 16 : index
    %54 = vector.load %arg8[%c0_31, %c16_32] : memref<64x64xbf16, #tpu.memory_space<vmem>>, vector<64x8xbf16>
    %c0_33 = arith.constant 0 : index
    %c48 = arith.constant 48 : index
    %55 = vector.load %arg8[%c0_33, %c48] : memref<64x64xbf16, #tpu.memory_space<vmem>>, vector<64x8xbf16>
    %cst_34 = arith.constant dense<0.000000e+00> : vector<64x64xf32>
    %56 = tpu.matmul %53, %54, %cst_34 {dimension_numbers = #tpu.dot_dimension_numbers<[1], [1], [0], [0], [0, 0, 1, 0], [], []>} : vector<64x8xbf16>, vector<64x8xbf16>, vector<64x64xf32> -> vector<64x64xf32>
    %cst_35 = arith.constant dense<0xFF800000> : vector<64xf32>
    %57 = vector.multi_reduction <maximumf>, %56, %cst_35 [1] : vector<64x64xf32> to vector<64xf32>
    %58 = vector.shape_cast %57 : vector<64xf32> to vector<64x1xf32>
    %59 = vector.broadcast %58 : vector<64x1xf32> to vector<64x64xf32>
    %60 = arith.subf %56, %59 : vector<64x64xf32>
    %61 = math.exp %60 : vector<64x64xf32>
    %cst_36 = arith.constant dense<0.000000e+00> : vector<64xf32>
    %62 = vector.multi_reduction <add>, %61, %cst_36 [1] : vector<64x64xf32> to vector<64xf32>
    %63 = vector.shape_cast %62 : vector<64xf32> to vector<64x1xf32>
    %64 = tpu.reciprocal %63 {approx = true} : vector<64x1xf32> -> vector<64x1xf32>
    %65 = arith.truncf %61 : vector<64x64xf32> to vector<64x64xbf16>
    %cst_37 = arith.constant dense<0.000000e+00> : vector<64x8xf32>
    %66 = tpu.matmul %65, %55, %cst_37 {dimension_numbers = #tpu.dot_dimension_numbers<[1], [0], [0], [1], [0, 0, 1, 1], [], []>} : vector<64x64xbf16>, vector<64x8xbf16>, vector<64x8xf32> -> vector<64x8xf32>
    %67 = vector.broadcast %64 : vector<64x1xf32> to vector<64x8xf32>
    %68 = arith.mulf %66, %67 : vector<64x8xf32>
    %69 = arith.truncf %68 : vector<64x8xf32> to vector<64x8xbf16>
    %c16_38 = arith.constant 16 : index
    %c0_39 = arith.constant 0 : index
    %70 = vector.load %arg5[%c16_38, %c0_39] : memref<32x32xbf16, #tpu.memory_space<vmem>>, vector<8x32xbf16>
    %cst_40 = arith.constant dense<0.000000e+00> : vector<64x32xf32>
    %71 = tpu.matmul %69, %70, %cst_40 {dimension_numbers = #tpu.dot_dimension_numbers<[1], [0], [0], [1], [0, 0, 1, 1], [], []>} : vector<64x8xbf16>, vector<8x32xbf16>, vector<64x32xf32> -> vector<64x32xf32>
    %72 = arith.addf %52, %71 : vector<64x32xf32>
    %c0_41 = arith.constant 0 : index
    %c24 = arith.constant 24 : index
    %73 = vector.load %arg9[%c0_41, %c24] : memref<64x32xbf16, #tpu.memory_space<vmem>>, vector<64x8xbf16>
    %c0_42 = arith.constant 0 : index
    %c24_43 = arith.constant 24 : index
    %74 = vector.load %arg8[%c0_42, %c24_43] : memref<64x64xbf16, #tpu.memory_space<vmem>>, vector<64x8xbf16>
    %c0_44 = arith.constant 0 : index
    %c56 = arith.constant 56 : index
    %75 = vector.load %arg8[%c0_44, %c56] : memref<64x64xbf16, #tpu.memory_space<vmem>>, vector<64x8xbf16>
    %cst_45 = arith.constant dense<0.000000e+00> : vector<64x64xf32>
    %76 = tpu.matmul %73, %74, %cst_45 {dimension_numbers = #tpu.dot_dimension_numbers<[1], [1], [0], [0], [0, 0, 1, 0], [], []>} : vector<64x8xbf16>, vector<64x8xbf16>, vector<64x64xf32> -> vector<64x64xf32>
    %cst_46 = arith.constant dense<0xFF800000> : vector<64xf32>
    %77 = vector.multi_reduction <maximumf>, %76, %cst_46 [1] : vector<64x64xf32> to vector<64xf32>
    %78 = vector.shape_cast %77 : vector<64xf32> to vector<64x1xf32>
    %79 = vector.broadcast %78 : vector<64x1xf32> to vector<64x64xf32>
    %80 = arith.subf %76, %79 : vector<64x64xf32>
    %81 = math.exp %80 : vector<64x64xf32>
    %cst_47 = arith.constant dense<0.000000e+00> : vector<64xf32>
    %82 = vector.multi_reduction <add>, %81, %cst_47 [1] : vector<64x64xf32> to vector<64xf32>
    %83 = vector.shape_cast %82 : vector<64xf32> to vector<64x1xf32>
    %84 = tpu.reciprocal %83 {approx = true} : vector<64x1xf32> -> vector<64x1xf32>
    %85 = arith.truncf %81 : vector<64x64xf32> to vector<64x64xbf16>
    %cst_48 = arith.constant dense<0.000000e+00> : vector<64x8xf32>
    %86 = tpu.matmul %85, %75, %cst_48 {dimension_numbers = #tpu.dot_dimension_numbers<[1], [0], [0], [1], [0, 0, 1, 1], [], []>} : vector<64x64xbf16>, vector<64x8xbf16>, vector<64x8xf32> -> vector<64x8xf32>
    %87 = vector.broadcast %84 : vector<64x1xf32> to vector<64x8xf32>
    %88 = arith.mulf %86, %87 : vector<64x8xf32>
    %89 = arith.truncf %88 : vector<64x8xf32> to vector<64x8xbf16>
    %c24_49 = arith.constant 24 : index
    %c0_50 = arith.constant 0 : index
    %90 = vector.load %arg5[%c24_49, %c0_50] : memref<32x32xbf16, #tpu.memory_space<vmem>>, vector<8x32xbf16>
    %cst_51 = arith.constant dense<0.000000e+00> : vector<64x32xf32>
    %91 = tpu.matmul %89, %90, %cst_51 {dimension_numbers = #tpu.dot_dimension_numbers<[1], [0], [0], [1], [0, 0, 1, 1], [], []>} : vector<64x8xbf16>, vector<8x32xbf16>, vector<64x32xf32> -> vector<64x32xf32>
    %92 = arith.addf %72, %91 : vector<64x32xf32>
    %c0_52 = arith.constant 0 : index
    %c0_53 = arith.constant 0 : index
    %93 = vector.load %arg6[%c0_52, %c0_53] : memref<1x32xf32, #tpu.memory_space<vmem>>, vector<1x32xf32>
    %94 = vector.shape_cast %93 : vector<1x32xf32> to vector<32xf32>
    %95 = vector.shape_cast %94 : vector<32xf32> to vector<1x32xf32>
    %96 = vector.broadcast %95 : vector<1x32xf32> to vector<64x32xf32>
    %97 = arith.addf %92, %96 : vector<64x32xf32>
    %c0_54 = arith.constant 0 : index
    %c0_55 = arith.constant 0 : index
    %c0_56 = arith.constant 0 : index
    %98 = vector.load %arg7[%c0_54, %c0_55, %c0_56] : memref<1x64x32xf32, #tpu.memory_space<vmem>>, vector<1x64x32xf32>
    %99 = vector.shape_cast %98 : vector<1x64x32xf32> to vector<64x32xf32>
    %100 = vector.shape_cast %97 : vector<64x32xf32> to vector<1x64x32xf32>
    tpu.vector_store %arg7[%c0_54, %c0_55, %c0_56], %100 {strides = array<i32>} : memref<1x64x32xf32, #tpu.memory_space<vmem>>, vector<1x64x32xf32>,
    return
  }
  func.func @transform_0(%arg0: i32, %arg1: i32) -> (i32, i32, i32) {
    %c0_i32 = arith.constant 0 : i32
    %c0_i32_0 = arith.constant 0 : i32
    %c0_i32_1 = arith.constant 0 : i32
    return %arg0, %c0_i32, %c0_i32_0 : i32, i32, i32
  }
  func.func @transform_1(%arg0: i32, %arg1: i32) -> (i32, i32) {
    %c0_i32 = arith.constant 0 : i32
    %c0_i32_0 = arith.constant 0 : i32
    %c0_i32_1 = arith.constant 0 : i32
    return %c0_i32, %c0_i32_0 : i32, i32
  }
  func.func @transform_2(%arg0: i32, %arg1: i32) -> (i32, i32) {
    %c0_i32 = arith.constant 0 : i32
    %c0_i32_0 = arith.constant 0 : i32
    %c0_i32_1 = arith.constant 0 : i32
    return %c0_i32, %c0_i32_0 : i32, i32
  }
  func.func @transform_3(%arg0: i32, %arg1: i32) -> (i32, i32) {
    %c0_i32 = arith.constant 0 : i32
    %c0_i32_0 = arith.constant 0 : i32
    %c0_i32_1 = arith.constant 0 : i32
    return %c0_i32, %c0_i32_0 : i32, i32
  }
  func.func @transform_4(%arg0: i32, %arg1: i32) -> (i32, i32) {
    %c0_i32 = arith.constant 0 : i32
    %c0_i32_0 = arith.constant 0 : i32
    %c0_i32_1 = arith.constant 0 : i32
    return %c0_i32, %c0_i32_0 : i32, i32
  }
  func.func @transform_5(%arg0: i32, %arg1: i32) -> (i32, i32, i32) {
    %c0_i32 = arith.constant 0 : i32
    %c0_i32_0 = arith.constant 0 : i32
    return %arg0, %arg1, %c0_i32 : i32, i32, i32
  }
}

</mosaic_0001>

<bundles_post_ra>
// kernel: tpu_custom_call.1
= control target key start
LH: loop header
LB: loop body
LE: loop exit
PB: predicated region body
PF: predicated region fallthrough
CT: control target
= control target key end

     0   :  { %s2780_s18 = smov 0   ;;  %s2782_s19 = smov 0   ;;  %s3308_s0 = inlined_call_operand.vmem [shape: bf16[2,64,32], index: 0, kind: input, shape index: {}]   ;;  %s3309_s1 = inlined_call_operand.vmem [shape: bf16[32,32], index: 1, kind: input, shape index: {}]   ;;  %s3310_s2 = inlined_call_operand.vmem [shape: bf16[32,64], index: 2, kind: input, shape index: {}]   ;;  %s3311_s3 = inlined_call_operand.vmem [shape: bf16[32,32], index: 3, kind: input, shape index: {}]   ;;  %s3312_s4 = inlined_call_operand.vmem [shape: f32[1,32], index: 4, kind: input, shape index: {}]   ;;  %s3313_s5 = inlined_call_operand.vmem [shape: f32[2,64,32], index: 5, kind: output, shape index: {}]  }
   0x1   :  { %s2784_s20 = smov 0  }
   0x2 LB: > { %s27_s21 = sadd.s32 1, %s2737_s19  ;;  %p2134_p0 = scmp.ge.s32.totalorder %s2741_s20, 1  ;;  %s2741_s20 = sphi %s2784_s20, %s15_s20   ;;  %s2737_s19 = sphi %s2782_s19, %s3315_s19   ;;  %s2733_s18 = sphi %s2780_s18, %s3314_s18  }
   0x3   : > { %p29_p1 = scmp.ge.s32.totalorder %s27_s21, 2  ;;  %p201_p2 = scmp.lt.s32.totalorder %s2741_s20, 3 }
   0x5   : > { %s3317_s21 = smov (%p29_p1, %s27_s21), 0  ;;  %p202_p3 = pnand %p2134_p0, %p201_p2 }
   0x6   : > { %v2575_v0 = vld [vmem:[%s3310_s2] sm:$0xff] (!%p202_p3)   ;;  %p233_p4 = scmp.lt.s32.totalorder (!%p202_p3), %s2733_s18, 1  ;;  %v2576_v1 = vld [vmem:[%s3310_s2 + $0x8] sm:$0xff] (!%p202_p3)   ;;  %vm297_vm0 = vcmask (!%p202_p3), 261120   ;;  %vm379_vm1 = vcmask (!%p202_p3), 523264   ;;  %vm527_vm2 = vcmask (!%p202_p3), 64512  }
   0x7   : > { %205 = sbr.rel (%p202_p3) target bundleno = 2222 (0x8ae), region = 40  ;;  %2308 = vmatprep.subr.bf16.mxu0 (!%p202_p3), %v2575_v0  ;;  %v2581_v2 = vld [vmem:[%s3309_s1] sm:$0xff] (!%p202_p3)   ;;  %v2582_v3 = vld [vmem:[%s3309_s1 + $0x8] sm:$0xff] (!%p202_p3)   ;;  %s2743_s9 = smov (!%p202_p3), 96   ;;  %vm1115_vm3 = vcmask (!%p202_p3), 1043456  }
   0x8   : > { %2309 = vmatpush3.bf16.msra.mxu0 (!%p202_p3), %v2575_v0  ;;  %2320 = vmatprep.subr.bf16.mxu1 (!%p202_p3), %v2581_v2  ;;  %s2744_s10 = smov (!%p202_p3), 120   ;;  %s2745_s11 = smov (!%p202_p3), 88  }
   0x9   : > { %2310 = vmatprep.subr.bf16.mxu0 (!%p202_p3), %v2576_v1  ;;  %2321 = vmatpush3.bf16.msra.mxu1 (!%p202_p3), %v2581_v2  ;;  %s2746_s12 = smov (!%p202_p3), 112   ;;  %s2747_s13 = smov (!%p202_p3), 104  }
   0xa   : > { %2322 = vmatprep.subr.bf16.mxu1 (!%p202_p3), %v2582_v3  ;;  %s2748_s14 = smov (!%p202_p3), 80   ;;  %s2749_s23 = smov (!%p202_p3), 72  }
   0xc   : > { %2311 = vmatpush3.bf16.msra.mxu0 (!%p202_p3), %v2576_v1 }
   0xd   : > { %2323 = vmatpush3.bf16.msra.mxu1 (!%p202_p3), %v2582_v3 }
   0xe   : > { %s3319_s18 = smov (!%p233_p4, %s2733_s18), 1 }
   0xf   : > { %s2210_s30 = sshll.u32 %s3319_s18, 5  ;;  %s2211_s28 = sshll.u32 %s3319_s18, 6 }
  0x10   : > { %s237_s8 = scalar_lea.vmem %s3308_s0, %s2210_s30 }
  0x11   : > { %v2577_v4 = vld [vmem:[%s237_s8] sm:$0xff]   ;;  %v2578_v5 = vld [vmem:[%s237_s8 + $0x8] sm:$0xff]   ;;  %v2579_v6 = vld [vmem:[%s237_s8 + $0x10] sm:$0xff]  }
  0x12   : > { %2312 = vmatprep.mubr.msk.bf16.mxu0 %vm297_vm0, %v2577_v4  ;;  %v2583_v7 = vld [vmem:[%s237_s8] sm:$0xff]   ;;  %v2584_v8 = vld [vmem:[%s237_s8 + $0x8] sm:$0xff]   ;;  %v2585_v9 = vld [vmem:[%s237_s8 + $0x10] sm:$0xff]  }
  0x13   : > { %2313 = vmatmul.mubr.msk.bf16.vlgmr.msra.gmra.mrb[0].mxu0 %vm297_vm0, %v2578_v5  ;;  %2324 = vmatprep.mubr.msk.bf16.mxu1 %vm297_vm0, %v2583_v7  ;;  %v2580_v10 = vld [vmem:[%s237_s8 + $0x18] sm:$0xff]  }
  0x14   : > { %2316 = vmatprep.mubr.msk.bf16.mxu0 %vm297_vm0, %v2579_v6  ;;  %2325 = vmatmul.mubr.msk.bf16.vlgmr.msra.gmra.mrb[0].mxu1 %vm297_vm0, %v2584_v8  ;;  %v2586_v11 = vld [vmem:[%s237_s8 + $0x18] sm:$0xff]   ;;  %s246_s8 = scalar_lea.vmem %s3313_s5, %s2211_s28 }
  0x15   : > { %2328 = vmatprep.mubr.msk.bf16.mxu1 %vm297_vm0, %v2585_v9 }
  0x1b   : > { %2317 = vmatmul.mubr.msk.bf16.gmra.mrb[4].mxu0 %vm297_vm0, %v2580_v10 }
  0x1c   : > { %2329 = vmatmul.mubr.msk.bf16.gmra.mrb[4].mxu1 %vm297_vm0, %v2586_v11 }
  0xe6   : > { %v2314_v12 = vpop.f32.mrb[0].mxu0 }
  0xe7   : > { %v344_v13 = vpop.f32.mrb[1].mxu0  ;;  %v2326_v17 = vpop.f32.mrb[0].mxu1 }
  0xe8   : > { %v2315_v14 = vpop.f32.mrb[2].mxu0  ;;  %v480_v19 = vpop.f32.mrb[1].mxu1 }
  0xe9   : > { %v376_v15 = vpack.c.bf16 %v2315_v14, %v2314_v12  ;;  %v347_v16 = vpop.f32.mrb[3].mxu0  ;;  %v2327_v20 = vpop.f32.mrb[2].mxu1 }
  0xea   : > { %v375_v18 = vpack.c.bf16 %v347_v16, %v344_v13  ;;  %v512_v21 = vpack.c.bf16 %v2327_v20, %v2326_v17  ;;  %v483_v22 = vpop.f32.mrb[3].mxu1 }
  0xeb   : > { %381 = vst.msk [vmem:[#allocation2 + $0x8] sm:$0xff] %vm379_vm1, %v376_v15  ;;  %v511_v23 = vpack.c.bf16 %v483_v22, %v480_v19 }
  0xec   : > { %380 = vst.msk [vmem:[#allocation2] sm:$0xff] %vm379_vm1, %v375_v18 }
  0xed   : > { %516 = vst.msk [vmem:[#allocation3 + $0x8] sm:$0xff] %vm297_vm0, %v512_v21  ;;  %515 = vst.msk [vmem:[#allocation3] sm:$0xff] %vm297_vm0, %v511_v23 }
  0xee   : > { %v2318_v24 = vpop.f32.mrb[4].mxu0 }
  0xef   : > { %v360_v25 = vpop.f32.mrb[5].mxu0  ;;  %v2330_v29 = vpop.f32.mrb[4].mxu1 }
  0xf0   : > { %v2319_v26 = vpop.f32.mrb[6].mxu0  ;;  %v496_v32 = vpop.f32.mrb[5].mxu1 }
  0xf1   : > { %v378_v27 = vpack.c.bf16 %v2319_v26, %v2318_v24  ;;  %v363_v28 = vpop.f32.mrb[7].mxu0  ;;  %v2331_v34 = vpop.f32.mrb[6].mxu1 }
  0xf2   : > { %v2828_v30 = vld [vmem:[#allocation2 + $0x8] sm:$0xff]  ;;  %v377_v31 = vpack.c.bf16 %v363_v28, %v360_v25  ;;  %v514_v36 = vpack.c.bf16 %v2331_v34, %v2330_v29  ;;  %v499_v37 = vpop.f32.mrb[7].mxu1 }
  0xf3   : > { %383 = vst.msk [vmem:[#allocation2 + $0x18] sm:$0xff] %vm379_vm1, %v378_v27  ;;  %708 = vrot.lane.b32.xlu1 %v2828_v30, %s2743_s9  ;;  %v2832_v33 = vld [vmem:[#allocation2] sm:$0xff]  ;;  %v513_v38 = vpack.c.bf16 %v499_v37, %v496_v32  ;;  %v544_v41 = vsel %vm527_vm2, %v2828_v30, 0 }
  0xf4   : > { %706 = vrot.lane.b32.xlu0 %v2832_v33, %s2743_s9  ;;  %382 = vst.msk [vmem:[#allocation2 + $0x10] sm:$0xff] %vm379_vm1, %v377_v31  ;;  %2524 = vmatprep.subr.msk.bf16.mxu0 %vm527_vm2, %v2832_v33  ;;  %v541_v35 = vsel %vm527_vm2, %v2832_v33, 0  ;;  %v2843_v39 = vld [vmem:[#allocation3] sm:$0xff]  ;;  %v2866_v46 = vld [vmem:[#allocation3 + $0x8] sm:$0xff] }
  0xf5   : > { %2333 = vmatpush3.bf16.xpose.msra.mxu0 %v541_v35  ;;  %518 = vst.msk [vmem:[#allocation3 + $0x18] sm:$0xff] %vm297_vm0, %v514_v36  ;;  %2340 = vmatprep.mubr.msk.bf16.mxu0 %vm527_vm2, %v2843_v39  ;;  %517 = vst.msk [vmem:[#allocation3 + $0x10] sm:$0xff] %vm297_vm0, %v513_v38 }
  0xf6   : > { %2525 = vmatprep.subr.msk.bf16.mxu0 %vm527_vm2, %v2828_v30 }
  0xfa   : > { %v2848_v40 = vld [vmem:[#allocation2 + $0x18] sm:$0xff] }
  0xfb   : > { %712 = vrot.lane.b32.xlu1 %v2848_v40, %s2743_s9  ;;  %v2853_v42 = vld [vmem:[#allocation2 + $0x10] sm:$0xff]  ;;  %v550_v44 = vsel %vm527_vm2, %v2848_v40, 0 }
  0xfc   : > { %v547_v43 = vsel %vm527_vm2, %v2853_v42, 0  ;;  %v2864_v45 = vld [vmem:[#allocation3 + $0x10] sm:$0xff]  ;;  %v2872_v47 = vld [vmem:[#allocation3 + $0x18] sm:$0xff] }
  0xfd   : > { %2335 = vmatpush3.bf16.xpose.msra.mxu0 %v544_v41 }
  0xfe   : > { %2526 = vmatprep.subr.msk.bf16.mxu0 %vm527_vm2, %v2853_v42 }
  0xff   : > { %710 = vrot.lane.b32.xlu1 %v2853_v42, %s2743_s9 }
 0x105   : > { %2337 = vmatpush3.bf16.xpose.msra.mxu0 %v547_v43 }
 0x106   : > { %2527 = vmatprep.subr.msk.bf16.mxu0 %vm527_vm2, %v2848_v40 }
 0x10d   : > { %2339 = vmatpush3.bf16.xpose.msra.mxu0 %v550_v44 }
 0x114   : > { %2341 = vmatmul.mubr.msk.bf16.vlgmr.msra.gmra.mrb[8].mxu0 %vm527_vm2, %v2866_v46 }
 0x115   : > { %2344 = vmatprep.mubr.msk.bf16.mxu0 %vm527_vm2, %v2864_v45 }
 0x11c   : > { %2345 = vmatmul.mubr.msk.bf16.gmra.mrb[12].mxu0 %vm527_vm2, %v2872_v47 }
 0x165   : > { %v709_v49 = vpop.permute.xlu1 %708 }
 0x166   : > { %v707_v48 = vpop.permute.xlu0 %706 }
 0x167   : > { %2348 = vmatprep.subr.bf16.mxu1 %v707_v48 }
 0x168   : > { %2349 = vmatpush3.bf16.msra.mxu1 %v707_v48 }
 0x169   : > { %2350 = vmatprep.subr.bf16.mxu1 %v709_v49 }
 0x16c   : > { %2351 = vmatpush3.bf16.msra.mxu1 %v709_v49 }
 0x16d   : > { %v713_v50 = vpop.permute.xlu1 %712 }
 0x171   : > { %v711_v51 = vpop.permute.xlu1 %710 }
 0x172   : > { %2352 = vmatprep.subr.bf16.mxu1 %v711_v51 }
 0x173   : > { %2353 = vmatpush3.bf16.msra.mxu1 %v711_v51 }
 0x174   : > { %2354 = vmatprep.subr.bf16.mxu1 %v713_v50 }
 0x177   : > { %2355 = vmatpush3.bf16.msra.mxu1 %v713_v50 }
 0x1e7   : > { %v2342_v52 = vpop.f32.mrb[8].mxu0 }
 0x1e8   : > { %v586_v53 = vpop.f32.mrb[9].mxu0  ;;  %v624_v54 = vsel %vm379_vm1, %v2342_v52, -inf }
 0x1e9   : > { %625 = vmax.xlane.f32.xlu1 %v624_v54  ;;  %v2343_v55 = vpop.f32.mrb[10].mxu0  ;;  %v618_v56 = vsel %vm379_vm1, %v586_v53, -inf }
 0x1ea   : > { %619 = vmax.xlane.f32.xlu0 %v618_v56  ;;  %v589_v57 = vpop.f32.mrb[11].mxu0  ;;  %v627_v58 = vsel %vm379_vm1, %v2343_v55, -inf }
 0x1eb   : > { %v621_v59 = vsel %vm379_vm1, %v589_v57, -inf }
 0x1ed   : > { %628 = vmax.xlane.f32.xlu1 %v627_v58 }
 0x1ee   : > { %622 = vmax.xlane.f32.xlu0 %v621_v59 }
 0x1ef   : > { %v2346_v60 = vpop.f32.mrb[12].mxu0 }
 0x1f0   : > { %v636_v61 = vsel %vm379_vm1, %v2346_v60, -inf  ;;  %v2881_v62 = vpop.f32.mrb[13].mxu0 }
 0x1f1   : > { %v2347_v63 = vpop.f32.mrb[14].mxu0  ;;  %v630_v1 = vsel %vm379_vm1, %v2881_v62, -inf }
 0x1f2   : > { %637 = vmax.xlane.f32.xlu0 %v636_v61  ;;  %v2883_v0 = vpop.f32.mrb[15].mxu0  ;;  %v639_v2 = vsel %vm379_vm1, %v2347_v63, -inf }
 0x1f3   : > { %v633_v3 = vsel %vm379_vm1, %v2883_v0, -inf }
 0x1f6   : > { %631 = vmax.xlane.f32.xlu0 %v630_v1 }
 0x1fa   : > { %640 = vmax.xlane.f32.xlu0 %v639_v2 }
 0x1fe   : > { %822 = vrot.lane.b32.xlu1 %v2828_v30, %s2744_s10 }
 0x202   : > { %824 = vrot.lane.b32.xlu1 %v2853_v42, %s2744_s10 }
 0x210   : > { %820 = vrot.lane.b32.xlu0 %v2832_v33, %s2744_s10 }
 0x214   : > { %812 = vrot.lane.b32.xlu0 %v2843_v39, %s2744_s10 }
 0x218   : > { %816 = vrot.lane.b32.xlu0 %v2864_v45, %s2744_s10 }
 0x21c   : > { %1001 = vrot.lane.b32.xlu0 %v2832_v33, %s2745_s11 }
 0x226   : > { %634 = vmax.xlane.f32.xlu1 %v633_v3 }
 0x237   : > { %826 = vrot.lane.b32.xlu1 %v2848_v40, %s2744_s10 }
 0x23b   : > { %814 = vrot.lane.b32.xlu1 %v2866_v46, %s2744_s10 }
 0x23f   : > { %818 = vrot.lane.b32.xlu1 %v2872_v47, %s2744_s10 }
 0x243   : > { %1003 = vrot.lane.b32.xlu1 %v2828_v30, %s2745_s11 }
 0x247   : > { %1005 = vrot.lane.b32.xlu1 %v2853_v42, %s2745_s11 }
 0x24b   : > { %1007 = vrot.lane.b32.xlu1 %v2848_v40, %s2745_s11 }
 0x276   : > { %v626_v4 = vpop.xlane.xlu1 %625 }
 0x277   : > { %v644_v5 = vsub.f32 %v2342_v52, %v626_v4  ;;  %v620_v6 = vpop.xlane.xlu0 %619 }
 0x278   : > { %v642_v7 = vsub.f32 %v586_v53, %v620_v6 }
 0x279   : > { %v654_v8 = vmul.f32 1.442695, %v644_v5 }
 0x27a   : > { %v650_v9 = vmul.f32 1.442695, %v642_v7  ;;  %v629_v10 = vpop.xlane.xlu1 %628 }
 0x27b   : > { %v645_v11 = vsub.f32 %v2343_v55, %v629_v10  ;;  %v623_v12 = vpop.xlane.xlu0 %622  ;;  %2587 = vpow2.f32 %v654_v8 }
 0x27c   : > { %v643_v13 = vsub.f32 %v589_v57, %v623_v12  ;;  %2589 = vpow2.f32 %v650_v9 }
 0x27d   : > { %v656_v14 = vmul.f32 1.442695, %v645_v11 }
 0x27e   : > { %v652_v15 = vmul.f32 1.442695, %v643_v13  ;;  %v823_v32 = vpop.permute.xlu1 %822 }
 0x27f   : > { %2591 = vpow2.f32 %v656_v14  ;;  %v638_v16 = vpop.xlane.xlu0 %637  ;;  %v844_v36 = vsel %vm527_vm2, %v823_v32, 0 }
 0x280   : > { %2593 = vpow2.f32 %v652_v15  ;;  %v648_v17 = vsub.f32 %v2346_v60, %v638_v16 }
 0x282   : > { %v662_v20 = vmul.f32 1.442695, %v648_v17  ;;  %v825_v37 = vpop.permute.xlu1 %824 }
 0x283   : > { %v632_v18 = vpop.xlane.xlu0 %631  ;;  %v847_v41 = vsel %vm527_vm2, %v825_v37, 0 }
 0x284   : > { %2595 = vpow2.f32 %v662_v20  ;;  %v646_v44 = vsub.f32 %v2881_v62, %v632_v18 }
 0x285   : > { %v2902_v19 = vpop.eup %2587 }
 0x286   : > { %v2904_v22 = vpop.eup %2589  ;;  %v658_v48 = vmul.f32 1.442695, %v646_v44 }
 0x287   : > { %v641_v21 = vpop.xlane.xlu0 %640 }
 0x288   : > { %v649_v23 = vsub.f32 %v2347_v63, %v641_v21 }
 0x289   : > { %v2906_v24 = vpop.eup %2591 }
 0x28a   : > { %v2908_v25 = vpop.eup %2593  ;;  %v699_v26 = vpack.c.bf16 %v2906_v24, %v2902_v19  ;;  %v664_v27 = vmul.f32 1.442695, %v649_v23 }
 0x28b   : > { %v821_v28 = vpop.permute.xlu0 %820  ;;  %v698_v29 = vpack.c.bf16 %v2908_v25, %v2904_v22 }
 0x28c   : > { %2597 = vpow2.f32 %v664_v27  ;;  %v841_v31 = vsel %vm527_vm2, %v821_v28, 0  ;;  %2528 = vmatprep.subr.msk.bf16.mxu1 %vm527_vm2, %v821_v28  ;;  %v666_v28 = vsel %vm379_vm1, %v2904_v22, 0.0 }
 0x28d   : > { %2356 = vmatprep.mubr.msk.bf16.mxu1 %vm379_vm1, %v698_v29  ;;  %2599 = vpow2.f32 %v658_v48 }
 0x28e   : > { %2357 = vmatmul.mubr.msk.bf16.vlgmr.msra.gmra.mrb[8].mxu1 %vm379_vm1, %v699_v26  ;;  %v2919_v34 = vpop.eup %2595 }
 0x28f   : > { %2365 = vmatpush3.bf16.xpose.msra.mxu1 %v841_v31  ;;  %v813_v43 = vpop.permute.xlu0 %812 }
 0x290   : > { %2529 = vmatprep.subr.msk.bf16.mxu1 %vm527_vm2, %v823_v32  ;;  %v675_v32 = vsel %vm379_vm1, %v2906_v24, 0.0 }
 0x293   : > { %v817_v49 = vpop.permute.xlu0 %816 }
 0x296   : > { %v2921_v35 = vpop.eup %2597 }
 0x297   : > { %2367 = vmatpush3.bf16.xpose.msra.mxu1 %v844_v36  ;;  %v701_v38 = vpack.c.bf16 %v2921_v35, %v2919_v34  ;;  %v1002_v55 = vpop.permute.xlu0 %1001  ;;  %v2932_v57 = vpop.eup %2599 }
 0x298   : > { %2530 = vmatprep.subr.msk.bf16.mxu1 %vm527_vm2, %v825_v37 }
 0x29f   : > { %2369 = vmatpush3.bf16.xpose.msra.mxu1 %v847_v41 }
 0x2b3   : > { %v635_v50 = vpop.xlane.xlu1 %634 }
 0x2b4   : > { %v647_v51 = vsub.f32 %v2883_v0, %v635_v50  ;;  %v684_v50 = vsel %vm379_vm1, %v2919_v34, 0.0 }
 0x2b6   : > { %v660_v52 = vmul.f32 1.442695, %v647_v51 }
 0x2b7   : > { %v827_v53 = vpop.permute.xlu1 %826 }
 0x2b8   : > { %2601 = vpow2.f32 %v660_v52  ;;  %2531 = vmatprep.subr.msk.bf16.mxu1 %vm527_vm2, %v827_v53  ;;  %v850_v54 = vsel %vm527_vm2, %v827_v53, 0 }
 0x2b9   : > { %2371 = vmatpush3.bf16.xpose.msra.mxu1 %v850_v54 }
 0x2ba   : > { %2380 = vmatprep.subr.bf16.mxu1 %v1002_v55 }
 0x2bb   : > { %v815_v56 = vpop.permute.xlu1 %814 }
 0x2bf   : > { %v819_v60 = vpop.permute.xlu1 %818 }
 0x2c2   : > { %v2934_v58 = vpop.eup %2601 }
 0x2c3   : > { %v700_v59 = vpack.c.bf16 %v2934_v58, %v2932_v57  ;;  %v1004_v61 = vpop.permute.xlu1 %1003  ;;  %v681_v24 = vsel %vm379_vm1, %v2934_v58, 0.0 }
 0x2c5   : > { %2360 = vmatprep.mubr.msk.bf16.mxu1 %vm379_vm1, %v700_v59 }
 0x2c6   : > { %2361 = vmatmul.mubr.msk.bf16.gmra.mrb[12].mxu1 %vm379_vm1, %v701_v38 }
 0x2c7   : > { %2372 = vmatprep.mubr.msk.bf16.mxu1 %vm527_vm2, %v813_v43  ;;  %v1006_v62 = vpop.permute.xlu1 %1005 }
 0x2cb   : > { %v1008_v63 = vpop.permute.xlu1 %1007 }
 0x2ce   : > { %2373 = vmatmul.mubr.msk.bf16.vlgmr.msra.gmra.mrb[16].mxu1 %vm527_vm2, %v815_v56  ;;  %v687_v56 = vsel %vm379_vm1, %v2921_v35, 0.0 }
 0x2cf   : > { %2381 = vmatpush3.bf16.msra.mxu1 %v1002_v55  ;;  %2376 = vmatprep.mubr.msk.bf16.mxu1 %vm527_vm2, %v817_v49 }
 0x2d0   : > { %2382 = vmatprep.subr.bf16.mxu1 %v1004_v61 }
 0x2d3   : > { %2383 = vmatpush3.bf16.msra.mxu1 %v1004_v61 }
 0x2d4   : > { %2384 = vmatprep.subr.bf16.mxu1 %v1006_v62 }
 0x2d6   : > { %2377 = vmatmul.mubr.msk.bf16.gmra.mrb[20].mxu1 %vm527_vm2, %v819_v60 }
 0x2d7   : > { %2385 = vmatpush3.bf16.msra.mxu1 %v1006_v62 }
 0x2d8   : > { %2386 = vmatprep.subr.bf16.mxu1 %v1008_v63 }
 0x2db   : > { %2387 = vmatpush3.bf16.msra.mxu1 %v1008_v63 }
 0x361   : > { %v2944_v0 = vpop.f32.mrb[8].mxu1 }
 0x362   : > { %v2946_v1 = vpop.f32.mrb[9].mxu1 }
 0x363   : > { %v2948_v2 = vpop.f32.mrb[10].mxu1 }
 0x364   : > { %v2950_v3 = vpop.f32.mrb[11].mxu1 }
 0x399   : > { %v2952_v4 = vpop.f32.mrb[12].mxu1 }
 0x39a   : > { %v2954_v5 = vpop.f32.mrb[13].mxu1 }
 0x39b   : > { %v2956_v6 = vpop.f32.mrb[14].mxu1 }
 0x39c   : > { %v2958_v7 = vpop.f32.mrb[15].mxu1 }
 0x3a1   : > { %v2374_v8 = vpop.f32.mrb[16].mxu1 }
 0x3a2   : > { %v886_v9 = vpop.f32.mrb[17].mxu1  ;;  %v923_v10 = vsel %vm379_vm1, %v2374_v8, -inf }
 0x3a3   : > { %924 = vmax.xlane.f32.xlu0 %v923_v10  ;;  %v2375_v11 = vpop.f32.mrb[18].mxu1  ;;  %v917_v14 = vsel %vm379_vm1, %v886_v9, -inf }
 0x3a4   : > { %v889_v12 = vpop.f32.mrb[19].mxu1  ;;  %v926_v17 = vsel %vm379_vm1, %v2375_v11, -inf }
 0x3a5   : > { %v920_v13 = vsel %vm379_vm1, %v889_v12, -inf }
 0x3a6   : > { %921 = vmax.xlane.f32.xlu1 %v920_v13 }
 0x3a7   : > { %918 = vmax.xlane.f32.xlu0 %v917_v14 }
 0x3a9   : > { %v2963_v15 = vpop.f32.mrb[20].mxu1 }
 0x3aa   : > { %v2965_v16 = vpop.f32.mrb[21].mxu1  ;;  %v935_v21 = vsel %vm379_vm1, %v2963_v15, -inf }
 0x3ab   : > { %927 = vmax.xlane.f32.xlu0 %v926_v17  ;;  %v2968_v18 = vpop.f32.mrb[22].mxu1  ;;  %v929_v23 = vsel %vm379_vm1, %v2965_v16, -inf }
 0x3ac   : > { %v2970_v20 = vpop.f32.mrb[23].mxu1  ;;  %v938_v26 = vsel %vm379_vm1, %v2968_v18, -inf }
 0x3ad   : > { %v932_v27 = vsel %vm379_vm1, %v2970_v20, -inf }
 0x3af   : > { %936 = vmax.xlane.f32.xlu0 %v935_v21 }
 0x3b3   : > { %930 = vmax.xlane.f32.xlu0 %v929_v23 }
 0x3b7   : > { %1274 = vrot.lane.b32.xlu1 %v2828_v30, %s2746_s12  ;;  %939 = vmax.xlane.f32.xlu0 %v938_v26 }
 0x3bb   : > { %1276 = vrot.lane.b32.xlu1 %v2853_v42, %s2746_s12 }
 0x3cd   : > { %1272 = vrot.lane.b32.xlu0 %v2832_v33, %s2746_s12 }
 0x3d1   : > { %1264 = vrot.lane.b32.xlu0 %v2843_v39, %s2746_s12 }
 0x3d5   : > { %1268 = vrot.lane.b32.xlu0 %v2864_v45, %s2746_s12 }
 0x3d9   : > { %1651 = vrot.lane.b32.xlu0 %v2832_v33, %s2747_s13 }
 0x3dd   : > { %1655 = vrot.lane.b32.xlu0 %v2853_v42, %s2747_s13 }
 0x3df   : > { %933 = vmax.xlane.f32.xlu1 %v932_v27 }
 0x3e1   : > { %1643 = vrot.lane.b32.xlu0 %v2843_v39, %s2747_s13  ;;  %v669_v39 = vsel %vm379_vm1, %v2908_v25, 0.0  ;;  %v678_v25 = vsel %vm379_vm1, %v2932_v57, 0.0 }
 0x3e5   : > { %1647 = vrot.lane.b32.xlu0 %v2864_v45, %s2747_s13  ;;  %v672_v45 = vsel %vm379_vm1, %v2902_v19, 0.0 }
 0x3e9   : > { %1649 = vrot.lane.b32.xlu0 %v2872_v47, %s2747_s13 }
 0x3f0   : > { %1278 = vrot.lane.b32.xlu1 %v2848_v40, %s2746_s12 }
 0x3f4   : > { %1266 = vrot.lane.b32.xlu1 %v2866_v46, %s2746_s12 }
 0x3f8   : > { %1270 = vrot.lane.b32.xlu1 %v2872_v47, %s2746_s12 }
 0x3fc   : > { %1653 = vrot.lane.b32.xlu1 %v2828_v30, %s2747_s13 }
 0x400   : > { %1657 = vrot.lane.b32.xlu1 %v2848_v40, %s2747_s13 }
 0x404   : > { %1645 = vrot.lane.b32.xlu1 %v2866_v46, %s2747_s13 }
 0x428   : > { %667 = vadd.xlane.f32.xlu1 %v666_v28 }
 0x42c   : > { %670 = vadd.xlane.f32.xlu1 %v669_v39 }
 0x430   : > { %v925_v29 = vpop.xlane.xlu0 %924  ;;  %673 = vadd.xlane.f32.xlu1 %v672_v45 }
 0x431   : > { %v943_v47 = vsub.f32 %v2374_v8, %v925_v29 }
 0x433   : > { %v922_v31 = vpop.xlane.xlu1 %921  ;;  %v953_v22 = vmul.f32 1.442695, %v943_v47 }
 0x434   : > { %v942_v36 = vsub.f32 %v889_v12, %v922_v31  ;;  %v919_v46 = vpop.xlane.xlu0 %918  ;;  %676 = vadd.xlane.f32.xlu1 %v675_v32 }
 0x435   : > { %v941_v37 = vsub.f32 %v886_v9, %v919_v46 }
 0x436   : > { %v951_v38 = vmul.f32 1.442695, %v942_v36 }
 0x437   : > { %v949_v41 = vmul.f32 1.442695, %v941_v37 }
 0x438   : > { %2603 = vpow2.f32 %v951_v38  ;;  %v928_v43 = vpop.xlane.xlu0 %927  ;;  %679 = vadd.xlane.f32.xlu1 %v678_v25 }
 0x439   : > { %2605 = vpow2.f32 %v949_v41  ;;  %v944_v19 = vsub.f32 %v2375_v11, %v928_v43  ;;  %v1275_v11 = vpop.permute.xlu1 %1274 }
 0x43a   : > { %2607 = vpow2.f32 %v953_v22 }
 0x43b   : > { %v955_v44 = vmul.f32 1.442695, %v944_v19 }
 0x43c   : > { %v937_v48 = vpop.xlane.xlu0 %936  ;;  %682 = vadd.xlane.f32.xlu1 %v681_v24 }
 0x43d   : > { %2609 = vpow2.f32 %v955_v44  ;;  %v947_v49 = vsub.f32 %v2963_v15, %v937_v48  ;;  %v1296_v15 = vsel %vm527_vm2, %v1275_v11, 0  ;;  %v1277_v17 = vpop.permute.xlu1 %1276 }
 0x43e   : > { %v1299_v28 = vsel %vm527_vm2, %v1277_v17, 0 }
 0x43f   : > { %v961_v53 = vmul.f32 1.442695, %v947_v49  ;;  %v1102_v49 = vld [vmem:[%s3311_s3 + $0x4] sm:$0xf] }
 0x440   : > { %v931_v51 = vpop.xlane.xlu0 %930  ;;  %685 = vadd.xlane.f32.xlu1 %v684_v50  ;;  %2532 = vmatprep.subr.msk.bf16.mxu0 %vm1115_vm3, %v1102_v49  ;;  %v1117_v50 = vsel %vm1115_vm3, %v1102_v49, 0 }
 0x441   : > { %v945_v54 = vsub.f32 %v2965_v16, %v931_v51  ;;  %2611 = vpow2.f32 %v961_v53  ;;  %2397 = vmatpush3.bf16.msra.mxu0 %v1117_v50  ;;  %v3061_v51 = vld [vmem:[%s3311_s3] sm:$0xf] }
 0x442   : > { %v2604_v52 = vpop.eup %2603  ;;  %2533 = vmatprep.subr.msk.bf16.mxu0 %vm1115_vm3, %v3061_v51 }
 0x443   : > { %v2606_v55 = vpop.eup %2605  ;;  %v968_v57 = vsel %vm379_vm1, %v2604_v52, 0.0  ;;  %v957_v34 = vmul.f32 1.442695, %v945_v54 }
 0x444   : > { %v2608_v58 = vpop.eup %2607  ;;  %v940_v59 = vpop.xlane.xlu0 %939  ;;  %688 = vadd.xlane.f32.xlu1 %v687_v56  ;;  %969 = vadd.xlane.f32.xlu0 %v968_v57  ;;  %v997_v60 = vpack.c.bf16 %v2604_v52, %v2606_v55  ;;  %v965_v12 = vsel %vm379_vm1, %v2606_v55, 0.0 }
 0x445   : > { %v948_v61 = vsub.f32 %v2968_v18, %v940_v59  ;;  %v971_v8 = vsel %vm379_vm1, %v2608_v58, 0.0 }
 0x446   : > { %2388 = vmatprep.mubr.msk.bf16.mxu1 %vm379_vm1, %v997_v60 }
 0x447   : > { %v2610_v62 = vpop.eup %2609  ;;  %v963_v63 = vmul.f32 1.442695, %v948_v61 }
 0x448   : > { %v998_v9 = vpack.c.bf16 %v2610_v62, %v2608_v58  ;;  %v1273_v10 = vpop.permute.xlu0 %1272  ;;  %972 = vadd.xlane.f32.xlu1 %v971_v8  ;;  %v974_v13 = vsel %vm379_vm1, %v2610_v62, 0.0 }
 0x449   : > { %2613 = vpow2.f32 %v963_v63  ;;  %v1293_v35 = vsel %vm527_vm2, %v1273_v10, 0  ;;  %2534 = vmatprep.subr.msk.bf16.mxu1 %vm527_vm2, %v1273_v10 }
 0x44a   : > { %2615 = vpow2.f32 %v957_v34  ;;  %2389 = vmatmul.mubr.msk.bf16.vlgmr.msra.gmra.mrb[24].mxu1 %vm379_vm1, %v998_v9 }
 0x44b   : > { %2417 = vmatpush3.bf16.xpose.msra.mxu1 %v1293_v35  ;;  %v2612_v14 = vpop.eup %2611 }
 0x44c   : > { %2535 = vmatprep.subr.msk.bf16.mxu1 %vm527_vm2, %v1275_v11  ;;  %966 = vadd.xlane.f32.xlu1 %v965_v12  ;;  %v983_v18 = vsel %vm379_vm1, %v2612_v14, 0.0  ;;  %v1265_v39 = vpop.permute.xlu0 %1264 }
 0x450   : > { %975 = vadd.xlane.f32.xlu1 %v974_v13  ;;  %v1269_v45 = vpop.permute.xlu0 %1268 }
 0x453   : > { %v2614_v16 = vpop.eup %2613  ;;  %2419 = vmatpush3.bf16.xpose.msra.mxu1 %v1296_v15 }
 0x454   : > { %v2616_v21 = vpop.eup %2615  ;;  %2536 = vmatprep.subr.msk.bf16.mxu1 %vm527_vm2, %v1277_v17  ;;  %984 = vadd.xlane.f32.xlu1 %v983_v18  ;;  %v986_v23 = vsel %vm379_vm1, %v2614_v16, 0.0  ;;  %v1000_v26 = vpack.c.bf16 %v2614_v16, %v2612_v14  ;;  %v1652_v46 = vpop.permute.xlu0 %1651 }
 0x455   : > { %987 = vadd.xlane.f32.xlu0 %v986_v23  ;;  %v977_v27 = vsel %vm379_vm1, %v2616_v21, 0.0 }
 0x458   : > { %978 = vadd.xlane.f32.xlu1 %v977_v27  ;;  %v1656_v41 = vpop.permute.xlu0 %1655 }
 0x459   : > { %v1678_v44 = vsel %vm527_vm2, %v1656_v41, 0 }
 0x45b   : > { %2421 = vmatpush3.bf16.xpose.msra.mxu1 %v1299_v28 }
 0x45c   : > { %v1644_v43 = vpop.permute.xlu0 %1643 }
 0x460   : > { %v1648_v53 = vpop.permute.xlu0 %1647 }
 0x464   : > { %v1650_v54 = vpop.permute.xlu0 %1649 }
 0x469   : > { %1455 = vrot.lane.b32.xlu1 %v2828_v30, %s2748_s14 }
 0x46b   : > { %1453 = vrot.lane.b32.xlu0 %v2832_v33, %s2748_s14 }
 0x46c   : > { %v934_v29 = vpop.xlane.xlu1 %933 }
 0x46d   : > { %v946_v47 = vsub.f32 %v2970_v20, %v934_v29  ;;  %v1672_v20 = vsel %vm527_vm2, %v1652_v46, 0 }
 0x46f   : > { %v959_v31 = vmul.f32 1.442695, %v946_v47 }
 0x470   : > { %v1279_v32 = vpop.permute.xlu1 %1278 }
 0x471   : > { %2617 = vpow2.f32 %v959_v31  ;;  %v1302_v36 = vsel %vm527_vm2, %v1279_v32, 0  ;;  %2537 = vmatprep.subr.msk.bf16.mxu1 %vm527_vm2, %v1279_v32 }
 0x472   : > { %2423 = vmatpush3.bf16.xpose.msra.mxu1 %v1302_v36 }
 0x473   : > { %2539 = vmatprep.subr.msk.bf16.mxu1 %vm527_vm2, %v1652_v46 }
 0x474   : > { %v1267_v30 = vpop.permute.xlu1 %1266 }
 0x478   : > { %v1271_v33 = vpop.permute.xlu1 %1270 }
 0x47b   : > { %v2618_v37 = vpop.eup %2617 }
 0x47c   : > { %v999_v22 = vpack.c.bf16 %v2618_v37, %v2616_v21  ;;  %v1654_v38 = vpop.permute.xlu1 %1653  ;;  %v980_v25 = vsel %vm379_vm1, %v2618_v37, 0.0 }
 0x47d   : > { %v1675_v19 = vsel %vm527_vm2, %v1654_v38, 0 }
 0x47e   : > { %2392 = vmatprep.mubr.msk.bf16.mxu1 %vm379_vm1, %v999_v22 }
 0x47f   : > { %2393 = vmatmul.mubr.msk.bf16.gmra.mrb[28].mxu1 %vm379_vm1, %v1000_v26 }
 0x480   : > { %2424 = vmatprep.mubr.msk.bf16.mxu1 %vm527_vm2, %v1265_v39  ;;  %v1658_v24 = vpop.permute.xlu1 %1657 }
 0x481   : > { %v1681_v48 = vsel %vm527_vm2, %v1658_v24, 0 }
 0x484   : > { %v1646_v52 = vpop.permute.xlu1 %1645 }
 0x487   : > { %2425 = vmatmul.mubr.msk.bf16.vlgmr.msra.gmra.mrb[32].mxu1 %vm527_vm2, %v1267_v30 }
 0x488   : > { %2459 = vmatpush3.bf16.xpose.msra.mxu1 %v1672_v20  ;;  %2428 = vmatprep.mubr.msk.bf16.mxu1 %vm527_vm2, %v1269_v45  ;;  %v1197_v20 = vsel %vm1115_vm3, %v3061_v51, 0 }
 0x489   : > { %2540 = vmatprep.subr.msk.bf16.mxu1 %vm527_vm2, %v1654_v38 }
 0x48d   : > { %981 = vadd.xlane.f32.xlu1 %v980_v25 }
 0x48f   : > { %2429 = vmatmul.mubr.msk.bf16.gmra.mrb[36].mxu1 %vm527_vm2, %v1271_v33 }
 0x490   : > { %2461 = vmatpush3.bf16.xpose.msra.mxu1 %v1675_v19  ;;  %2466 = vmatprep.mubr.msk.bf16.mxu1 %vm527_vm2, %v1644_v43 }
 0x491   : > { %2541 = vmatprep.subr.msk.bf16.mxu1 %vm527_vm2, %v1656_v41 }
 0x498   : > { %2463 = vmatpush3.bf16.xpose.msra.mxu1 %v1678_v44 }
 0x499   : > { %2542 = vmatprep.subr.msk.bf16.mxu1 %vm527_vm2, %v1658_v24 }
 0x4a0   : > { %2465 = vmatpush3.bf16.xpose.msra.mxu1 %v1681_v48 }
 0x4a7   : > { %2467 = vmatmul.mubr.msk.bf16.vlgmr.msra.gmra.mrb[40].mxu1 %vm527_vm2, %v1646_v52 }
 0x4a8   : > { %2470 = vmatprep.mubr.msk.bf16.mxu1 %vm527_vm2, %v1648_v53 }
 0x4af   : > { %2471 = vmatmul.mubr.msk.bf16.gmra.mrb[44].mxu1 %vm527_vm2, %v1650_v54 }
 0x4b5   : > { %v668_v55 = vpop.xlane.xlu1 %667 }
 0x4b6   : > { %2619 = vrcp.f32 %v668_v55 }
 0x4b9   : > { %v671_v56 = vpop.xlane.xlu1 %670 }
 0x4ba   : > { %2621 = vrcp.f32 %v671_v56 }
 0x4bd   : > { %v674_v57 = vpop.xlane.xlu1 %673 }
 0x4be   : > { %2623 = vrcp.f32 %v674_v57 }
 0x4c0   : > { %v2620_v58 = vpop.eup %2619 }
 0x4c1   : > { %v677_v59 = vpop.xlane.xlu1 %676  ;;  %v3069_v60 = vmul.f32 %v2620_v58, %v2946_v1 }
 0x4c2   : > { %2625 = vrcp.f32 %v677_v59 }
 0x4c4   : > { %v2622_v61 = vpop.eup %2621 }
 0x4c5   : > { %v680_v34 = vpop.xlane.xlu1 %679  ;;  %v3072_v62 = vmul.f32 %v2622_v61, %v2950_v3 }
 0x4c6   : > { %2627 = vrcp.f32 %v680_v34 }
 0x4c7   : > { %v803_v63 = vpack.c.bf16 %v3072_v62, %v3069_v60 }
 0x4c8   : > { %v2624_v8 = vpop.eup %2623 }
 0x4c9   : > { %v3077_v9 = vmul.f32 %v2624_v8, %v2944_v0  ;;  %v683_v10 = vpop.xlane.xlu1 %682 }
 0x4ca   : > { %2629 = vrcp.f32 %v683_v10 }
 0x4cc   : > { %v2626_v35 = vpop.eup %2625 }
 0x4cd   : > { %v3080_v1 = vmul.f32 %v2626_v35, %v2948_v2  ;;  %v686_v11 = vpop.xlane.xlu1 %685 }
 0x4ce   : > { %2631 = vrcp.f32 %v686_v11 }
 0x4cf   : > { %v804_v3 = vpack.c.bf16 %v3080_v1, %v3077_v9 }
 0x4d0   : > { %v2628_v12 = vpop.eup %2627 }
 0x4d1   : > { %v689_v13 = vpop.xlane.xlu1 %688  ;;  %v3085_v14 = vmul.f32 %v2628_v12, %v2954_v5  ;;  %v970_v27 = vpop.xlane.xlu0 %969 }
 0x4d2   : > { %2633 = vrcp.f32 %v689_v13 }
 0x4d3   : > { %2635 = vrcp.f32 %v970_v27 }
 0x4d4   : > { %v2630_v15 = vpop.eup %2629 }
 0x4d5   : > { %v3088_v0 = vmul.f32 %v2630_v15, %v2958_v7  ;;  %v973_v23 = vpop.xlane.xlu1 %972 }
 0x4d6   : > { %2637 = vrcp.f32 %v973_v23 }
 0x4d7   : > { %v805_v16 = vpack.c.bf16 %v3088_v0, %v3085_v14 }
 0x4d8   : > { %v2632_v2 = vpop.eup %2631 }
 0x4d9   : > { %v3093_v17 = vmul.f32 %v2632_v2, %v2952_v4  ;;  %v967_v26 = vpop.xlane.xlu1 %966 }
 0x4dc   : > { %v2634_v18 = vpop.eup %2633 }
 0x4dd   : > { %v3096_v21 = vmul.f32 %v2634_v18, %v2956_v6  ;;  %v976_v28 = vpop.xlane.xlu1 %975  ;;  %v2636_v7 = vpop.eup %2635 }
 0x4de   : > { %2639 = vrcp.f32 %v976_v28 }
 0x4df   : > { %v806_v5 = vpack.c.bf16 %v3096_v21, %v3093_v17  ;;  %2641 = vrcp.f32 %v967_v26 }
 0x4e0   : > { %v2638_v45 = vpop.eup %2637 }
 0x4e1   : > { %v985_v41 = vpop.xlane.xlu1 %984 }
 0x4e2   : > { %v988_v46 = vpop.xlane.xlu0 %987  ;;  %2643 = vrcp.f32 %v985_v41 }
 0x4e3   : > { %2645 = vrcp.f32 %v988_v46 }
 0x4e5   : > { %v979_v25 = vpop.xlane.xlu1 %978 }
 0x4e6   : > { %v1454_v38 = vpop.permute.xlu0 %1453  ;;  %2647 = vrcp.f32 %v979_v25 }
 0x4e8   : > { %v2640_v29 = vpop.eup %2639 }
 0x4e9   : > { %v2642_v31 = vpop.eup %2641  ;;  %v1456_v43 = vpop.permute.xlu1 %1455 }
 0x4ec   : > { %v2644_v44 = vpop.eup %2643 }
 0x4ed   : > { %v2646_v48 = vpop.eup %2645 }
 0x4f0   : > { %v2648_v50 = vpop.eup %2647 }
 0x51a   : > { %v982_v19 = vpop.xlane.xlu1 %981 }
 0x51b   : > { %2649 = vrcp.f32 %v982_v19 }
 0x51d   : > { %v2390_v39 = vpop.f32.mrb[24].mxu1 }
 0x51e   : > { %v1059_v4 = vpop.f32.mrb[25].mxu1  ;;  %v1092_v6 = vmul.f32 %v2638_v45, %v2390_v39 }
 0x51f   : > { %v2391_v47 = vpop.f32.mrb[26].mxu1  ;;  %v1090_v37 = vmul.f32 %v2642_v31, %v1059_v4 }
 0x520   : > { %v1093_v32 = vmul.f32 %v2640_v29, %v2391_v47  ;;  %v1062_v36 = vpop.f32.mrb[27].mxu1 }
 0x521   : > { %v1091_v30 = vmul.f32 %v2636_v7, %v1062_v36 }
 0x522   : > { %v1099_v22 = vpack.c.bf16 %v1093_v32, %v1092_v6 }
 0x523   : > { %v1098_v33 = vpack.c.bf16 %v1091_v30, %v1090_v37 }
 0x525   : > { %2398 = vmatprep.mubr.msk.bf16.mxu0 %vm527_vm2, %v1098_v33  ;;  %v2650_v52 = vpop.eup %2649 }
 0x526   : > { %2399 = vmatmul.mubr.msk.bf16.vlgmr.msra.gmra.mrb[16].mxu0 %vm527_vm2, %v1099_v22 }
 0x527   : > { %2407 = vmatpush3.bf16.msra.mxu0 %v1197_v20 }
 0x528   : > { %2432 = vmatprep.subr.bf16.mxu0 %v1454_v38 }
 0x552   : > { %v2394_v24 = vpop.f32.mrb[28].mxu1 }
 0x553   : > { %v1075_v49 = vpop.f32.mrb[29].mxu1  ;;  %v1096_v53 = vmul.f32 %v2644_v44, %v2394_v24 }
 0x554   : > { %v2395_v51 = vpop.f32.mrb[30].mxu1  ;;  %v1094_v56 = vmul.f32 %v2648_v50, %v1075_v49 }
 0x555   : > { %v1097_v54 = vmul.f32 %v2646_v48, %v2395_v51  ;;  %v1078_v55 = vpop.f32.mrb[31].mxu1 }
 0x556   : > { %v1095_v57 = vmul.f32 %v2650_v52, %v1078_v55 }
 0x557   : > { %v1101_v58 = vpack.c.bf16 %v1097_v54, %v1096_v53 }
 0x558   : > { %v1100_v59 = vpack.c.bf16 %v1095_v57, %v1094_v56 }
 0x55a   : > { %2402 = vmatprep.mubr.msk.bf16.mxu0 %vm527_vm2, %v1100_v59  ;;  %v2426_v61 = vpop.f32.mrb[32].mxu1 }
 0x55b   : > { %2403 = vmatmul.mubr.msk.bf16.gmra.mrb[20].mxu0 %vm527_vm2, %v1101_v58  ;;  %v3106_v34 = vpop.f32.mrb[33].mxu1  ;;  %v1375_v8 = vsel %vm379_vm1, %v2426_v61, -inf }
 0x55c   : > { %1376 = vmax.xlane.f32.xlu0 %v1375_v8  ;;  %2408 = vmatprep.mubr.msk.bf16.mxu0 %vm527_vm2, %v803_v63  ;;  %v2427_v10 = vpop.f32.mrb[34].mxu1  ;;  %v1369_v12 = vsel %vm379_vm1, %v3106_v34, -inf }
 0x55d   : > { %v3113_v35 = vpop.f32.mrb[35].mxu1  ;;  %v1378_v11 = vsel %vm379_vm1, %v2427_v10, -inf }
 0x55e   : > { %1379 = vmax.xlane.f32.xlu1 %v1378_v11  ;;  %v1372_v13 = vsel %vm379_vm1, %v3113_v35, -inf }
 0x560   : > { %1370 = vmax.xlane.f32.xlu0 %v1369_v12 }
 0x562   : > { %1373 = vmax.xlane.f32.xlu1 %v1372_v13  ;;  %v3120_v15 = vpop.f32.mrb[36].mxu1 }
 0x563   : > { %2409 = vmatmul.mubr.msk.bf16.vlgmr.msra.gmra.mrb[16].mxu0 %vm527_vm2, %v804_v3  ;;  %v3126_v60 = vpop.f32.mrb[37].mxu1  ;;  %v1387_v62 = vsel %vm379_vm1, %v3120_v15, -inf }
 0x564   : > { %2433 = vmatpush3.bf16.msra.mxu0 %v1454_v38  ;;  %1388 = vmax.xlane.f32.xlu0 %v1387_v62  ;;  %v2431_v63 = vpop.f32.mrb[38].mxu1  ;;  %v1381_v1 = vsel %vm379_vm1, %v3126_v60, -inf }
 0x565   : > { %2412 = vmatprep.mubr.msk.bf16.mxu0 %vm527_vm2, %v805_v16  ;;  %2434 = vmatprep.subr.bf16.mxu0 %v1456_v43  ;;  %v3134_v2 = vpop.f32.mrb[39].mxu1  ;;  %v1390_v9 = vsel %vm379_vm1, %v2431_v63, -inf }
 0x566   : > { %1391 = vmax.xlane.f32.xlu1 %v1390_v9  ;;  %v1384_v3 = vsel %vm379_vm1, %v3134_v2, -inf  ;;  %v1554_v9 = vld [vmem:[%s3311_s3 + $0x8] sm:$0xf] }
 0x568   : > { %2435 = vmatpush3.bf16.msra.mxu0 %v1456_v43  ;;  %1382 = vmax.xlane.f32.xlu0 %v1381_v1  ;;  %v1568_v1 = vsel %vm1115_vm3, %v1554_v9, 0 }
 0x56a   : > { %1385 = vmax.xlane.f32.xlu1 %v1384_v3  ;;  %v2716_v3 = vld [vmem:[#allocation2] sm:$0xff] }
 0x56b   : > { %2413 = vmatmul.mubr.msk.bf16.gmra.mrb[20].mxu0 %vm527_vm2, %v806_v5 }
 0x57a   : > { %v3145_v14 = vpop.f32.mrb[40].mxu1 }
 0x57b   : > { %v3147_v0 = vpop.f32.mrb[41].mxu1  ;;  %1457 = vrot.lane.b32.xlu1 %v2853_v42, %s2748_s14  ;;  %v1754_v5 = vsel %vm379_vm1, %v3145_v14, -inf }
 0x57c   : > { %v3151_v16 = vpop.f32.mrb[42].mxu1  ;;  %v1748_v27 = vsel %vm379_vm1, %v3147_v0, -inf }
 0x57d   : > { %v3153_v18 = vpop.f32.mrb[43].mxu1  ;;  %v1757_v42 = vsel %vm379_vm1, %v3151_v16, -inf }
 0x57e   : > { %1459 = vrot.lane.b32.xlu0 %v2848_v40, %s2748_s14  ;;  %v1751_v40 = vsel %vm379_vm1, %v3153_v18, -inf }
 0x582   : > { %v3157_v23 = vpop.f32.mrb[44].mxu1 }
 0x583   : > { %v3159_v26 = vpop.f32.mrb[45].mxu1  ;;  %v1766_v28 = vsel %vm379_vm1, %v3157_v23, -inf }
 0x584   : > { %v3161_v17 = vpop.f32.mrb[46].mxu1  ;;  %v1760_v39 = vsel %vm379_vm1, %v3159_v26, -inf }
 0x585   : > { %v3163_v21 = vpop.f32.mrb[47].mxu1  ;;  %v1769_v7 = vsel %vm379_vm1, %v3161_v17, -inf }
 0x586   : > { %v1763_v45 = vsel %vm379_vm1, %v3163_v21, -inf }
 0x59d   : > { %1755 = vmax.xlane.f32.xlu0 %v1754_v5  ;;  %v2717_v5 = vld [vmem:[#allocation2 + $0x18] sm:$0xff] }
 0x59f   : > { %1758 = vmax.xlane.f32.xlu1 %v1757_v42 }
 0x5a1   : > { %1749 = vmax.xlane.f32.xlu0 %v1748_v27 }
 0x5a3   : > { %1752 = vmax.xlane.f32.xlu1 %v1751_v40 }
 0x5a5   : > { %1767 = vmax.xlane.f32.xlu0 %v1766_v28 }
 0x5a7   : > { %1770 = vmax.xlane.f32.xlu1 %v1769_v7 }
 0x5a9   : > { %1761 = vmax.xlane.f32.xlu0 %v1760_v39 }
 0x5ab   : > { %1764 = vmax.xlane.f32.xlu1 %v1763_v45 }
 0x5e9   : > { %v1377_v4 = vpop.xlane.xlu0 %1376 }
 0x5ea   : > { %v1395_v29 = vsub.f32 %v2426_v61, %v1377_v4 }
 0x5eb   : > { %v1380_v47 = vpop.xlane.xlu1 %1379 }
 0x5ec   : > { %v1405_v31 = vmul.f32 1.442695, %v1395_v29  ;;  %v1396_v6 = vsub.f32 %v2427_v10, %v1380_v47 }
 0x5ed   : > { %v1371_v32 = vpop.xlane.xlu0 %1370 }
 0x5ee   : > { %2651 = vpow2.f32 %v1405_v31  ;;  %v1407_v36 = vmul.f32 1.442695, %v1396_v6  ;;  %v1393_v46 = vsub.f32 %v3106_v34, %v1371_v32 }
 0x5ef   : > { %v1374_v37 = vpop.xlane.xlu1 %1373 }
 0x5f0   : > { %2653 = vpow2.f32 %v1407_v36  ;;  %v1401_v30 = vmul.f32 1.442695, %v1393_v46  ;;  %v1394_v22 = vsub.f32 %v3113_v35, %v1374_v37 }
 0x5f1   : > { %v1389_v33 = vpop.xlane.xlu0 %1388 }
 0x5f2   : > { %2655 = vpow2.f32 %v1401_v30  ;;  %v1403_v20 = vmul.f32 1.442695, %v1394_v22  ;;  %v1399_v38 = vsub.f32 %v3120_v15, %v1389_v33 }
 0x5f3   : > { %v1392_v41 = vpop.xlane.xlu1 %1391 }
 0x5f4   : > { %2657 = vpow2.f32 %v1403_v20  ;;  %v1413_v25 = vmul.f32 1.442695, %v1399_v38  ;;  %v1400_v43 = vsub.f32 %v2431_v63, %v1392_v41 }
 0x5f5   : > { %v1383_v19 = vpop.xlane.xlu0 %1382 }
 0x5f6   : > { %2659 = vpow2.f32 %v1413_v25  ;;  %v1415_v44 = vmul.f32 1.442695, %v1400_v43  ;;  %v1397_v24 = vsub.f32 %v3126_v60, %v1383_v19 }
 0x5f7   : > { %v1386_v48 = vpop.xlane.xlu1 %1385 }
 0x5f8   : > { %v2652_v49 = vpop.eup %2651  ;;  %2661 = vpow2.f32 %v1415_v44  ;;  %v1409_v50 = vmul.f32 1.442695, %v1397_v24  ;;  %v1398_v51 = vsub.f32 %v3134_v2, %v1386_v48  ;;  %v2715_v2 = vld [vmem:[#allocation2 + $0x8] sm:$0xff] }
 0x5f9   : > { %v1423_v52 = vsel %vm379_vm1, %v2652_v49, 0.0  ;;  %v1460_v58 = vpop.permute.xlu0 %1459 }
 0x5fa   : > { %v2654_v53 = vpop.eup %2653  ;;  %2663 = vpow2.f32 %v1409_v50  ;;  %v1411_v54 = vmul.f32 1.442695, %v1398_v51  ;;  %1424 = vadd.xlane.f32.xlu0 %v1423_v52 }
 0x5fb   : > { %v1450_v55 = vpack.c.bf16 %v2654_v53, %v2652_v49  ;;  %v1458_v56 = vpop.permute.xlu1 %1457  ;;  %v1426_v35 = vsel %vm379_vm1, %v2654_v53, 0.0 }
 0x5fc   : > { %v2656_v57 = vpop.eup %2655  ;;  %2665 = vpow2.f32 %v1411_v54  ;;  %2436 = vmatprep.subr.bf16.mxu0 %v1458_v56  ;;  %v2718_v54 = vld [vmem:[#allocation2 + $0x10] sm:$0xff] }
 0x5fd   : > { %2437 = vmatpush3.bf16.msra.mxu0 %v1458_v56  ;;  %v1417_v59 = vsel %vm379_vm1, %v2656_v57, 0.0 }
 0x5fe   : > { %v2658_v61 = vpop.eup %2657  ;;  %1418 = vadd.xlane.f32.xlu1 %v1417_v59  ;;  %2438 = vmatprep.subr.bf16.mxu0 %v1460_v58 }
 0x5ff   : > { %v1420_v34 = vsel %vm379_vm1, %v2658_v61, 0.0  ;;  %v1449_v8 = vpack.c.bf16 %v2658_v61, %v2656_v57 }
 0x600   : > { %v2660_v10 = vpop.eup %2659  ;;  %1421 = vadd.xlane.f32.xlu0 %v1420_v34 }
 0x601   : > { %2439 = vmatpush3.bf16.msra.mxu0 %v1460_v58  ;;  %2440 = vmatprep.mubr.msk.bf16.mxu0 %vm379_vm1, %v1449_v8  ;;  %v1435_v12 = vsel %vm379_vm1, %v2660_v10, 0.0 }
 0x602   : > { %v2662_v11 = vpop.eup %2661  ;;  %1427 = vadd.xlane.f32.xlu1 %v1426_v35  ;;  %2538 = vmatprep.subr.msk.bf16.mxu0 %vm1115_vm3, %v1554_v9 }
 0x603   : > { %v1452_v13 = vpack.c.bf16 %v2662_v11, %v2660_v10  ;;  %v1438_v30 = vsel %vm379_vm1, %v2662_v11, 0.0 }
 0x604   : > { %v2664_v15 = vpop.eup %2663  ;;  %1436 = vadd.xlane.f32.xlu0 %v1435_v12  ;;  %2441 = vmatmul.mubr.msk.bf16.vlgmr.msra.gmra.mrb[24].mxu0 %vm379_vm1, %v1450_v55 }
 0x605   : > { %v1429_v62 = vsel %vm379_vm1, %v2664_v15, 0.0  ;;  %2449 = vmatpush3.bf16.msra.mxu0 %v1568_v1 }
 0x606   : > { %v2666_v60 = vpop.eup %2665 }
 0x607   : > { %v1451_v63 = vpack.c.bf16 %v2666_v60, %v2664_v15  ;;  %v1432_v38 = vsel %vm379_vm1, %v2666_v60, 0.0 }
 0x608   : > { %1430 = vadd.xlane.f32.xlu0 %v1429_v62 }
 0x609   : > { %2444 = vmatprep.mubr.msk.bf16.mxu0 %vm379_vm1, %v1451_v63 }
 0x60c   : > { %2445 = vmatmul.mubr.msk.bf16.gmra.mrb[28].mxu0 %vm379_vm1, %v1452_v13 }
 0x613   : > { %1834 = vrot.lane.b32.xlu1 %v2715_v2, %s2749_s23 }
 0x61e   : > { %1832 = vrot.lane.b32.xlu0 %v2716_v3, %s2749_s23 }
 0x622   : > { %1838 = vrot.lane.b32.xlu0 %v2717_v5, %s2749_s23 }
 0x62a   : > { %v1756_v42 = vpop.xlane.xlu0 %1755 }
 0x62b   : > { %v1774_v27 = vsub.f32 %v3145_v14, %v1756_v42 }
 0x62c   : > { %v1759_v40 = vpop.xlane.xlu1 %1758 }
 0x62d   : > { %v1784_v28 = vmul.f32 1.442695, %v1774_v27  ;;  %v1775_v7 = vsub.f32 %v3151_v16, %v1759_v40 }
 0x62e   : > { %v1750_v39 = vpop.xlane.xlu0 %1749 }
 0x62f   : > { %v1786_v45 = vmul.f32 1.442695, %v1775_v7  ;;  %v1772_v4 = vsub.f32 %v3147_v0, %v1750_v39  ;;  %2667 = vpow2.f32 %v1784_v28 }
 0x630   : > { %v1753_v29 = vpop.xlane.xlu1 %1752 }
 0x631   : > { %2669 = vpow2.f32 %v1786_v45  ;;  %v1780_v47 = vmul.f32 1.442695, %v1772_v4  ;;  %v1773_v31 = vsub.f32 %v3153_v18, %v1753_v29 }
 0x632   : > { %v1768_v6 = vpop.xlane.xlu0 %1767 }
 0x633   : > { %v1782_v32 = vmul.f32 1.442695, %v1773_v31  ;;  %v1778_v36 = vsub.f32 %v3157_v23, %v1768_v6  ;;  %2671 = vpow2.f32 %v1780_v47 }
 0x634   : > { %v1771_v14 = vpop.xlane.xlu1 %1770 }
 0x635   : > { %2673 = vpow2.f32 %v1782_v32  ;;  %v1792_v46 = vmul.f32 1.442695, %v1778_v36  ;;  %v1779_v16 = vsub.f32 %v3161_v17, %v1771_v14 }
 0x636   : > { %v1762_v37 = vpop.xlane.xlu0 %1761 }
 0x637   : > { %v1794_v0 = vmul.f32 1.442695, %v1779_v16  ;;  %v1776_v22 = vsub.f32 %v3159_v26, %v1762_v37  ;;  %1439 = vadd.xlane.f32.xlu1 %v1438_v30  ;;  %2675 = vpow2.f32 %v1792_v46 }
 0x638   : > { %v1765_v33 = vpop.xlane.xlu1 %1764 }
 0x639   : > { %2677 = vpow2.f32 %v1794_v0  ;;  %v1788_v18 = vmul.f32 1.442695, %v1776_v22  ;;  %v1777_v20 = vsub.f32 %v3163_v21, %v1765_v33  ;;  %v3213_v23 = vpop.eup %2667 }
 0x63a   : > { %v1802_v48 = vsel %vm379_vm1, %v3213_v23, 0.0 }
 0x63b   : > { %v3216_v41 = vpop.eup %2669  ;;  %2679 = vpow2.f32 %v1788_v18  ;;  %v1790_v17 = vmul.f32 1.442695, %v1777_v20  ;;  %1433 = vadd.xlane.f32.xlu1 %v1432_v38  ;;  %v1933_v20 = vld [vmem:[%s3311_s3 + $0xc] sm:$0xf] }
 0x63c   : > { %v1829_v25 = vpack.c.bf16 %v3216_v41, %v3213_v23  ;;  %v1805_v57 = vsel %vm379_vm1, %v3216_v41, 0.0  ;;  %v1947_v38 = vsel %vm1115_vm3, %v1933_v20, 0 }
 0x63d   : > { %2681 = vpow2.f32 %v1790_v17  ;;  %v3220_v26 = vpop.eup %2671 }
 0x63e   : > { %v1796_v56 = vsel %vm379_vm1, %v3220_v26, 0.0 }
 0x63f   : > { %v3222_v43 = vpop.eup %2673 }
 0x640   : > { %v1799_v21 = vsel %vm379_vm1, %v3222_v43, 0.0  ;;  %v1828_v19 = vpack.c.bf16 %v3222_v43, %v3220_v26 }
 0x641   : > { %1800 = vadd.xlane.f32.xlu0 %v1799_v21  ;;  %v3228_v44 = vpop.eup %2675 }
 0x642   : > { %v1814_v55 = vsel %vm379_vm1, %v3228_v44, 0.0 }
 0x643   : > { %v3230_v24 = vpop.eup %2677 }
 0x644   : > { %v1831_v49 = vpack.c.bf16 %v3230_v24, %v3228_v44  ;;  %v1817_v59 = vsel %vm379_vm1, %v3230_v24, 0.0 }
 0x645   : > { %v3236_v50 = vpop.eup %2679  ;;  %1803 = vadd.xlane.f32.xlu0 %v1802_v48 }
 0x646   : > { %v1808_v52 = vsel %vm379_vm1, %v3236_v50, 0.0 }
 0x647   : > { %v3238_v51 = vpop.eup %2681 }
 0x648   : > { %v1830_v53 = vpack.c.bf16 %v3238_v51, %v3236_v50  ;;  %v1811_v58 = vsel %vm379_vm1, %v3238_v51, 0.0 }
 0x649   : > { %1809 = vadd.xlane.f32.xlu0 %v1808_v52 }
 0x64c   : > { %1836 = vrot.lane.b32.xlu1 %v2718_v54, %s2749_s23 }
 0x64d   : > { %1815 = vadd.xlane.f32.xlu0 %v1814_v55 }
 0x670   : > { %1797 = vadd.xlane.f32.xlu1 %v1796_v56 }
 0x674   : > { %1806 = vadd.xlane.f32.xlu1 %v1805_v57 }
 0x678   : > { %1812 = vadd.xlane.f32.xlu1 %v1811_v58 }
 0x67c   : > { %1818 = vadd.xlane.f32.xlu1 %v1817_v59 }
 0x687   : > { %v1425_v61 = vpop.xlane.xlu0 %1424 }
 0x688   : > { %2683 = vrcp.f32 %v1425_v61 }
 0x68b   : > { %v1419_v11 = vpop.xlane.xlu1 %1418 }
 0x68c   : > { %2685 = vrcp.f32 %v1419_v11 }
 0x68d   : > { %v1422_v34 = vpop.xlane.xlu0 %1421 }
 0x68f   : > { %v1428_v12 = vpop.xlane.xlu1 %1427 }
 0x690   : > { %2687 = vrcp.f32 %v1428_v12 }
 0x691   : > { %v1437_v8 = vpop.xlane.xlu0 %1436  ;;  %2689 = vrcp.f32 %v1422_v34 }
 0x692   : > { %2691 = vrcp.f32 %v1437_v8  ;;  %v2684_v62 = vpop.eup %2683 }
 0x693   : > { %v1835_v13 = vpop.permute.xlu1 %1834 }
 0x695   : > { %v1431_v10 = vpop.xlane.xlu0 %1430 }
 0x696   : > { %2693 = vrcp.f32 %v1431_v10  ;;  %v2686_v2 = vpop.eup %2685 }
 0x699   : > { %v1833_v35 = vpop.permute.xlu0 %1832 }
 0x69a   : > { %2474 = vmatprep.subr.bf16.mxu0 %v1833_v35  ;;  %v2688_v3 = vpop.eup %2687 }
 0x69b   : > { %v2690_v42 = vpop.eup %2689 }
 0x69c   : > { %v2692_v4 = vpop.eup %2691 }
 0x69d   : > { %v1839_v18 = vpop.permute.xlu0 %1838 }
 0x6a0   : > { %v2694_v47 = vpop.eup %2693 }
 0x6c4   : > { %v1440_v15 = vpop.xlane.xlu1 %1439 }
 0x6c5   : > { %2695 = vrcp.f32 %v1440_v15 }
 0x6c8   : > { %v1434_v60 = vpop.xlane.xlu1 %1433 }
 0x6c9   : > { %2697 = vrcp.f32 %v1434_v60 }
 0x6cc   : > { %v1837_v22 = vpop.permute.xlu1 %1836 }
 0x6ce   : > { %v1801_v17 = vpop.xlane.xlu0 %1800 }
 0x6cf   : > { %v2696_v32 = vpop.eup %2695  ;;  %2699 = vrcp.f32 %v1801_v17 }
 0x6d2   : > { %v1804_v43 = vpop.xlane.xlu0 %1803 }
 0x6d3   : > { %v2698_v46 = vpop.eup %2697  ;;  %2701 = vrcp.f32 %v1804_v43 }
 0x6d7   : > { %v2442_v63 = vpop.f32.mrb[24].mxu0 }
 0x6d8   : > { %v1544_v9 = vmul.f32 %v2684_v62, %v2442_v63  ;;  %v1511_v1 = vpop.f32.mrb[25].mxu0 }
 0x6d9   : > { %v2443_v5 = vpop.f32.mrb[26].mxu0  ;;  %v1542_v28 = vmul.f32 %v2686_v2, %v1511_v1  ;;  %v2700_v48 = vpop.eup %2699  ;;  %v2207_v1 = vld [vmem:[%s3312_s4] ss:$0 sm:$0xff] }
 0x6da   : > { %v1545_v27 = vmul.f32 %v2688_v3, %v2443_v5  ;;  %v1514_v40 = vpop.f32.mrb[27].mxu0 }
 0x6db   : > { %v1543_v7 = vmul.f32 %v2690_v42, %v1514_v40 }
 0x6dc   : > { %v1551_v39 = vpack.c.bf16 %v1545_v27, %v1544_v9 }
 0x6dd   : > { %v1550_v45 = vpack.c.bf16 %v1543_v7, %v1542_v28  ;;  %v2702_v44 = vpop.eup %2701 }
 0x6df   : > { %v2446_v29 = vpop.f32.mrb[28].mxu0  ;;  %2450 = vmatprep.mubr.msk.bf16.mxu0 %vm527_vm2, %v1550_v45 }
 0x6e0   : > { %v1548_v31 = vmul.f32 %v2692_v4, %v2446_v29  ;;  %v1527_v6 = vpop.f32.mrb[29].mxu0  ;;  %2451 = vmatmul.mubr.msk.bf16.vlgmr.msra.gmra.mrb[16].mxu0 %vm527_vm2, %v1551_v39 }
 0x6e1   : > { %v1546_v36 = vmul.f32 %v2694_v47, %v1527_v6  ;;  %2475 = vmatpush3.bf16.msra.mxu0 %v1833_v35  ;;  %v2447_v14 = vpop.f32.mrb[30].mxu0 }
 0x6e2   : > { %v1549_v16 = vmul.f32 %v2696_v32, %v2447_v14  ;;  %2476 = vmatprep.subr.bf16.mxu0 %v1835_v13  ;;  %v1530_v37 = vpop.f32.mrb[31].mxu0 }
 0x6e3   : > { %v1547_v30 = vmul.f32 %v2698_v46, %v1530_v37 }
 0x6e4   : > { %v1553_v0 = vpack.c.bf16 %v1549_v16, %v1548_v31 }
 0x6e5   : > { %v1552_v33 = vpack.c.bf16 %v1547_v30, %v1546_v36  ;;  %2477 = vmatpush3.bf16.msra.mxu0 %v1835_v13 }
 0x6e6   : > { %2478 = vmatprep.subr.bf16.mxu0 %v1837_v22 }
 0x6e7   : > { %2454 = vmatprep.mubr.msk.bf16.mxu0 %vm527_vm2, %v1552_v33 }
 0x6e8   : > { %2455 = vmatmul.mubr.msk.bf16.gmra.mrb[20].mxu0 %vm527_vm2, %v1553_v0 }
 0x6e9   : > { %2479 = vmatpush3.bf16.msra.mxu0 %v1837_v22  ;;  %2482 = vmatprep.mubr.msk.bf16.mxu0 %vm379_vm1, %v1828_v19  ;;  %v1810_v19 = vpop.xlane.xlu0 %1809 }
 0x6ea   : > { %2480 = vmatprep.subr.bf16.mxu0 %v1839_v18 }
 0x6ed   : > { %2481 = vmatpush3.bf16.msra.mxu0 %v1839_v18  ;;  %v1816_v41 = vpop.xlane.xlu0 %1815 }
 0x6ee   : > { %2543 = vmatprep.subr.msk.bf16.mxu0 %vm1115_vm3, %v1933_v20 }
 0x6f0   : > { %2483 = vmatmul.mubr.msk.bf16.vlgmr.msra.gmra.mrb[32].mxu0 %vm379_vm1, %v1829_v25 }
 0x6f1   : > { %2486 = vmatprep.mubr.msk.bf16.mxu0 %vm379_vm1, %v1830_v53  ;;  %2491 = vmatpush3.bf16.msra.mxu0 %v1947_v38 }
 0x6f8   : > { %2487 = vmatmul.mubr.msk.bf16.gmra.mrb[36].mxu0 %vm379_vm1, %v1831_v49 }
 0x6fd   : > { %v1798_v26 = vpop.xlane.xlu1 %1797 }
 0x701   : > { %v1807_v21 = vpop.xlane.xlu1 %1806 }
 0x702   : > { %2703 = vrcp.f32 %v1807_v21 }
 0x703   : > { %2705 = vrcp.f32 %v1798_v26 }
 0x704   : > { %2707 = vrcp.f32 %v1810_v19 }
 0x705   : > { %v1813_v23 = vpop.xlane.xlu1 %1812  ;;  %2709 = vrcp.f32 %v1816_v41 }
 0x709   : > { %v1819_v25 = vpop.xlane.xlu1 %1818 }
 0x70a   : > { %2711 = vrcp.f32 %v1819_v25 }
 0x70b   : > { %2713 = vrcp.f32 %v1813_v23 }
 0x70c   : > { %v2704_v49 = vpop.eup %2703 }
 0x70d   : > { %v2706_v52 = vpop.eup %2705 }
 0x70e   : > { %v2708_v61 = vpop.eup %2707 }
 0x70f   : > { %v2710_v8 = vpop.eup %2709 }
 0x714   : > { %v2712_v35 = vpop.eup %2711 }
 0x715   : > { %v2714_v12 = vpop.eup %2713 }
 0x7c3   : > { %v2484_v50 = vpop.f32.mrb[32].mxu0 }
 0x7c4   : > { %v1890_v24 = vpop.f32.mrb[33].mxu0  ;;  %v1923_v53 = vmul.f32 %v2702_v44, %v2484_v50 }
 0x7c5   : > { %v2485_v51 = vpop.f32.mrb[34].mxu0  ;;  %v1921_v56 = vmul.f32 %v2706_v52, %v1890_v24 }
 0x7c6   : > { %v1924_v54 = vmul.f32 %v2704_v49, %v2485_v51  ;;  %v1893_v55 = vpop.f32.mrb[35].mxu0 }
 0x7c7   : > { %v1922_v57 = vmul.f32 %v2700_v48, %v1893_v55 }
 0x7c8   : > { %v1930_v58 = vpack.c.bf16 %v1924_v54, %v1923_v53 }
 0x7c9   : > { %v1929_v59 = vpack.c.bf16 %v1922_v57, %v1921_v56 }
 0x7cb   : > { %v2488_v34 = vpop.f32.mrb[36].mxu0  ;;  %2492 = vmatprep.mubr.msk.bf16.mxu0 %vm527_vm2, %v1929_v59 }
 0x7cc   : > { %v1906_v10 = vpop.f32.mrb[37].mxu0  ;;  %2493 = vmatmul.mubr.msk.bf16.vlgmr.msra.gmra.mrb[16].mxu0 %vm527_vm2, %v1930_v58  ;;  %v1927_v13 = vmul.f32 %v2710_v8, %v2488_v34 }
 0x7cd   : > { %v2489_v11 = vpop.f32.mrb[38].mxu0  ;;  %v1925_v62 = vmul.f32 %v2708_v61, %v1906_v10 }
 0x7ce   : > { %v1928_v15 = vmul.f32 %v2712_v35, %v2489_v11  ;;  %v1909_v60 = vpop.f32.mrb[39].mxu0 }
 0x7cf   : > { %v1926_v63 = vmul.f32 %v2714_v12, %v1909_v60 }
 0x7d0   : > { %v1932_v2 = vpack.c.bf16 %v1928_v15, %v1927_v13 }
 0x7d1   : > { %v1931_v9 = vpack.c.bf16 %v1926_v63, %v1925_v62 }
 0x7d3   : > { %2496 = vmatprep.mubr.msk.bf16.mxu0 %vm527_vm2, %v1931_v9 }
 0x7d4   : > { %2497 = vmatmul.mubr.msk.bf16.gmra.mrb[20].mxu0 %vm527_vm2, %v1932_v2 }
 0x89f   : > { %v2494_v3 = vpop.f32.mrb[16].mxu0 }
 0x8a0   : > { %v2031_v5 = vadd.f32 %v2494_v3, %v2207_v1  ;;  %v1983_v42 = vpop.f32.mrb[17].mxu0 }
 0x8a1   : > { %v2029_v27 = vadd.f32 %v2207_v1, %v1983_v42  ;;  %v2495_v40 = vpop.f32.mrb[18].mxu0 }
 0x8a2   : > { %2039 = vst.msk [vmem:[%s246_s8 + $0x10] sm:$0xff] %vm297_vm0, %v2031_v5  ;;  %v2032_v28 = vadd.f32 %v2495_v40, %v2207_v1  ;;  %v1986_v7 = vpop.f32.mrb[19].mxu0 }
 0x8a3   : > { %2037 = vst.msk [vmem:[%s246_s8] sm:$0xff] %vm297_vm0, %v2029_v27  ;;  %v2030_v39 = vadd.f32 %v2207_v1, %v1986_v7 }
 0x8a4   : > { %2040 = vst.msk [vmem:[%s246_s8 + $0x18] sm:$0xff] %vm297_vm0, %v2032_v28 }
 0x8a5   : > { %2038 = vst.msk [vmem:[%s246_s8 + $0x8] sm:$0xff] %vm297_vm0, %v2030_v39 }
 0x8a7   : > { %v2498_v45 = vpop.f32.mrb[20].mxu0 }
 0x8a8   : > { %v2035_v4 = vadd.f32 %v2498_v45, %v2207_v1  ;;  %v1999_v29 = vpop.f32.mrb[21].mxu0 }
 0x8a9   : > { %v2033_v47 = vadd.f32 %v2207_v1, %v1999_v29  ;;  %v2499_v31 = vpop.f32.mrb[22].mxu0 }
 0x8aa   : > { %2043 = vst.msk [vmem:[%s246_s8 + $0x30] sm:$0xff] %vm297_vm0, %v2035_v4  ;;  %v2036_v6 = vadd.f32 %v2499_v31, %v2207_v1  ;;  %v2002_v32 = vpop.f32.mrb[23].mxu0 }
 0x8ab   : > { %2041 = vst.msk [vmem:[%s246_s8 + $0x20] sm:$0xff] %vm297_vm0, %v2033_v47  ;;  %v2034_v36 = vadd.f32 %v2207_v1, %v2002_v32 }
 0x8ac   : > { %2044 = vst.msk [vmem:[%s246_s8 + $0x38] sm:$0xff] %vm297_vm0, %v2036_v6 }
 0x8ad   : > { %2042 = vst.msk [vmem:[%s246_s8 + $0x28] sm:$0xff] %vm297_vm0, %v2034_v36 }
 0x8ae PF: > { %s15_s20 = sadd.s32 1, %s2741_s20   ;;  %s3314_s18 = smov %s2737_s19 }
 0x8af   : > { %p12_p5 = scmp.ge.s32.totalorder %s15_s20, 4   ;;  %s3315_s19 = smov %s3317_s21 }
 0x8b1   :  { %14 = sbr.rel (!%p12_p5) target bundleno = 2 (0x2), region = 75 }

// kernel: tpu_custom_call.1
= control target key start
LH: loop header
LB: loop body
LE: loop exit
PB: predicated region body
PF: predicated region fallthrough
CT: control target
= control target key end

     0   :  { %s2778_s18 = smov 0   ;;  %s2780_s19 = smov 0   ;;  %s3306_s0 = inlined_call_operand.vmem [shape: bf16[2,64,32], index: 0, kind: input, shape index: {}]   ;;  %s3307_s1 = inlined_call_operand.vmem [shape: bf16[32,32], index: 1, kind: input, shape index: {}]   ;;  %s3308_s2 = inlined_call_operand.vmem [shape: bf16[32,64], index: 2, kind: input, shape index: {}]   ;;  %s3309_s3 = inlined_call_operand.vmem [shape: bf16[32,32], index: 3, kind: input, shape index: {}]   ;;  %s3310_s4 = inlined_call_operand.vmem [shape: f32[1,32], index: 4, kind: input, shape index: {}]   ;;  %s3311_s5 = inlined_call_operand.vmem [shape: f32[2,64,32], index: 5, kind: output, shape index: {}]  }
   0x1   :  { %s2782_s20 = smov 0  }
   0x2 LB: > { %s27_s21 = sadd.s32 1, %s2735_s19  ;;  %p2132_p0 = scmp.ge.s32.totalorder %s2739_s20, 1  ;;  %s2739_s20 = sphi %s2782_s20, %s15_s20   ;;  %s2735_s19 = sphi %s2780_s19, %s3313_s19   ;;  %s2731_s18 = sphi %s2778_s18, %s3312_s18  }
   0x3   : > { %p29_p1 = scmp.ge.s32.totalorder %s27_s21, 2  ;;  %p201_p2 = scmp.lt.s32.totalorder %s2739_s20, 3 }
   0x5   : > { %s3315_s21 = smov (%p29_p1, %s27_s21), 0  ;;  %p202_p3 = pnand %p2132_p0, %p201_p2 }
   0x6   : > { %v2573_v0 = vld [vmem:[%s3308_s2] sm:$0xff] (!%p202_p3)   ;;  %p233_p4 = scmp.lt.s32.totalorder (!%p202_p3), %s2731_s18, 1  ;;  %v2574_v1 = vld [vmem:[%s3308_s2 + $0x8] sm:$0xff] (!%p202_p3)   ;;  %vm297_vm0 = vcmask (!%p202_p3), 261120   ;;  %vm379_vm1 = vcmask (!%p202_p3), 523264   ;;  %vm527_vm2 = vcmask (!%p202_p3), 64512  }
   0x7   : > { %205 = sbr.rel (%p202_p3) target bundleno = 2222 (0x8ae), region = 40  ;;  %2306 = vmatprep.subr.bf16.mxu0 (!%p202_p3), %v2573_v0  ;;  %v2579_v2 = vld [vmem:[%s3307_s1] sm:$0xff] (!%p202_p3)   ;;  %v2580_v3 = vld [vmem:[%s3307_s1 + $0x8] sm:$0xff] (!%p202_p3)   ;;  %s2741_s9 = smov (!%p202_p3), 96   ;;  %vm1115_vm3 = vcmask (!%p202_p3), 1043456  }
   0x8   : > { %2307 = vmatpush3.bf16.msra.mxu0 (!%p202_p3), %v2573_v0  ;;  %2318 = vmatprep.subr.bf16.mxu1 (!%p202_p3), %v2579_v2  ;;  %s2742_s10 = smov (!%p202_p3), 120   ;;  %s2743_s11 = smov (!%p202_p3), 88  }
   0x9   : > { %2308 = vmatprep.subr.bf16.mxu0 (!%p202_p3), %v2574_v1  ;;  %2319 = vmatpush3.bf16.msra.mxu1 (!%p202_p3), %v2579_v2  ;;  %s2744_s12 = smov (!%p202_p3), 112   ;;  %s2745_s13 = smov (!%p202_p3), 104  }
   0xa   : > { %2320 = vmatprep.subr.bf16.mxu1 (!%p202_p3), %v2580_v3  ;;  %s2746_s14 = smov (!%p202_p3), 80   ;;  %s2747_s23 = smov (!%p202_p3), 72  }
   0xc   : > { %2309 = vmatpush3.bf16.msra.mxu0 (!%p202_p3), %v2574_v1 }
   0xd   : > { %2321 = vmatpush3.bf16.msra.mxu1 (!%p202_p3), %v2580_v3 }
   0xe   : > { %s3317_s18 = smov (!%p233_p4, %s2731_s18), 1 }
   0xf   : > { %s2208_s30 = sshll.u32 %s3317_s18, 5  ;;  %s2209_s28 = sshll.u32 %s3317_s18, 6 }
  0x10   : > { %s237_s8 = scalar_lea.vmem %s3306_s0, %s2208_s30 }
  0x11   : > { %v2575_v4 = vld [vmem:[%s237_s8] sm:$0xff]   ;;  %v2576_v5 = vld [vmem:[%s237_s8 + $0x8] sm:$0xff]   ;;  %v2577_v6 = vld [vmem:[%s237_s8 + $0x10] sm:$0xff]  }
  0x12   : > { %2310 = vmatprep.mubr.msk.bf16.mxu0 %vm297_vm0, %v2575_v4  ;;  %v2581_v7 = vld [vmem:[%s237_s8] sm:$0xff]   ;;  %v2582_v8 = vld [vmem:[%s237_s8 + $0x8] sm:$0xff]   ;;  %v2583_v9 = vld [vmem:[%s237_s8 + $0x10] sm:$0xff]  }
  0x13   : > { %2311 = vmatmul.mubr.msk.bf16.vlgmr.msra.gmra.mrb[0].mxu0 %vm297_vm0, %v2576_v5  ;;  %2322 = vmatprep.mubr.msk.bf16.mxu1 %vm297_vm0, %v2581_v7  ;;  %v2578_v10 = vld [vmem:[%s237_s8 + $0x18] sm:$0xff]  }
  0x14   : > { %2314 = vmatprep.mubr.msk.bf16.mxu0 %vm297_vm0, %v2577_v6  ;;  %2323 = vmatmul.mubr.msk.bf16.vlgmr.msra.gmra.mrb[0].mxu1 %vm297_vm0, %v2582_v8  ;;  %v2584_v11 = vld [vmem:[%s237_s8 + $0x18] sm:$0xff]   ;;  %s246_s8 = scalar_lea.vmem %s3311_s5, %s2209_s28 }
  0x15   : > { %2326 = vmatprep.mubr.msk.bf16.mxu1 %vm297_vm0, %v2583_v9 }
  0x1b   : > { %2315 = vmatmul.mubr.msk.bf16.gmra.mrb[4].mxu0 %vm297_vm0, %v2578_v10 }
  0x1c   : > { %2327 = vmatmul.mubr.msk.bf16.gmra.mrb[4].mxu1 %vm297_vm0, %v2584_v11 }
  0xe6   : > { %v2312_v12 = vpop.f32.mrb[0].mxu0 }
  0xe7   : > { %v344_v13 = vpop.f32.mrb[1].mxu0  ;;  %v2324_v17 = vpop.f32.mrb[0].mxu1 }
  0xe8   : > { %v2313_v14 = vpop.f32.mrb[2].mxu0  ;;  %v480_v19 = vpop.f32.mrb[1].mxu1 }
  0xe9   : > { %v376_v15 = vpack.c.bf16 %v2313_v14, %v2312_v12  ;;  %v347_v16 = vpop.f32.mrb[3].mxu0  ;;  %v2325_v20 = vpop.f32.mrb[2].mxu1 }
  0xea   : > { %v375_v18 = vpack.c.bf16 %v347_v16, %v344_v13  ;;  %v512_v21 = vpack.c.bf16 %v2325_v20, %v2324_v17  ;;  %v483_v22 = vpop.f32.mrb[3].mxu1 }
  0xeb   : > { %381 = vst.msk [vmem:[#allocation2 + $0x8] sm:$0xff] %vm379_vm1, %v376_v15  ;;  %v511_v23 = vpack.c.bf16 %v483_v22, %v480_v19 }
  0xec   : > { %380 = vst.msk [vmem:[#allocation2] sm:$0xff] %vm379_vm1, %v375_v18 }
  0xed   : > { %516 = vst.msk [vmem:[#allocation3 + $0x8] sm:$0xff] %vm297_vm0, %v512_v21  ;;  %515 = vst.msk [vmem:[#allocation3] sm:$0xff] %vm297_vm0, %v511_v23 }
  0xee   : > { %v2316_v24 = vpop.f32.mrb[4].mxu0 }
  0xef   : > { %v360_v25 = vpop.f32.mrb[5].mxu0  ;;  %v2328_v29 = vpop.f32.mrb[4].mxu1 }
  0xf0   : > { %v2317_v26 = vpop.f32.mrb[6].mxu0  ;;  %v496_v32 = vpop.f32.mrb[5].mxu1 }
  0xf1   : > { %v378_v27 = vpack.c.bf16 %v2317_v26, %v2316_v24  ;;  %v363_v28 = vpop.f32.mrb[7].mxu0  ;;  %v2329_v34 = vpop.f32.mrb[6].mxu1 }
  0xf2   : > { %v2826_v30 = vld [vmem:[#allocation2 + $0x8] sm:$0xff]  ;;  %v377_v31 = vpack.c.bf16 %v363_v28, %v360_v25  ;;  %v514_v36 = vpack.c.bf16 %v2329_v34, %v2328_v29  ;;  %v499_v37 = vpop.f32.mrb[7].mxu1 }
  0xf3   : > { %383 = vst.msk [vmem:[#allocation2 + $0x18] sm:$0xff] %vm379_vm1, %v378_v27  ;;  %708 = vrot.lane.b32.xlu1 %v2826_v30, %s2741_s9  ;;  %v2830_v33 = vld [vmem:[#allocation2] sm:$0xff]  ;;  %v513_v38 = vpack.c.bf16 %v499_v37, %v496_v32  ;;  %v544_v41 = vsel %vm527_vm2, %v2826_v30, 0 }
  0xf4   : > { %706 = vrot.lane.b32.xlu0 %v2830_v33, %s2741_s9  ;;  %382 = vst.msk [vmem:[#allocation2 + $0x10] sm:$0xff] %vm379_vm1, %v377_v31  ;;  %2522 = vmatprep.subr.msk.bf16.mxu0 %vm527_vm2, %v2830_v33  ;;  %v541_v35 = vsel %vm527_vm2, %v2830_v33, 0  ;;  %v2841_v39 = vld [vmem:[#allocation3] sm:$0xff]  ;;  %v2864_v46 = vld [vmem:[#allocation3 + $0x8] sm:$0xff] }
  0xf5   : > { %2331 = vmatpush3.bf16.xpose.msra.mxu0 %v541_v35  ;;  %518 = vst.msk [vmem:[#allocation3 + $0x18] sm:$0xff] %vm297_vm0, %v514_v36  ;;  %2338 = vmatprep.mubr.msk.bf16.mxu0 %vm527_vm2, %v2841_v39  ;;  %517 = vst.msk [vmem:[#allocation3 + $0x10] sm:$0xff] %vm297_vm0, %v513_v38 }
  0xf6   : > { %2523 = vmatprep.subr.msk.bf16.mxu0 %vm527_vm2, %v2826_v30 }
  0xfa   : > { %v2846_v40 = vld [vmem:[#allocation2 + $0x18] sm:$0xff] }
  0xfb   : > { %712 = vrot.lane.b32.xlu1 %v2846_v40, %s2741_s9  ;;  %v2851_v42 = vld [vmem:[#allocation2 + $0x10] sm:$0xff]  ;;  %v550_v44 = vsel %vm527_vm2, %v2846_v40, 0 }
  0xfc   : > { %v547_v43 = vsel %vm527_vm2, %v2851_v42, 0  ;;  %v2862_v45 = vld [vmem:[#allocation3 + $0x10] sm:$0xff]  ;;  %v2870_v47 = vld [vmem:[#allocation3 + $0x18] sm:$0xff] }
  0xfd   : > { %2333 = vmatpush3.bf16.xpose.msra.mxu0 %v544_v41 }
  0xfe   : > { %2524 = vmatprep.subr.msk.bf16.mxu0 %vm527_vm2, %v2851_v42 }
  0xff   : > { %710 = vrot.lane.b32.xlu1 %v2851_v42, %s2741_s9 }
 0x105   : > { %2335 = vmatpush3.bf16.xpose.msra.mxu0 %v547_v43 }
 0x106   : > { %2525 = vmatprep.subr.msk.bf16.mxu0 %vm527_vm2, %v2846_v40 }
 0x10d   : > { %2337 = vmatpush3.bf16.xpose.msra.mxu0 %v550_v44 }
 0x114   : > { %2339 = vmatmul.mubr.msk.bf16.vlgmr.msra.gmra.mrb[8].mxu0 %vm527_vm2, %v2864_v46 }
 0x115   : > { %2342 = vmatprep.mubr.msk.bf16.mxu0 %vm527_vm2, %v2862_v45 }
 0x11c   : > { %2343 = vmatmul.mubr.msk.bf16.gmra.mrb[12].mxu0 %vm527_vm2, %v2870_v47 }
 0x165   : > { %v709_v49 = vpop.permute.xlu1 %708 }
 0x166   : > { %v707_v48 = vpop.permute.xlu0 %706 }
 0x167   : > { %2346 = vmatprep.subr.bf16.mxu1 %v707_v48 }
 0x168   : > { %2347 = vmatpush3.bf16.msra.mxu1 %v707_v48 }
 0x169   : > { %2348 = vmatprep.subr.bf16.mxu1 %v709_v49 }
 0x16c   : > { %2349 = vmatpush3.bf16.msra.mxu1 %v709_v49 }
 0x16d   : > { %v713_v50 = vpop.permute.xlu1 %712 }
 0x171   : > { %v711_v51 = vpop.permute.xlu1 %710 }
 0x172   : > { %2350 = vmatprep.subr.bf16.mxu1 %v711_v51 }
 0x173   : > { %2351 = vmatpush3.bf16.msra.mxu1 %v711_v51 }
 0x174   : > { %2352 = vmatprep.subr.bf16.mxu1 %v713_v50 }
 0x177   : > { %2353 = vmatpush3.bf16.msra.mxu1 %v713_v50 }
 0x1e7   : > { %v2340_v52 = vpop.f32.mrb[8].mxu0 }
 0x1e8   : > { %v586_v53 = vpop.f32.mrb[9].mxu0  ;;  %v624_v54 = vsel %vm379_vm1, %v2340_v52, -inf }
 0x1e9   : > { %625 = vmax.xlane.f32.xlu1 %v624_v54  ;;  %v2341_v55 = vpop.f32.mrb[10].mxu0  ;;  %v618_v56 = vsel %vm379_vm1, %v586_v53, -inf }
 0x1ea   : > { %619 = vmax.xlane.f32.xlu0 %v618_v56  ;;  %v589_v57 = vpop.f32.mrb[11].mxu0  ;;  %v627_v58 = vsel %vm379_vm1, %v2341_v55, -inf }
 0x1eb   : > { %v621_v59 = vsel %vm379_vm1, %v589_v57, -inf }
 0x1ed   : > { %628 = vmax.xlane.f32.xlu1 %v627_v58 }
 0x1ee   : > { %622 = vmax.xlane.f32.xlu0 %v621_v59 }
 0x1ef   : > { %v2344_v60 = vpop.f32.mrb[12].mxu0 }
 0x1f0   : > { %v636_v61 = vsel %vm379_vm1, %v2344_v60, -inf  ;;  %v2879_v62 = vpop.f32.mrb[13].mxu0 }
 0x1f1   : > { %v2345_v63 = vpop.f32.mrb[14].mxu0  ;;  %v630_v1 = vsel %vm379_vm1, %v2879_v62, -inf }
 0x1f2   : > { %637 = vmax.xlane.f32.xlu0 %v636_v61  ;;  %v2881_v0 = vpop.f32.mrb[15].mxu0  ;;  %v639_v2 = vsel %vm379_vm1, %v2345_v63, -inf }
 0x1f3   : > { %v633_v3 = vsel %vm379_vm1, %v2881_v0, -inf }
 0x1f6   : > { %631 = vmax.xlane.f32.xlu0 %v630_v1 }
 0x1fa   : > { %640 = vmax.xlane.f32.xlu0 %v639_v2 }
 0x1fe   : > { %822 = vrot.lane.b32.xlu1 %v2826_v30, %s2742_s10 }
 0x202   : > { %824 = vrot.lane.b32.xlu1 %v2851_v42, %s2742_s10 }
 0x210   : > { %820 = vrot.lane.b32.xlu0 %v2830_v33, %s2742_s10 }
 0x214   : > { %812 = vrot.lane.b32.xlu0 %v2841_v39, %s2742_s10 }
 0x218   : > { %816 = vrot.lane.b32.xlu0 %v2862_v45, %s2742_s10 }
 0x21c   : > { %1001 = vrot.lane.b32.xlu0 %v2830_v33, %s2743_s11 }
 0x226   : > { %634 = vmax.xlane.f32.xlu1 %v633_v3 }
 0x237   : > { %826 = vrot.lane.b32.xlu1 %v2846_v40, %s2742_s10 }
 0x23b   : > { %814 = vrot.lane.b32.xlu1 %v2864_v46, %s2742_s10 }
 0x23f   : > { %818 = vrot.lane.b32.xlu1 %v2870_v47, %s2742_s10 }
 0x243   : > { %1003 = vrot.lane.b32.xlu1 %v2826_v30, %s2743_s11 }
 0x247   : > { %1005 = vrot.lane.b32.xlu1 %v2851_v42, %s2743_s11 }
 0x24b   : > { %1007 = vrot.lane.b32.xlu1 %v2846_v40, %s2743_s11 }
 0x276   : > { %v626_v4 = vpop.xlane.xlu1 %625 }
 0x277   : > { %v644_v5 = vsub.f32 %v2340_v52, %v626_v4  ;;  %v620_v6 = vpop.xlane.xlu0 %619 }
 0x278   : > { %v642_v7 = vsub.f32 %v586_v53, %v620_v6 }
 0x279   : > { %v654_v8 = vmul.f32 1.442695, %v644_v5 }
 0x27a   : > { %v650_v9 = vmul.f32 1.442695, %v642_v7  ;;  %v629_v10 = vpop.xlane.xlu1 %628 }
 0x27b   : > { %v645_v11 = vsub.f32 %v2341_v55, %v629_v10  ;;  %v623_v12 = vpop.xlane.xlu0 %622  ;;  %2585 = vpow2.f32 %v654_v8 }
 0x27c   : > { %v643_v13 = vsub.f32 %v589_v57, %v623_v12  ;;  %2587 = vpow2.f32 %v650_v9 }
 0x27d   : > { %v656_v14 = vmul.f32 1.442695, %v645_v11 }
 0x27e   : > { %v652_v15 = vmul.f32 1.442695, %v643_v13  ;;  %v823_v32 = vpop.permute.xlu1 %822 }
 0x27f   : > { %2589 = vpow2.f32 %v656_v14  ;;  %v638_v16 = vpop.xlane.xlu0 %637  ;;  %v844_v36 = vsel %vm527_vm2, %v823_v32, 0 }
 0x280   : > { %2591 = vpow2.f32 %v652_v15  ;;  %v648_v17 = vsub.f32 %v2344_v60, %v638_v16 }
 0x282   : > { %v662_v20 = vmul.f32 1.442695, %v648_v17  ;;  %v825_v37 = vpop.permute.xlu1 %824 }
 0x283   : > { %v632_v18 = vpop.xlane.xlu0 %631  ;;  %v847_v41 = vsel %vm527_vm2, %v825_v37, 0 }
 0x284   : > { %2593 = vpow2.f32 %v662_v20  ;;  %v646_v44 = vsub.f32 %v2879_v62, %v632_v18 }
 0x285   : > { %v2900_v19 = vpop.eup %2585 }
 0x286   : > { %v2902_v22 = vpop.eup %2587  ;;  %v658_v48 = vmul.f32 1.442695, %v646_v44 }
 0x287   : > { %v641_v21 = vpop.xlane.xlu0 %640 }
 0x288   : > { %v649_v23 = vsub.f32 %v2345_v63, %v641_v21 }
 0x289   : > { %v2904_v24 = vpop.eup %2589 }
 0x28a   : > { %v2906_v25 = vpop.eup %2591  ;;  %v699_v26 = vpack.c.bf16 %v2904_v24, %v2900_v19  ;;  %v664_v27 = vmul.f32 1.442695, %v649_v23 }
 0x28b   : > { %v821_v28 = vpop.permute.xlu0 %820  ;;  %v698_v29 = vpack.c.bf16 %v2906_v25, %v2902_v22 }
 0x28c   : > { %2595 = vpow2.f32 %v664_v27  ;;  %v841_v31 = vsel %vm527_vm2, %v821_v28, 0  ;;  %2526 = vmatprep.subr.msk.bf16.mxu1 %vm527_vm2, %v821_v28  ;;  %v666_v28 = vsel %vm379_vm1, %v2902_v22, 0.0 }
 0x28d   : > { %2354 = vmatprep.mubr.msk.bf16.mxu1 %vm379_vm1, %v698_v29  ;;  %2597 = vpow2.f32 %v658_v48 }
 0x28e   : > { %2355 = vmatmul.mubr.msk.bf16.vlgmr.msra.gmra.mrb[8].mxu1 %vm379_vm1, %v699_v26  ;;  %v2917_v34 = vpop.eup %2593 }
 0x28f   : > { %2363 = vmatpush3.bf16.xpose.msra.mxu1 %v841_v31  ;;  %v813_v43 = vpop.permute.xlu0 %812 }
 0x290   : > { %2527 = vmatprep.subr.msk.bf16.mxu1 %vm527_vm2, %v823_v32  ;;  %v675_v32 = vsel %vm379_vm1, %v2904_v24, 0.0 }
 0x293   : > { %v817_v49 = vpop.permute.xlu0 %816 }
 0x296   : > { %v2919_v35 = vpop.eup %2595 }
 0x297   : > { %2365 = vmatpush3.bf16.xpose.msra.mxu1 %v844_v36  ;;  %v701_v38 = vpack.c.bf16 %v2919_v35, %v2917_v34  ;;  %v1002_v55 = vpop.permute.xlu0 %1001  ;;  %v2930_v57 = vpop.eup %2597 }
 0x298   : > { %2528 = vmatprep.subr.msk.bf16.mxu1 %vm527_vm2, %v825_v37 }
 0x29f   : > { %2367 = vmatpush3.bf16.xpose.msra.mxu1 %v847_v41 }
 0x2b3   : > { %v635_v50 = vpop.xlane.xlu1 %634 }
 0x2b4   : > { %v647_v51 = vsub.f32 %v2881_v0, %v635_v50  ;;  %v684_v50 = vsel %vm379_vm1, %v2917_v34, 0.0 }
 0x2b6   : > { %v660_v52 = vmul.f32 1.442695, %v647_v51 }
 0x2b7   : > { %v827_v53 = vpop.permute.xlu1 %826 }
 0x2b8   : > { %2599 = vpow2.f32 %v660_v52  ;;  %2529 = vmatprep.subr.msk.bf16.mxu1 %vm527_vm2, %v827_v53  ;;  %v850_v54 = vsel %vm527_vm2, %v827_v53, 0 }
 0x2b9   : > { %2369 = vmatpush3.bf16.xpose.msra.mxu1 %v850_v54 }
 0x2ba   : > { %2378 = vmatprep.subr.bf16.mxu1 %v1002_v55 }
 0x2bb   : > { %v815_v56 = vpop.permute.xlu1 %814 }
 0x2bf   : > { %v819_v60 = vpop.permute.xlu1 %818 }
 0x2c2   : > { %v2932_v58 = vpop.eup %2599 }
 0x2c3   : > { %v700_v59 = vpack.c.bf16 %v2932_v58, %v2930_v57  ;;  %v1004_v61 = vpop.permute.xlu1 %1003  ;;  %v681_v24 = vsel %vm379_vm1, %v2932_v58, 0.0 }
 0x2c5   : > { %2358 = vmatprep.mubr.msk.bf16.mxu1 %vm379_vm1, %v700_v59 }
 0x2c6   : > { %2359 = vmatmul.mubr.msk.bf16.gmra.mrb[12].mxu1 %vm379_vm1, %v701_v38 }
 0x2c7   : > { %2370 = vmatprep.mubr.msk.bf16.mxu1 %vm527_vm2, %v813_v43  ;;  %v1006_v62 = vpop.permute.xlu1 %1005 }
 0x2cb   : > { %v1008_v63 = vpop.permute.xlu1 %1007 }
 0x2ce   : > { %2371 = vmatmul.mubr.msk.bf16.vlgmr.msra.gmra.mrb[16].mxu1 %vm527_vm2, %v815_v56  ;;  %v687_v56 = vsel %vm379_vm1, %v2919_v35, 0.0 }
 0x2cf   : > { %2379 = vmatpush3.bf16.msra.mxu1 %v1002_v55  ;;  %2374 = vmatprep.mubr.msk.bf16.mxu1 %vm527_vm2, %v817_v49 }
 0x2d0   : > { %2380 = vmatprep.subr.bf16.mxu1 %v1004_v61 }
 0x2d3   : > { %2381 = vmatpush3.bf16.msra.mxu1 %v1004_v61 }
 0x2d4   : > { %2382 = vmatprep.subr.bf16.mxu1 %v1006_v62 }
 0x2d6   : > { %2375 = vmatmul.mubr.msk.bf16.gmra.mrb[20].mxu1 %vm527_vm2, %v819_v60 }
 0x2d7   : > { %2383 = vmatpush3.bf16.msra.mxu1 %v1006_v62 }
 0x2d8   : > { %2384 = vmatprep.subr.bf16.mxu1 %v1008_v63 }
 0x2db   : > { %2385 = vmatpush3.bf16.msra.mxu1 %v1008_v63 }
 0x361   : > { %v2942_v0 = vpop.f32.mrb[8].mxu1 }
 0x362   : > { %v2944_v1 = vpop.f32.mrb[9].mxu1 }
 0x363   : > { %v2946_v2 = vpop.f32.mrb[10].mxu1 }
 0x364   : > { %v2948_v3 = vpop.f32.mrb[11].mxu1 }
 0x399   : > { %v2950_v4 = vpop.f32.mrb[12].mxu1 }
 0x39a   : > { %v2952_v5 = vpop.f32.mrb[13].mxu1 }
 0x39b   : > { %v2954_v6 = vpop.f32.mrb[14].mxu1 }
 0x39c   : > { %v2956_v7 = vpop.f32.mrb[15].mxu1 }
 0x3a1   : > { %v2372_v8 = vpop.f32.mrb[16].mxu1 }
 0x3a2   : > { %v886_v9 = vpop.f32.mrb[17].mxu1  ;;  %v923_v10 = vsel %vm379_vm1, %v2372_v8, -inf }
 0x3a3   : > { %924 = vmax.xlane.f32.xlu0 %v923_v10  ;;  %v2373_v11 = vpop.f32.mrb[18].mxu1  ;;  %v917_v14 = vsel %vm379_vm1, %v886_v9, -inf }
 0x3a4   : > { %v889_v12 = vpop.f32.mrb[19].mxu1  ;;  %v926_v17 = vsel %vm379_vm1, %v2373_v11, -inf }
 0x3a5   : > { %v920_v13 = vsel %vm379_vm1, %v889_v12, -inf }
 0x3a6   : > { %921 = vmax.xlane.f32.xlu1 %v920_v13 }
 0x3a7   : > { %918 = vmax.xlane.f32.xlu0 %v917_v14 }
 0x3a9   : > { %v2961_v15 = vpop.f32.mrb[20].mxu1 }
 0x3aa   : > { %v2963_v16 = vpop.f32.mrb[21].mxu1  ;;  %v935_v21 = vsel %vm379_vm1, %v2961_v15, -inf }
 0x3ab   : > { %927 = vmax.xlane.f32.xlu0 %v926_v17  ;;  %v2966_v18 = vpop.f32.mrb[22].mxu1  ;;  %v929_v23 = vsel %vm379_vm1, %v2963_v16, -inf }
 0x3ac   : > { %v2968_v20 = vpop.f32.mrb[23].mxu1  ;;  %v938_v26 = vsel %vm379_vm1, %v2966_v18, -inf }
 0x3ad   : > { %v932_v27 = vsel %vm379_vm1, %v2968_v20, -inf }
 0x3af   : > { %936 = vmax.xlane.f32.xlu0 %v935_v21 }
 0x3b3   : > { %930 = vmax.xlane.f32.xlu0 %v929_v23 }
 0x3b7   : > { %1274 = vrot.lane.b32.xlu1 %v2826_v30, %s2744_s12  ;;  %939 = vmax.xlane.f32.xlu0 %v938_v26 }
 0x3bb   : > { %1276 = vrot.lane.b32.xlu1 %v2851_v42, %s2744_s12 }
 0x3cd   : > { %1272 = vrot.lane.b32.xlu0 %v2830_v33, %s2744_s12 }
 0x3d1   : > { %1264 = vrot.lane.b32.xlu0 %v2841_v39, %s2744_s12 }
 0x3d5   : > { %1268 = vrot.lane.b32.xlu0 %v2862_v45, %s2744_s12 }
 0x3d9   : > { %1651 = vrot.lane.b32.xlu0 %v2830_v33, %s2745_s13 }
 0x3dd   : > { %1655 = vrot.lane.b32.xlu0 %v2851_v42, %s2745_s13 }
 0x3df   : > { %933 = vmax.xlane.f32.xlu1 %v932_v27 }
 0x3e1   : > { %1643 = vrot.lane.b32.xlu0 %v2841_v39, %s2745_s13  ;;  %v669_v39 = vsel %vm379_vm1, %v2906_v25, 0.0  ;;  %v678_v25 = vsel %vm379_vm1, %v2930_v57, 0.0 }
 0x3e5   : > { %1647 = vrot.lane.b32.xlu0 %v2862_v45, %s2745_s13  ;;  %v672_v45 = vsel %vm379_vm1, %v2900_v19, 0.0 }
 0x3e9   : > { %1649 = vrot.lane.b32.xlu0 %v2870_v47, %s2745_s13 }
 0x3f0   : > { %1278 = vrot.lane.b32.xlu1 %v2846_v40, %s2744_s12 }
 0x3f4   : > { %1266 = vrot.lane.b32.xlu1 %v2864_v46, %s2744_s12 }
 0x3f8   : > { %1270 = vrot.lane.b32.xlu1 %v2870_v47, %s2744_s12 }
 0x3fc   : > { %1653 = vrot.lane.b32.xlu1 %v2826_v30, %s2745_s13 }
 0x400   : > { %1657 = vrot.lane.b32.xlu1 %v2846_v40, %s2745_s13 }
 0x404   : > { %1645 = vrot.lane.b32.xlu1 %v2864_v46, %s2745_s13 }
 0x428   : > { %667 = vadd.xlane.f32.xlu1 %v666_v28 }
 0x42c   : > { %670 = vadd.xlane.f32.xlu1 %v669_v39 }
 0x430   : > { %v925_v29 = vpop.xlane.xlu0 %924  ;;  %673 = vadd.xlane.f32.xlu1 %v672_v45 }
 0x431   : > { %v943_v47 = vsub.f32 %v2372_v8, %v925_v29 }
 0x433   : > { %v922_v31 = vpop.xlane.xlu1 %921  ;;  %v953_v22 = vmul.f32 1.442695, %v943_v47 }
 0x434   : > { %v942_v36 = vsub.f32 %v889_v12, %v922_v31  ;;  %v919_v46 = vpop.xlane.xlu0 %918  ;;  %676 = vadd.xlane.f32.xlu1 %v675_v32 }
 0x435   : > { %v941_v37 = vsub.f32 %v886_v9, %v919_v46 }
 0x436   : > { %v951_v38 = vmul.f32 1.442695, %v942_v36 }
 0x437   : > { %v949_v41 = vmul.f32 1.442695, %v941_v37 }
 0x438   : > { %2601 = vpow2.f32 %v951_v38  ;;  %v928_v43 = vpop.xlane.xlu0 %927  ;;  %679 = vadd.xlane.f32.xlu1 %v678_v25 }
 0x439   : > { %2603 = vpow2.f32 %v949_v41  ;;  %v944_v19 = vsub.f32 %v2373_v11, %v928_v43  ;;  %v1275_v11 = vpop.permute.xlu1 %1274 }
 0x43a   : > { %2605 = vpow2.f32 %v953_v22 }
 0x43b   : > { %v955_v44 = vmul.f32 1.442695, %v944_v19 }
 0x43c   : > { %v937_v48 = vpop.xlane.xlu0 %936  ;;  %682 = vadd.xlane.f32.xlu1 %v681_v24 }
 0x43d   : > { %2607 = vpow2.f32 %v955_v44  ;;  %v947_v49 = vsub.f32 %v2961_v15, %v937_v48  ;;  %v1296_v15 = vsel %vm527_vm2, %v1275_v11, 0  ;;  %v1277_v17 = vpop.permute.xlu1 %1276 }
 0x43e   : > { %v1299_v28 = vsel %vm527_vm2, %v1277_v17, 0 }
 0x43f   : > { %v961_v53 = vmul.f32 1.442695, %v947_v49  ;;  %v1102_v49 = vld [vmem:[%s3309_s3 + $0x4] sm:$0xf] }
 0x440   : > { %v931_v51 = vpop.xlane.xlu0 %930  ;;  %685 = vadd.xlane.f32.xlu1 %v684_v50  ;;  %2530 = vmatprep.subr.msk.bf16.mxu0 %vm1115_vm3, %v1102_v49  ;;  %v1117_v50 = vsel %vm1115_vm3, %v1102_v49, 0 }
 0x441   : > { %v945_v54 = vsub.f32 %v2963_v16, %v931_v51  ;;  %2609 = vpow2.f32 %v961_v53  ;;  %2395 = vmatpush3.bf16.msra.mxu0 %v1117_v50  ;;  %v3059_v51 = vld [vmem:[%s3309_s3] sm:$0xf] }
 0x442   : > { %v2602_v52 = vpop.eup %2601  ;;  %2531 = vmatprep.subr.msk.bf16.mxu0 %vm1115_vm3, %v3059_v51 }
 0x443   : > { %v2604_v55 = vpop.eup %2603  ;;  %v968_v57 = vsel %vm379_vm1, %v2602_v52, 0.0  ;;  %v957_v34 = vmul.f32 1.442695, %v945_v54 }
 0x444   : > { %v2606_v58 = vpop.eup %2605  ;;  %v940_v59 = vpop.xlane.xlu0 %939  ;;  %688 = vadd.xlane.f32.xlu1 %v687_v56  ;;  %969 = vadd.xlane.f32.xlu0 %v968_v57  ;;  %v997_v60 = vpack.c.bf16 %v2602_v52, %v2604_v55  ;;  %v965_v12 = vsel %vm379_vm1, %v2604_v55, 0.0 }
 0x445   : > { %v948_v61 = vsub.f32 %v2966_v18, %v940_v59  ;;  %v971_v8 = vsel %vm379_vm1, %v2606_v58, 0.0 }
 0x446   : > { %2386 = vmatprep.mubr.msk.bf16.mxu1 %vm379_vm1, %v997_v60 }
 0x447   : > { %v2608_v62 = vpop.eup %2607  ;;  %v963_v63 = vmul.f32 1.442695, %v948_v61 }
 0x448   : > { %v998_v9 = vpack.c.bf16 %v2608_v62, %v2606_v58  ;;  %v1273_v10 = vpop.permute.xlu0 %1272  ;;  %972 = vadd.xlane.f32.xlu1 %v971_v8  ;;  %v974_v13 = vsel %vm379_vm1, %v2608_v62, 0.0 }
 0x449   : > { %2611 = vpow2.f32 %v963_v63  ;;  %v1293_v35 = vsel %vm527_vm2, %v1273_v10, 0  ;;  %2532 = vmatprep.subr.msk.bf16.mxu1 %vm527_vm2, %v1273_v10 }
 0x44a   : > { %2613 = vpow2.f32 %v957_v34  ;;  %2387 = vmatmul.mubr.msk.bf16.vlgmr.msra.gmra.mrb[24].mxu1 %vm379_vm1, %v998_v9 }
 0x44b   : > { %2415 = vmatpush3.bf16.xpose.msra.mxu1 %v1293_v35  ;;  %v2610_v14 = vpop.eup %2609 }
 0x44c   : > { %2533 = vmatprep.subr.msk.bf16.mxu1 %vm527_vm2, %v1275_v11  ;;  %966 = vadd.xlane.f32.xlu1 %v965_v12  ;;  %v983_v18 = vsel %vm379_vm1, %v2610_v14, 0.0  ;;  %v1265_v39 = vpop.permute.xlu0 %1264 }
 0x450   : > { %975 = vadd.xlane.f32.xlu1 %v974_v13  ;;  %v1269_v45 = vpop.permute.xlu0 %1268 }
 0x453   : > { %v2612_v16 = vpop.eup %2611  ;;  %2417 = vmatpush3.bf16.xpose.msra.mxu1 %v1296_v15 }
 0x454   : > { %v2614_v21 = vpop.eup %2613  ;;  %2534 = vmatprep.subr.msk.bf16.mxu1 %vm527_vm2, %v1277_v17  ;;  %984 = vadd.xlane.f32.xlu1 %v983_v18  ;;  %v986_v23 = vsel %vm379_vm1, %v2612_v16, 0.0  ;;  %v1000_v26 = vpack.c.bf16 %v2612_v16, %v2610_v14  ;;  %v1652_v46 = vpop.permute.xlu0 %1651 }
 0x455   : > { %987 = vadd.xlane.f32.xlu0 %v986_v23  ;;  %v977_v27 = vsel %vm379_vm1, %v2614_v21, 0.0 }
 0x458   : > { %978 = vadd.xlane.f32.xlu1 %v977_v27  ;;  %v1656_v41 = vpop.permute.xlu0 %1655 }
 0x459   : > { %v1678_v44 = vsel %vm527_vm2, %v1656_v41, 0 }
 0x45b   : > { %2419 = vmatpush3.bf16.xpose.msra.mxu1 %v1299_v28 }
 0x45c   : > { %v1644_v43 = vpop.permute.xlu0 %1643 }
 0x460   : > { %v1648_v53 = vpop.permute.xlu0 %1647 }
 0x464   : > { %v1650_v54 = vpop.permute.xlu0 %1649 }
 0x469   : > { %1455 = vrot.lane.b32.xlu1 %v2826_v30, %s2746_s14 }
 0x46b   : > { %1453 = vrot.lane.b32.xlu0 %v2830_v33, %s2746_s14 }
 0x46c   : > { %v934_v29 = vpop.xlane.xlu1 %933 }
 0x46d   : > { %v946_v47 = vsub.f32 %v2968_v20, %v934_v29  ;;  %v1672_v20 = vsel %vm527_vm2, %v1652_v46, 0 }
 0x46f   : > { %v959_v31 = vmul.f32 1.442695, %v946_v47 }
 0x470   : > { %v1279_v32 = vpop.permute.xlu1 %1278 }
 0x471   : > { %2615 = vpow2.f32 %v959_v31  ;;  %v1302_v36 = vsel %vm527_vm2, %v1279_v32, 0  ;;  %2535 = vmatprep.subr.msk.bf16.mxu1 %vm527_vm2, %v1279_v32 }
 0x472   : > { %2421 = vmatpush3.bf16.xpose.msra.mxu1 %v1302_v36 }
 0x473   : > { %2537 = vmatprep.subr.msk.bf16.mxu1 %vm527_vm2, %v1652_v46 }
 0x474   : > { %v1267_v30 = vpop.permute.xlu1 %1266 }
 0x478   : > { %v1271_v33 = vpop.permute.xlu1 %1270 }
 0x47b   : > { %v2616_v37 = vpop.eup %2615 }
 0x47c   : > { %v999_v22 = vpack.c.bf16 %v2616_v37, %v2614_v21  ;;  %v1654_v38 = vpop.permute.xlu1 %1653  ;;  %v980_v25 = vsel %vm379_vm1, %v2616_v37, 0.0 }
 0x47d   : > { %v1675_v19 = vsel %vm527_vm2, %v1654_v38, 0 }
 0x47e   : > { %2390 = vmatprep.mubr.msk.bf16.mxu1 %vm379_vm1, %v999_v22 }
 0x47f   : > { %2391 = vmatmul.mubr.msk.bf16.gmra.mrb[28].mxu1 %vm379_vm1, %v1000_v26 }
 0x480   : > { %2422 = vmatprep.mubr.msk.bf16.mxu1 %vm527_vm2, %v1265_v39  ;;  %v1658_v24 = vpop.permute.xlu1 %1657 }
 0x481   : > { %v1681_v48 = vsel %vm527_vm2, %v1658_v24, 0 }
 0x484   : > { %v1646_v52 = vpop.permute.xlu1 %1645 }
 0x487   : > { %2423 = vmatmul.mubr.msk.bf16.vlgmr.msra.gmra.mrb[32].mxu1 %vm527_vm2, %v1267_v30 }
 0x488   : > { %2457 = vmatpush3.bf16.xpose.msra.mxu1 %v1672_v20  ;;  %2426 = vmatprep.mubr.msk.bf16.mxu1 %vm527_vm2, %v1269_v45  ;;  %v1197_v20 = vsel %vm1115_vm3, %v3059_v51, 0 }
 0x489   : > { %2538 = vmatprep.subr.msk.bf16.mxu1 %vm527_vm2, %v1654_v38 }
 0x48d   : > { %981 = vadd.xlane.f32.xlu1 %v980_v25 }
 0x48f   : > { %2427 = vmatmul.mubr.msk.bf16.gmra.mrb[36].mxu1 %vm527_vm2, %v1271_v33 }
 0x490   : > { %2459 = vmatpush3.bf16.xpose.msra.mxu1 %v1675_v19  ;;  %2464 = vmatprep.mubr.msk.bf16.mxu1 %vm527_vm2, %v1644_v43 }
 0x491   : > { %2539 = vmatprep.subr.msk.bf16.mxu1 %vm527_vm2, %v1656_v41 }
 0x498   : > { %2461 = vmatpush3.bf16.xpose.msra.mxu1 %v1678_v44 }
 0x499   : > { %2540 = vmatprep.subr.msk.bf16.mxu1 %vm527_vm2, %v1658_v24 }
 0x4a0   : > { %2463 = vmatpush3.bf16.xpose.msra.mxu1 %v1681_v48 }
 0x4a7   : > { %2465 = vmatmul.mubr.msk.bf16.vlgmr.msra.gmra.mrb[40].mxu1 %vm527_vm2, %v1646_v52 }
 0x4a8   : > { %2468 = vmatprep.mubr.msk.bf16.mxu1 %vm527_vm2, %v1648_v53 }
 0x4af   : > { %2469 = vmatmul.mubr.msk.bf16.gmra.mrb[44].mxu1 %vm527_vm2, %v1650_v54 }
 0x4b5   : > { %v668_v55 = vpop.xlane.xlu1 %667 }
 0x4b6   : > { %2617 = vrcp.f32 %v668_v55 }
 0x4b9   : > { %v671_v56 = vpop.xlane.xlu1 %670 }
 0x4ba   : > { %2619 = vrcp.f32 %v671_v56 }
 0x4bd   : > { %v674_v57 = vpop.xlane.xlu1 %673 }
 0x4be   : > { %2621 = vrcp.f32 %v674_v57 }
 0x4c0   : > { %v2618_v58 = vpop.eup %2617 }
 0x4c1   : > { %v677_v59 = vpop.xlane.xlu1 %676  ;;  %v3067_v60 = vmul.f32 %v2618_v58, %v2944_v1 }
 0x4c2   : > { %2623 = vrcp.f32 %v677_v59 }
 0x4c4   : > { %v2620_v61 = vpop.eup %2619 }
 0x4c5   : > { %v680_v34 = vpop.xlane.xlu1 %679  ;;  %v3070_v62 = vmul.f32 %v2620_v61, %v2948_v3 }
 0x4c6   : > { %2625 = vrcp.f32 %v680_v34 }
 0x4c7   : > { %v803_v63 = vpack.c.bf16 %v3070_v62, %v3067_v60 }
 0x4c8   : > { %v2622_v8 = vpop.eup %2621 }
 0x4c9   : > { %v3075_v9 = vmul.f32 %v2622_v8, %v2942_v0  ;;  %v683_v10 = vpop.xlane.xlu1 %682 }
 0x4ca   : > { %2627 = vrcp.f32 %v683_v10 }
 0x4cc   : > { %v2624_v35 = vpop.eup %2623 }
 0x4cd   : > { %v3078_v1 = vmul.f32 %v2624_v35, %v2946_v2  ;;  %v686_v11 = vpop.xlane.xlu1 %685 }
 0x4ce   : > { %2629 = vrcp.f32 %v686_v11 }
 0x4cf   : > { %v804_v3 = vpack.c.bf16 %v3078_v1, %v3075_v9 }
 0x4d0   : > { %v2626_v12 = vpop.eup %2625 }
 0x4d1   : > { %v689_v13 = vpop.xlane.xlu1 %688  ;;  %v3083_v14 = vmul.f32 %v2626_v12, %v2952_v5  ;;  %v970_v27 = vpop.xlane.xlu0 %969 }
 0x4d2   : > { %2631 = vrcp.f32 %v689_v13 }
 0x4d3   : > { %2633 = vrcp.f32 %v970_v27 }
 0x4d4   : > { %v2628_v15 = vpop.eup %2627 }
 0x4d5   : > { %v3086_v0 = vmul.f32 %v2628_v15, %v2956_v7  ;;  %v973_v23 = vpop.xlane.xlu1 %972 }
 0x4d6   : > { %2635 = vrcp.f32 %v973_v23 }
 0x4d7   : > { %v805_v16 = vpack.c.bf16 %v3086_v0, %v3083_v14 }
 0x4d8   : > { %v2630_v2 = vpop.eup %2629 }
 0x4d9   : > { %v3091_v17 = vmul.f32 %v2630_v2, %v2950_v4  ;;  %v967_v26 = vpop.xlane.xlu1 %966 }
 0x4dc   : > { %v2632_v18 = vpop.eup %2631 }
 0x4dd   : > { %v3094_v21 = vmul.f32 %v2632_v18, %v2954_v6  ;;  %v976_v28 = vpop.xlane.xlu1 %975  ;;  %v2634_v7 = vpop.eup %2633 }
 0x4de   : > { %2637 = vrcp.f32 %v976_v28 }
 0x4df   : > { %v806_v5 = vpack.c.bf16 %v3094_v21, %v3091_v17  ;;  %2639 = vrcp.f32 %v967_v26 }
 0x4e0   : > { %v2636_v45 = vpop.eup %2635 }
 0x4e1   : > { %v985_v41 = vpop.xlane.xlu1 %984 }
 0x4e2   : > { %v988_v46 = vpop.xlane.xlu0 %987  ;;  %2641 = vrcp.f32 %v985_v41 }
 0x4e3   : > { %2643 = vrcp.f32 %v988_v46 }
 0x4e5   : > { %v979_v25 = vpop.xlane.xlu1 %978 }
 0x4e6   : > { %v1454_v38 = vpop.permute.xlu0 %1453  ;;  %2645 = vrcp.f32 %v979_v25 }
 0x4e8   : > { %v2638_v29 = vpop.eup %2637 }
 0x4e9   : > { %v2640_v31 = vpop.eup %2639  ;;  %v1456_v43 = vpop.permute.xlu1 %1455 }
 0x4ec   : > { %v2642_v44 = vpop.eup %2641 }
 0x4ed   : > { %v2644_v48 = vpop.eup %2643 }
 0x4f0   : > { %v2646_v50 = vpop.eup %2645 }
 0x51a   : > { %v982_v19 = vpop.xlane.xlu1 %981 }
 0x51b   : > { %2647 = vrcp.f32 %v982_v19 }
 0x51d   : > { %v2388_v39 = vpop.f32.mrb[24].mxu1 }
 0x51e   : > { %v1059_v4 = vpop.f32.mrb[25].mxu1  ;;  %v1092_v6 = vmul.f32 %v2636_v45, %v2388_v39 }
 0x51f   : > { %v2389_v47 = vpop.f32.mrb[26].mxu1  ;;  %v1090_v37 = vmul.f32 %v2640_v31, %v1059_v4 }
 0x520   : > { %v1093_v32 = vmul.f32 %v2638_v29, %v2389_v47  ;;  %v1062_v36 = vpop.f32.mrb[27].mxu1 }
 0x521   : > { %v1091_v30 = vmul.f32 %v2634_v7, %v1062_v36 }
 0x522   : > { %v1099_v22 = vpack.c.bf16 %v1093_v32, %v1092_v6 }
 0x523   : > { %v1098_v33 = vpack.c.bf16 %v1091_v30, %v1090_v37 }
 0x525   : > { %2396 = vmatprep.mubr.msk.bf16.mxu0 %vm527_vm2, %v1098_v33  ;;  %v2648_v52 = vpop.eup %2647 }
 0x526   : > { %2397 = vmatmul.mubr.msk.bf16.vlgmr.msra.gmra.mrb[16].mxu0 %vm527_vm2, %v1099_v22 }
 0x527   : > { %2405 = vmatpush3.bf16.msra.mxu0 %v1197_v20 }
 0x528   : > { %2430 = vmatprep.subr.bf16.mxu0 %v1454_v38 }
 0x552   : > { %v2392_v24 = vpop.f32.mrb[28].mxu1 }
 0x553   : > { %v1075_v49 = vpop.f32.mrb[29].mxu1  ;;  %v1096_v53 = vmul.f32 %v2642_v44, %v2392_v24 }
 0x554   : > { %v2393_v51 = vpop.f32.mrb[30].mxu1  ;;  %v1094_v56 = vmul.f32 %v2646_v50, %v1075_v49 }
 0x555   : > { %v1097_v54 = vmul.f32 %v2644_v48, %v2393_v51  ;;  %v1078_v55 = vpop.f32.mrb[31].mxu1 }
 0x556   : > { %v1095_v57 = vmul.f32 %v2648_v52, %v1078_v55 }
 0x557   : > { %v1101_v58 = vpack.c.bf16 %v1097_v54, %v1096_v53 }
 0x558   : > { %v1100_v59 = vpack.c.bf16 %v1095_v57, %v1094_v56 }
 0x55a   : > { %2400 = vmatprep.mubr.msk.bf16.mxu0 %vm527_vm2, %v1100_v59  ;;  %v2424_v61 = vpop.f32.mrb[32].mxu1 }
 0x55b   : > { %2401 = vmatmul.mubr.msk.bf16.gmra.mrb[20].mxu0 %vm527_vm2, %v1101_v58  ;;  %v3104_v34 = vpop.f32.mrb[33].mxu1  ;;  %v1375_v8 = vsel %vm379_vm1, %v2424_v61, -inf }
 0x55c   : > { %1376 = vmax.xlane.f32.xlu0 %v1375_v8  ;;  %2406 = vmatprep.mubr.msk.bf16.mxu0 %vm527_vm2, %v803_v63  ;;  %v2425_v10 = vpop.f32.mrb[34].mxu1  ;;  %v1369_v12 = vsel %vm379_vm1, %v3104_v34, -inf }
 0x55d   : > { %v3111_v35 = vpop.f32.mrb[35].mxu1  ;;  %v1378_v11 = vsel %vm379_vm1, %v2425_v10, -inf }
 0x55e   : > { %1379 = vmax.xlane.f32.xlu1 %v1378_v11  ;;  %v1372_v13 = vsel %vm379_vm1, %v3111_v35, -inf }
 0x560   : > { %1370 = vmax.xlane.f32.xlu0 %v1369_v12 }
 0x562   : > { %1373 = vmax.xlane.f32.xlu1 %v1372_v13  ;;  %v3118_v15 = vpop.f32.mrb[36].mxu1 }
 0x563   : > { %2407 = vmatmul.mubr.msk.bf16.vlgmr.msra.gmra.mrb[16].mxu0 %vm527_vm2, %v804_v3  ;;  %v3124_v60 = vpop.f32.mrb[37].mxu1  ;;  %v1387_v62 = vsel %vm379_vm1, %v3118_v15, -inf }
 0x564   : > { %2431 = vmatpush3.bf16.msra.mxu0 %v1454_v38  ;;  %1388 = vmax.xlane.f32.xlu0 %v1387_v62  ;;  %v2429_v63 = vpop.f32.mrb[38].mxu1  ;;  %v1381_v1 = vsel %vm379_vm1, %v3124_v60, -inf }
 0x565   : > { %2410 = vmatprep.mubr.msk.bf16.mxu0 %vm527_vm2, %v805_v16  ;;  %2432 = vmatprep.subr.bf16.mxu0 %v1456_v43  ;;  %v3132_v2 = vpop.f32.mrb[39].mxu1  ;;  %v1390_v9 = vsel %vm379_vm1, %v2429_v63, -inf }
 0x566   : > { %1391 = vmax.xlane.f32.xlu1 %v1390_v9  ;;  %v1384_v3 = vsel %vm379_vm1, %v3132_v2, -inf  ;;  %v1554_v9 = vld [vmem:[%s3309_s3 + $0x8] sm:$0xf] }
 0x568   : > { %2433 = vmatpush3.bf16.msra.mxu0 %v1456_v43  ;;  %1382 = vmax.xlane.f32.xlu0 %v1381_v1  ;;  %v1568_v1 = vsel %vm1115_vm3, %v1554_v9, 0 }
 0x56a   : > { %1385 = vmax.xlane.f32.xlu1 %v1384_v3  ;;  %v2714_v3 = vld [vmem:[#allocation2] sm:$0xff] }
 0x56b   : > { %2411 = vmatmul.mubr.msk.bf16.gmra.mrb[20].mxu0 %vm527_vm2, %v806_v5 }
 0x57a   : > { %v3143_v14 = vpop.f32.mrb[40].mxu1 }
 0x57b   : > { %v3145_v0 = vpop.f32.mrb[41].mxu1  ;;  %1457 = vrot.lane.b32.xlu1 %v2851_v42, %s2746_s14  ;;  %v1754_v5 = vsel %vm379_vm1, %v3143_v14, -inf }
 0x57c   : > { %v3149_v16 = vpop.f32.mrb[42].mxu1  ;;  %v1748_v27 = vsel %vm379_vm1, %v3145_v0, -inf }
 0x57d   : > { %v3151_v18 = vpop.f32.mrb[43].mxu1  ;;  %v1757_v42 = vsel %vm379_vm1, %v3149_v16, -inf }
 0x57e   : > { %1459 = vrot.lane.b32.xlu0 %v2846_v40, %s2746_s14  ;;  %v1751_v40 = vsel %vm379_vm1, %v3151_v18, -inf }
 0x582   : > { %v3155_v23 = vpop.f32.mrb[44].mxu1 }
 0x583   : > { %v3157_v26 = vpop.f32.mrb[45].mxu1  ;;  %v1766_v28 = vsel %vm379_vm1, %v3155_v23, -inf }
 0x584   : > { %v3159_v17 = vpop.f32.mrb[46].mxu1  ;;  %v1760_v39 = vsel %vm379_vm1, %v3157_v26, -inf }
 0x585   : > { %v3161_v21 = vpop.f32.mrb[47].mxu1  ;;  %v1769_v7 = vsel %vm379_vm1, %v3159_v17, -inf }
 0x586   : > { %v1763_v45 = vsel %vm379_vm1, %v3161_v21, -inf }
 0x59d   : > { %1755 = vmax.xlane.f32.xlu0 %v1754_v5  ;;  %v2715_v5 = vld [vmem:[#allocation2 + $0x18] sm:$0xff] }
 0x59f   : > { %1758 = vmax.xlane.f32.xlu1 %v1757_v42 }
 0x5a1   : > { %1749 = vmax.xlane.f32.xlu0 %v1748_v27 }
 0x5a3   : > { %1752 = vmax.xlane.f32.xlu1 %v1751_v40 }
 0x5a5   : > { %1767 = vmax.xlane.f32.xlu0 %v1766_v28 }
 0x5a7   : > { %1770 = vmax.xlane.f32.xlu1 %v1769_v7 }
 0x5a9   : > { %1761 = vmax.xlane.f32.xlu0 %v1760_v39 }
 0x5ab   : > { %1764 = vmax.xlane.f32.xlu1 %v1763_v45 }
 0x5e9   : > { %v1377_v4 = vpop.xlane.xlu0 %1376 }
 0x5ea   : > { %v1395_v29 = vsub.f32 %v2424_v61, %v1377_v4 }
 0x5eb   : > { %v1380_v47 = vpop.xlane.xlu1 %1379 }
 0x5ec   : > { %v1405_v31 = vmul.f32 1.442695, %v1395_v29  ;;  %v1396_v6 = vsub.f32 %v2425_v10, %v1380_v47 }
 0x5ed   : > { %v1371_v32 = vpop.xlane.xlu0 %1370 }
 0x5ee   : > { %2649 = vpow2.f32 %v1405_v31  ;;  %v1407_v36 = vmul.f32 1.442695, %v1396_v6  ;;  %v1393_v46 = vsub.f32 %v3104_v34, %v1371_v32 }
 0x5ef   : > { %v1374_v37 = vpop.xlane.xlu1 %1373 }
 0x5f0   : > { %2651 = vpow2.f32 %v1407_v36  ;;  %v1401_v30 = vmul.f32 1.442695, %v1393_v46  ;;  %v1394_v22 = vsub.f32 %v3111_v35, %v1374_v37 }
 0x5f1   : > { %v1389_v33 = vpop.xlane.xlu0 %1388 }
 0x5f2   : > { %2653 = vpow2.f32 %v1401_v30  ;;  %v1403_v20 = vmul.f32 1.442695, %v1394_v22  ;;  %v1399_v38 = vsub.f32 %v3118_v15, %v1389_v33 }
 0x5f3   : > { %v1392_v41 = vpop.xlane.xlu1 %1391 }
 0x5f4   : > { %2655 = vpow2.f32 %v1403_v20  ;;  %v1413_v25 = vmul.f32 1.442695, %v1399_v38  ;;  %v1400_v43 = vsub.f32 %v2429_v63, %v1392_v41 }
 0x5f5   : > { %v1383_v19 = vpop.xlane.xlu0 %1382 }
 0x5f6   : > { %2657 = vpow2.f32 %v1413_v25  ;;  %v1415_v44 = vmul.f32 1.442695, %v1400_v43  ;;  %v1397_v24 = vsub.f32 %v3124_v60, %v1383_v19 }
 0x5f7   : > { %v1386_v48 = vpop.xlane.xlu1 %1385 }
 0x5f8   : > { %v2650_v49 = vpop.eup %2649  ;;  %2659 = vpow2.f32 %v1415_v44  ;;  %v1409_v50 = vmul.f32 1.442695, %v1397_v24  ;;  %v1398_v51 = vsub.f32 %v3132_v2, %v1386_v48  ;;  %v2713_v2 = vld [vmem:[#allocation2 + $0x8] sm:$0xff] }
 0x5f9   : > { %v1423_v52 = vsel %vm379_vm1, %v2650_v49, 0.0  ;;  %v1460_v58 = vpop.permute.xlu0 %1459 }
 0x5fa   : > { %v2652_v53 = vpop.eup %2651  ;;  %2661 = vpow2.f32 %v1409_v50  ;;  %v1411_v54 = vmul.f32 1.442695, %v1398_v51  ;;  %1424 = vadd.xlane.f32.xlu0 %v1423_v52 }
 0x5fb   : > { %v1450_v55 = vpack.c.bf16 %v2652_v53, %v2650_v49  ;;  %v1458_v56 = vpop.permute.xlu1 %1457  ;;  %v1426_v35 = vsel %vm379_vm1, %v2652_v53, 0.0 }
 0x5fc   : > { %v2654_v57 = vpop.eup %2653  ;;  %2663 = vpow2.f32 %v1411_v54  ;;  %2434 = vmatprep.subr.bf16.mxu0 %v1458_v56  ;;  %v2716_v54 = vld [vmem:[#allocation2 + $0x10] sm:$0xff] }
 0x5fd   : > { %2435 = vmatpush3.bf16.msra.mxu0 %v1458_v56  ;;  %v1417_v59 = vsel %vm379_vm1, %v2654_v57, 0.0 }
 0x5fe   : > { %v2656_v61 = vpop.eup %2655  ;;  %1418 = vadd.xlane.f32.xlu1 %v1417_v59  ;;  %2436 = vmatprep.subr.bf16.mxu0 %v1460_v58 }
 0x5ff   : > { %v1420_v34 = vsel %vm379_vm1, %v2656_v61, 0.0  ;;  %v1449_v8 = vpack.c.bf16 %v2656_v61, %v2654_v57 }
 0x600   : > { %v2658_v10 = vpop.eup %2657  ;;  %1421 = vadd.xlane.f32.xlu0 %v1420_v34 }
 0x601   : > { %2437 = vmatpush3.bf16.msra.mxu0 %v1460_v58  ;;  %2438 = vmatprep.mubr.msk.bf16.mxu0 %vm379_vm1, %v1449_v8  ;;  %v1435_v12 = vsel %vm379_vm1, %v2658_v10, 0.0 }
 0x602   : > { %v2660_v11 = vpop.eup %2659  ;;  %1427 = vadd.xlane.f32.xlu1 %v1426_v35  ;;  %2536 = vmatprep.subr.msk.bf16.mxu0 %vm1115_vm3, %v1554_v9 }
 0x603   : > { %v1452_v13 = vpack.c.bf16 %v2660_v11, %v2658_v10  ;;  %v1438_v30 = vsel %vm379_vm1, %v2660_v11, 0.0 }
 0x604   : > { %v2662_v15 = vpop.eup %2661  ;;  %1436 = vadd.xlane.f32.xlu0 %v1435_v12  ;;  %2439 = vmatmul.mubr.msk.bf16.vlgmr.msra.gmra.mrb[24].mxu0 %vm379_vm1, %v1450_v55 }
 0x605   : > { %v1429_v62 = vsel %vm379_vm1, %v2662_v15, 0.0  ;;  %2447 = vmatpush3.bf16.msra.mxu0 %v1568_v1 }
 0x606   : > { %v2664_v60 = vpop.eup %2663 }
 0x607   : > { %v1451_v63 = vpack.c.bf16 %v2664_v60, %v2662_v15  ;;  %v1432_v38 = vsel %vm379_vm1, %v2664_v60, 0.0 }
 0x608   : > { %1430 = vadd.xlane.f32.xlu0 %v1429_v62 }
 0x609   : > { %2442 = vmatprep.mubr.msk.bf16.mxu0 %vm379_vm1, %v1451_v63 }
 0x60c   : > { %2443 = vmatmul.mubr.msk.bf16.gmra.mrb[28].mxu0 %vm379_vm1, %v1452_v13 }
 0x613   : > { %1834 = vrot.lane.b32.xlu1 %v2713_v2, %s2747_s23 }
 0x61e   : > { %1832 = vrot.lane.b32.xlu0 %v2714_v3, %s2747_s23 }
 0x622   : > { %1838 = vrot.lane.b32.xlu0 %v2715_v5, %s2747_s23 }
 0x62a   : > { %v1756_v42 = vpop.xlane.xlu0 %1755 }
 0x62b   : > { %v1774_v27 = vsub.f32 %v3143_v14, %v1756_v42 }
 0x62c   : > { %v1759_v40 = vpop.xlane.xlu1 %1758 }
 0x62d   : > { %v1784_v28 = vmul.f32 1.442695, %v1774_v27  ;;  %v1775_v7 = vsub.f32 %v3149_v16, %v1759_v40 }
 0x62e   : > { %v1750_v39 = vpop.xlane.xlu0 %1749 }
 0x62f   : > { %v1786_v45 = vmul.f32 1.442695, %v1775_v7  ;;  %v1772_v4 = vsub.f32 %v3145_v0, %v1750_v39  ;;  %2665 = vpow2.f32 %v1784_v28 }
 0x630   : > { %v1753_v29 = vpop.xlane.xlu1 %1752 }
 0x631   : > { %2667 = vpow2.f32 %v1786_v45  ;;  %v1780_v47 = vmul.f32 1.442695, %v1772_v4  ;;  %v1773_v31 = vsub.f32 %v3151_v18, %v1753_v29 }
 0x632   : > { %v1768_v6 = vpop.xlane.xlu0 %1767 }
 0x633   : > { %v1782_v32 = vmul.f32 1.442695, %v1773_v31  ;;  %v1778_v36 = vsub.f32 %v3155_v23, %v1768_v6  ;;  %2669 = vpow2.f32 %v1780_v47 }
 0x634   : > { %v1771_v14 = vpop.xlane.xlu1 %1770 }
 0x635   : > { %2671 = vpow2.f32 %v1782_v32  ;;  %v1792_v46 = vmul.f32 1.442695, %v1778_v36  ;;  %v1779_v16 = vsub.f32 %v3159_v17, %v1771_v14 }
 0x636   : > { %v1762_v37 = vpop.xlane.xlu0 %1761 }
 0x637   : > { %v1794_v0 = vmul.f32 1.442695, %v1779_v16  ;;  %v1776_v22 = vsub.f32 %v3157_v26, %v1762_v37  ;;  %1439 = vadd.xlane.f32.xlu1 %v1438_v30  ;;  %2673 = vpow2.f32 %v1792_v46 }
 0x638   : > { %v1765_v33 = vpop.xlane.xlu1 %1764 }
 0x639   : > { %2675 = vpow2.f32 %v1794_v0  ;;  %v1788_v18 = vmul.f32 1.442695, %v1776_v22  ;;  %v1777_v20 = vsub.f32 %v3161_v21, %v1765_v33  ;;  %v3211_v23 = vpop.eup %2665 }
 0x63a   : > { %v1802_v48 = vsel %vm379_vm1, %v3211_v23, 0.0 }
 0x63b   : > { %v3214_v41 = vpop.eup %2667  ;;  %2677 = vpow2.f32 %v1788_v18  ;;  %v1790_v17 = vmul.f32 1.442695, %v1777_v20  ;;  %1433 = vadd.xlane.f32.xlu1 %v1432_v38  ;;  %v1933_v20 = vld [vmem:[%s3309_s3 + $0xc] sm:$0xf] }
 0x63c   : > { %v1829_v25 = vpack.c.bf16 %v3214_v41, %v3211_v23  ;;  %v1805_v57 = vsel %vm379_vm1, %v3214_v41, 0.0  ;;  %v1947_v38 = vsel %vm1115_vm3, %v1933_v20, 0 }
 0x63d   : > { %2679 = vpow2.f32 %v1790_v17  ;;  %v3218_v26 = vpop.eup %2669 }
 0x63e   : > { %v1796_v56 = vsel %vm379_vm1, %v3218_v26, 0.0 }
 0x63f   : > { %v3220_v43 = vpop.eup %2671 }
 0x640   : > { %v1799_v21 = vsel %vm379_vm1, %v3220_v43, 0.0  ;;  %v1828_v19 = vpack.c.bf16 %v3220_v43, %v3218_v26 }
 0x641   : > { %1800 = vadd.xlane.f32.xlu0 %v1799_v21  ;;  %v3226_v44 = vpop.eup %2673 }
 0x642   : > { %v1814_v55 = vsel %vm379_vm1, %v3226_v44, 0.0 }
 0x643   : > { %v3228_v24 = vpop.eup %2675 }
 0x644   : > { %v1831_v49 = vpack.c.bf16 %v3228_v24, %v3226_v44  ;;  %v1817_v59 = vsel %vm379_vm1, %v3228_v24, 0.0 }
 0x645   : > { %v3234_v50 = vpop.eup %2677  ;;  %1803 = vadd.xlane.f32.xlu0 %v1802_v48 }
 0x646   : > { %v1808_v52 = vsel %vm379_vm1, %v3234_v50, 0.0 }
 0x647   : > { %v3236_v51 = vpop.eup %2679 }
 0x648   : > { %v1830_v53 = vpack.c.bf16 %v3236_v51, %v3234_v50  ;;  %v1811_v58 = vsel %vm379_vm1, %v3236_v51, 0.0 }
 0x649   : > { %1809 = vadd.xlane.f32.xlu0 %v1808_v52 }
 0x64c   : > { %1836 = vrot.lane.b32.xlu1 %v2716_v54, %s2747_s23 }
 0x64d   : > { %1815 = vadd.xlane.f32.xlu0 %v1814_v55 }
 0x670   : > { %1797 = vadd.xlane.f32.xlu1 %v1796_v56 }
 0x674   : > { %1806 = vadd.xlane.f32.xlu1 %v1805_v57 }
 0x678   : > { %1812 = vadd.xlane.f32.xlu1 %v1811_v58 }
 0x67c   : > { %1818 = vadd.xlane.f32.xlu1 %v1817_v59 }
 0x687   : > { %v1425_v61 = vpop.xlane.xlu0 %1424 }
 0x688   : > { %2681 = vrcp.f32 %v1425_v61 }
 0x68b   : > { %v1419_v11 = vpop.xlane.xlu1 %1418 }
 0x68c   : > { %2683 = vrcp.f32 %v1419_v11 }
 0x68d   : > { %v1422_v34 = vpop.xlane.xlu0 %1421 }
 0x68f   : > { %v1428_v12 = vpop.xlane.xlu1 %1427 }
 0x690   : > { %2685 = vrcp.f32 %v1428_v12 }
 0x691   : > { %v1437_v8 = vpop.xlane.xlu0 %1436  ;;  %2687 = vrcp.f32 %v1422_v34 }
 0x692   : > { %2689 = vrcp.f32 %v1437_v8  ;;  %v2682_v62 = vpop.eup %2681 }
 0x693   : > { %v1835_v13 = vpop.permute.xlu1 %1834 }
 0x695   : > { %v1431_v10 = vpop.xlane.xlu0 %1430 }
 0x696   : > { %2691 = vrcp.f32 %v1431_v10  ;;  %v2684_v2 = vpop.eup %2683 }
 0x699   : > { %v1833_v35 = vpop.permute.xlu0 %1832 }
 0x69a   : > { %2472 = vmatprep.subr.bf16.mxu0 %v1833_v35  ;;  %v2686_v3 = vpop.eup %2685 }
 0x69b   : > { %v2688_v42 = vpop.eup %2687 }
 0x69c   : > { %v2690_v4 = vpop.eup %2689 }
 0x69d   : > { %v1839_v18 = vpop.permute.xlu0 %1838 }
 0x6a0   : > { %v2692_v47 = vpop.eup %2691 }
 0x6c4   : > { %v1440_v15 = vpop.xlane.xlu1 %1439 }
 0x6c5   : > { %2693 = vrcp.f32 %v1440_v15 }
 0x6c8   : > { %v1434_v60 = vpop.xlane.xlu1 %1433 }
 0x6c9   : > { %2695 = vrcp.f32 %v1434_v60 }
 0x6cc   : > { %v1837_v22 = vpop.permute.xlu1 %1836 }
 0x6ce   : > { %v1801_v17 = vpop.xlane.xlu0 %1800 }
 0x6cf   : > { %v2694_v32 = vpop.eup %2693  ;;  %2697 = vrcp.f32 %v1801_v17 }
 0x6d2   : > { %v1804_v43 = vpop.xlane.xlu0 %1803 }
 0x6d3   : > { %v2696_v46 = vpop.eup %2695  ;;  %2699 = vrcp.f32 %v1804_v43 }
 0x6d7   : > { %v2440_v63 = vpop.f32.mrb[24].mxu0 }
 0x6d8   : > { %v1544_v9 = vmul.f32 %v2682_v62, %v2440_v63  ;;  %v1511_v1 = vpop.f32.mrb[25].mxu0 }
 0x6d9   : > { %v2441_v5 = vpop.f32.mrb[26].mxu0  ;;  %v1542_v28 = vmul.f32 %v2684_v2, %v1511_v1  ;;  %v2698_v48 = vpop.eup %2697  ;;  %v2205_v1 = vld [vmem:[%s3310_s4] ss:$0 sm:$0xff] }
 0x6da   : > { %v1545_v27 = vmul.f32 %v2686_v3, %v2441_v5  ;;  %v1514_v40 = vpop.f32.mrb[27].mxu0 }
 0x6db   : > { %v1543_v7 = vmul.f32 %v2688_v42, %v1514_v40 }
 0x6dc   : > { %v1551_v39 = vpack.c.bf16 %v1545_v27, %v1544_v9 }
 0x6dd   : > { %v1550_v45 = vpack.c.bf16 %v1543_v7, %v1542_v28  ;;  %v2700_v44 = vpop.eup %2699 }
 0x6df   : > { %v2444_v29 = vpop.f32.mrb[28].mxu0  ;;  %2448 = vmatprep.mubr.msk.bf16.mxu0 %vm527_vm2, %v1550_v45 }
 0x6e0   : > { %v1548_v31 = vmul.f32 %v2690_v4, %v2444_v29  ;;  %v1527_v6 = vpop.f32.mrb[29].mxu0  ;;  %2449 = vmatmul.mubr.msk.bf16.vlgmr.msra.gmra.mrb[16].mxu0 %vm527_vm2, %v1551_v39 }
 0x6e1   : > { %v1546_v36 = vmul.f32 %v2692_v47, %v1527_v6  ;;  %2473 = vmatpush3.bf16.msra.mxu0 %v1833_v35  ;;  %v2445_v14 = vpop.f32.mrb[30].mxu0 }
 0x6e2   : > { %v1549_v16 = vmul.f32 %v2694_v32, %v2445_v14  ;;  %2474 = vmatprep.subr.bf16.mxu0 %v1835_v13  ;;  %v1530_v37 = vpop.f32.mrb[31].mxu0 }
 0x6e3   : > { %v1547_v30 = vmul.f32 %v2696_v46, %v1530_v37 }
 0x6e4   : > { %v1553_v0 = vpack.c.bf16 %v1549_v16, %v1548_v31 }
 0x6e5   : > { %v1552_v33 = vpack.c.bf16 %v1547_v30, %v1546_v36  ;;  %2475 = vmatpush3.bf16.msra.mxu0 %v1835_v13 }
 0x6e6   : > { %2476 = vmatprep.subr.bf16.mxu0 %v1837_v22 }
 0x6e7   : > { %2452 = vmatprep.mubr.msk.bf16.mxu0 %vm527_vm2, %v1552_v33 }
 0x6e8   : > { %2453 = vmatmul.mubr.msk.bf16.gmra.mrb[20].mxu0 %vm527_vm2, %v1553_v0 }
 0x6e9   : > { %2477 = vmatpush3.bf16.msra.mxu0 %v1837_v22  ;;  %2480 = vmatprep.mubr.msk.bf16.mxu0 %vm379_vm1, %v1828_v19  ;;  %v1810_v19 = vpop.xlane.xlu0 %1809 }
 0x6ea   : > { %2478 = vmatprep.subr.bf16.mxu0 %v1839_v18 }
 0x6ed   : > { %2479 = vmatpush3.bf16.msra.mxu0 %v1839_v18  ;;  %v1816_v41 = vpop.xlane.xlu0 %1815 }
 0x6ee   : > { %2541 = vmatprep.subr.msk.bf16.mxu0 %vm1115_vm3, %v1933_v20 }
 0x6f0   : > { %2481 = vmatmul.mubr.msk.bf16.vlgmr.msra.gmra.mrb[32].mxu0 %vm379_vm1, %v1829_v25 }
 0x6f1   : > { %2484 = vmatprep.mubr.msk.bf16.mxu0 %vm379_vm1, %v1830_v53  ;;  %2489 = vmatpush3.bf16.msra.mxu0 %v1947_v38 }
 0x6f8   : > { %2485 = vmatmul.mubr.msk.bf16.gmra.mrb[36].mxu0 %vm379_vm1, %v1831_v49 }
 0x6fd   : > { %v1798_v26 = vpop.xlane.xlu1 %1797 }
 0x701   : > { %v1807_v21 = vpop.xlane.xlu1 %1806 }
 0x702   : > { %2701 = vrcp.f32 %v1807_v21 }
 0x703   : > { %2703 = vrcp.f32 %v1798_v26 }
 0x704   : > { %2705 = vrcp.f32 %v1810_v19 }
 0x705   : > { %v1813_v23 = vpop.xlane.xlu1 %1812  ;;  %2707 = vrcp.f32 %v1816_v41 }
 0x709   : > { %v1819_v25 = vpop.xlane.xlu1 %1818 }
 0x70a   : > { %2709 = vrcp.f32 %v1819_v25 }
 0x70b   : > { %2711 = vrcp.f32 %v1813_v23 }
 0x70c   : > { %v2702_v49 = vpop.eup %2701 }
 0x70d   : > { %v2704_v52 = vpop.eup %2703 }
 0x70e   : > { %v2706_v61 = vpop.eup %2705 }
 0x70f   : > { %v2708_v8 = vpop.eup %2707 }
 0x714   : > { %v2710_v35 = vpop.eup %2709 }
 0x715   : > { %v2712_v12 = vpop.eup %2711 }
 0x7c3   : > { %v2482_v50 = vpop.f32.mrb[32].mxu0 }
 0x7c4   : > { %v1890_v24 = vpop.f32.mrb[33].mxu0  ;;  %v1923_v53 = vmul.f32 %v2700_v44, %v2482_v50 }
 0x7c5   : > { %v2483_v51 = vpop.f32.mrb[34].mxu0  ;;  %v1921_v56 = vmul.f32 %v2704_v52, %v1890_v24 }
 0x7c6   : > { %v1924_v54 = vmul.f32 %v2702_v49, %v2483_v51  ;;  %v1893_v55 = vpop.f32.mrb[35].mxu0 }
 0x7c7   : > { %v1922_v57 = vmul.f32 %v2698_v48, %v1893_v55 }
 0x7c8   : > { %v1930_v58 = vpack.c.bf16 %v1924_v54, %v1923_v53 }
 0x7c9   : > { %v1929_v59 = vpack.c.bf16 %v1922_v57, %v1921_v56 }
 0x7cb   : > { %v2486_v34 = vpop.f32.mrb[36].mxu0  ;;  %2490 = vmatprep.mubr.msk.bf16.mxu0 %vm527_vm2, %v1929_v59 }
 0x7cc   : > { %v1906_v10 = vpop.f32.mrb[37].mxu0  ;;  %2491 = vmatmul.mubr.msk.bf16.vlgmr.msra.gmra.mrb[16].mxu0 %vm527_vm2, %v1930_v58  ;;  %v1927_v13 = vmul.f32 %v2708_v8, %v2486_v34 }
 0x7cd   : > { %v2487_v11 = vpop.f32.mrb[38].mxu0  ;;  %v1925_v62 = vmul.f32 %v2706_v61, %v1906_v10 }
 0x7ce   : > { %v1928_v15 = vmul.f32 %v2710_v35, %v2487_v11  ;;  %v1909_v60 = vpop.f32.mrb[39].mxu0 }
 0x7cf   : > { %v1926_v63 = vmul.f32 %v2712_v12, %v1909_v60 }
 0x7d0   : > { %v1932_v2 = vpack.c.bf16 %v1928_v15, %v1927_v13 }
 0x7d1   : > { %v1931_v9 = vpack.c.bf16 %v1926_v63, %v1925_v62 }
 0x7d3   : > { %2494 = vmatprep.mubr.msk.bf16.mxu0 %vm527_vm2, %v1931_v9 }
 0x7d4   : > { %2495 = vmatmul.mubr.msk.bf16.gmra.mrb[20].mxu0 %vm527_vm2, %v1932_v2 }
 0x89f   : > { %v2492_v3 = vpop.f32.mrb[16].mxu0 }
 0x8a0   : > { %v2031_v5 = vadd.f32 %v2492_v3, %v2205_v1  ;;  %v1983_v42 = vpop.f32.mrb[17].mxu0 }
 0x8a1   : > { %v2029_v27 = vadd.f32 %v2205_v1, %v1983_v42  ;;  %v2493_v40 = vpop.f32.mrb[18].mxu0 }
 0x8a2   : > { %2039 = vst.msk [vmem:[%s246_s8 + $0x10] sm:$0xff] %vm297_vm0, %v2031_v5  ;;  %v2032_v28 = vadd.f32 %v2493_v40, %v2205_v1  ;;  %v1986_v7 = vpop.f32.mrb[19].mxu0 }
 0x8a3   : > { %2037 = vst.msk [vmem:[%s246_s8] sm:$0xff] %vm297_vm0, %v2029_v27  ;;  %v2030_v39 = vadd.f32 %v2205_v1, %v1986_v7 }
 0x8a4   : > { %2040 = vst.msk [vmem:[%s246_s8 + $0x18] sm:$0xff] %vm297_vm0, %v2032_v28 }
 0x8a5   : > { %2038 = vst.msk [vmem:[%s246_s8 + $0x8] sm:$0xff] %vm297_vm0, %v2030_v39 }
 0x8a7   : > { %v2496_v45 = vpop.f32.mrb[20].mxu0 }
 0x8a8   : > { %v2035_v4 = vadd.f32 %v2496_v45, %v2205_v1  ;;  %v1999_v29 = vpop.f32.mrb[21].mxu0 }
 0x8a9   : > { %v2033_v47 = vadd.f32 %v2205_v1, %v1999_v29  ;;  %v2497_v31 = vpop.f32.mrb[22].mxu0 }
 0x8aa   : > { %2043 = vst.msk [vmem:[%s246_s8 + $0x30] sm:$0xff] %vm297_vm0, %v2035_v4  ;;  %v2036_v6 = vadd.f32 %v2497_v31, %v2205_v1  ;;  %v2002_v32 = vpop.f32.mrb[23].mxu0 }
 0x8ab   : > { %2041 = vst.msk [vmem:[%s246_s8 + $0x20] sm:$0xff] %vm297_vm0, %v2033_v47  ;;  %v2034_v36 = vadd.f32 %v2205_v1, %v2002_v32 }
 0x8ac   : > { %2044 = vst.msk [vmem:[%s246_s8 + $0x38] sm:$0xff] %vm297_vm0, %v2036_v6 }
 0x8ad   : > { %2042 = vst.msk [vmem:[%s246_s8 + $0x28] sm:$0xff] %vm297_vm0, %v2034_v36 }
 0x8ae PF: > { %s15_s20 = sadd.s32 1, %s2739_s20   ;;  %s3312_s18 = smov %s2735_s19 }
 0x8af   : > { %p12_p5 = scmp.ge.s32.totalorder %s15_s20, 4   ;;  %s3313_s19 = smov %s3315_s21 }
 0x8b1   :  { %14 = sbr.rel (!%p12_p5) target bundleno = 2 (0x2), region = 75 }

</bundles_post_ra>
